<compile_context>
chip_gen: v7x
topology: tpu7x:2x2x1
jax: 0.10.0
libtpu: 0.0.40
codegen_flags: <defaults>
</compile_context>

<pallas_src>
import math
import functools

import jax
import jax.numpy as jnp
from jax import lax
from jax.experimental import pallas as pl
from jax.experimental.pallas import tpu as pltpu

WORLD_SIZE = 4
RANK = 0

# Cap on row DMAs in flight per grid step (gather path): keeps clear of HW DMA
# queue limits while still overlapping the HBM row fetches.
_MAX_INFLIGHT_DMAS = 32

# Shards at or below this size stay resident in VMEM (one-hot MXU fast path).
_VMEM_WEIGHT_BYTES = 4 << 20
_VMEM_WEIGHT_ROWS = 4096


def _round_up(x: int, m: int) -> int:
    return ((x + m - 1) // m) * m


# -------- fast path: VMEM-resident weight shard, one-hot MXU gather -------- #

def _embedding_onehot_kernel(ids_ref, w_ref, o_ref, *, vocab_start):
    """o = one_hot(ids - start) @ W ; out-of-shard rows are exactly zero."""
    ids = ids_ref[...]                                   # (tb, 1) int32
    local = ids - vocab_start                            # out-of-shard -> <0 or >=pv
    pv = w_ref.shape[0]
    iota = lax.broadcasted_iota(jnp.int32, (ids.shape[0], pv), 1)
    one_hot = (local == iota).astype(w_ref.dtype)        # all-zero row when masked
    o_ref[...] = jnp.dot(
        one_hot, w_ref[...],
        preferred_element_type=jnp.float32,
        precision=lax.Precision.HIGHEST,
    ).astype(o_ref.dtype)


def _embedding_onehot(idx2d, weight, *, vocab_start, tokens_per_block):
    M, _ = idx2d.shape
    V, D = weight.shape
    kernel = functools.partial(_embedding_onehot_kernel, vocab_start=vocab_start)
    return pl.pallas_call(
        kernel,
        out_shape=jax.ShapeDtypeStruct((M, D), weight.dtype),
        grid_spec=pltpu.PrefetchScalarGridSpec(
            num_scalar_prefetch=0,
            grid=(M // tokens_per_block,),
            in_specs=[
                pl.BlockSpec((tokens_per_block, 1), lambda i: (i, 0)),  # token ids
                pl.BlockSpec((V, D), lambda i: (0, 0)),  # full shard resident in VMEM
            ],
            out_specs=pl.BlockSpec((tokens_per_block, D), lambda i: (i, 0)),
        ),
        compiler_params=pltpu.CompilerParams(
            dimension_semantics=("parallel",),   # disjoint output blocks
        ),
    )(idx2d, weight)


# -------- gather path: weight in HBM, row DMAs straight into o_ref --------- #

def _embedding_gather_kernel(idx_sm, ids_ref, w_hbm, o_ref, sem, *,
                             tokens_per_block, vocab_start, vocab_end):
    """Gather tb rows from the HBM shard directly into the output block.

    idx_sm : SMEM (M_pad,) int32 token ids (scalar prefetch)
    ids_ref: VMEM (tb, 1) int32 token ids (for the block-wide mask)
    w_hbm  : HBM  (part_vocab, dim) embedding shard
    o_ref  : VMEM (tb, dim) output block (DMA destination, no staging buffer)
    sem    : single DMA semaphore shared by every row copy of this block
    """
    base = pl.program_id(0) * tokens_per_block
    part_vocab = w_hbm.shape[0]

    # Phase 1: issue every row DMA up front (bounded in-flight window) so the
    # copies overlap each other and the previous block's output write-back.
    copies = []
    for t in range(tokens_per_block):
        tok = idx_sm[base + t]
        # Same as PyTorch's x[mask] = 0: out-of-shard tokens read row 0 and are
        # zeroed by the block-wide mask below.
        local = jnp.clip(tok - vocab_start, 0, part_vocab - 1)
        cp = pltpu.make_async_copy(
            w_hbm.at[pl.ds(local, 1), :],
            o_ref.at[pl.ds(t, 1), :],
            sem,
        )
        cp.start()
        copies.append(cp)
        if t >= _MAX_INFLIGHT_DMAS:
            copies[t - _MAX_INFLIGHT_DMAS].wait()

    # Phase 2: drain the remaining copies (same descriptors that were started).
    for cp in copies[max(0, tokens_per_block - _MAX_INFLIGHT_DMAS):]:
        cp.wait()

    # One lane-dense, block-wide masked store: out-of-shard rows -> exact 0.
    ids = ids_ref[...]                                           # (tb, 1) int32
    valid = jnp.logical_and(ids >= vocab_start, ids < vocab_end)
    o_ref[...] = jnp.where(valid, o_ref[...], 0.0).astype(o_ref.dtype)


def _embedding_gather(idx_flat, idx2d, weight, *, vocab_start, vocab_end,
                      tokens_per_block):
    M, _ = idx2d.shape
    V, D = weight.shape
    kernel = functools.partial(
        _embedding_gather_kernel,
        tokens_per_block=tokens_per_block,
        vocab_start=vocab_start,
        vocab_end=vocab_end,
    )
    return pl.pallas_call(
        kernel,
        out_shape=jax.ShapeDtypeStruct((M, D), weight.dtype),
        grid_spec=pltpu.PrefetchScalarGridSpec(
            num_scalar_prefetch=1,                        # flat token ids -> SMEM
            grid=(M // tokens_per_block,),
            in_specs=[
                pl.BlockSpec((tokens_per_block, 1), lambda i, idx: (i, 0)),  # ids
                pl.BlockSpec(memory_space=pl.ANY),                           # weight in HBM
            ],
            out_specs=pl.BlockSpec((tokens_per_block, D), lambda i, idx: (i, 0)),
            scratch_shapes=[pltpu.SemaphoreType.DMA],     # ONE semaphore per block
        ),
        compiler_params=pltpu.CompilerParams(
            dimension_semantics=("parallel",),
        ),
    )(idx_flat, idx2d, weight)


# ------------------------ Module-equivalent wrapper ------------------------ #

class ParallelEmbeddingPallas:
    """JAX/Pallas port of ParallelEmbedding (shard of rank=0, world_size=4)."""

    def __init__(self, vocab_size: int, dim: int, *, key=None,
                 dtype=jnp.float32):
        assert vocab_size % WORLD_SIZE == 0, (
            f"Vocabulary size must be divisible by world size "
            f"(world_size={WORLD_SIZE})"
        )
        self.vocab_size = vocab_size
        self.dim = dim
        self.part_vocab_size = vocab_size // WORLD_SIZE
        self.vocab_start_idx = RANK * self.part_vocab_size
        self.vocab_end_idx = self.vocab_start_idx + self.part_vocab_size

        if key is None:
            key = jax.random.PRNGKey(0)
        # xavier_normal_ on a (part_vocab, dim) matrix.
        std = math.sqrt(2.0 / (self.part_vocab_size + dim))
        self.weight = (
            std * jax.random.normal(
                key, (self.part_vocab_size, dim), dtype=jnp.float32
            )
        ).astype(dtype)

    def __call__(self, x, *, tokens_per_block: int = 256, force_path=None):
        lead_shape = x.shape
        idx = x.reshape(-1).astype(jnp.int32)
        M = idx.shape[0]
        D = self.dim
        itemsize = jnp.dtype(self.weight.dtype).itemsize

        # Cap tb so the double-buffered output block stays ~4 MiB: fits the
        # scoped-VMEM default on every generation (16 MiB v5e, 32 MiB v6e/v7x)
        # without needing vmem_limit_bytes.
        tb_cap = max(8, (4 << 20) // max(1, 2 * D * itemsize))
        tb = max(8, min(tokens_per_block, tb_cap, _round_up(M, 8)))
        tb = _round_up(tb, 8)

        M_pad = _round_up(M, tb)
        if M_pad != M:
            # Pad with -1: always out of shard -> zero rows (sliced off below).
            pad = jnp.full((M_pad - M,), -1, dtype=jnp.int32)
            idx = jnp.concatenate([idx, pad])
        idx2d = idx.reshape(M_pad, 1)

        weight_bytes = self.part_vocab_size * D * itemsize
        use_onehot = (weight_bytes <= _VMEM_WEIGHT_BYTES
                      and self.part_vocab_size <= _VMEM_WEIGHT_ROWS)
        if force_path is not None:
            use_onehot = (force_path == "onehot")

        if use_onehot:
            y2d = _embedding_onehot(
                idx2d, self.weight,
                vocab_start=self.vocab_start_idx,
                tokens_per_block=tb,
            )
        else:
            y2d = _embedding_gather(
                idx, idx2d, self.weight,
                vocab_start=self.vocab_start_idx,
                vocab_end=self.vocab_end_idx,
                tokens_per_block=tb,
            )
        y2d = y2d[:M]

        # TODO(synk): dist.all_reduce across the 4 vocab shards (sum of
        # partials) needs a device mesh; on TPU it would be a ring reduce via
        # pltpu.make_async_remote_copy. This returns rank 0's partial, which
        # equals the PyTorch value right before all_reduce.
        return y2d.reshape(*lead_shape, D)


# ---------------------------------- main ----------------------------------- #

if __name__ == "__main__":
    key = jax.random.PRNGKey(0)
    k_tok, k_w = jax.random.split(key)

    batch, seq = 2, 8
    vocab_size, dim = 2048, 256          # part_vocab = 2048 / 4 = 512

    emb = ParallelEmbeddingPallas(vocab_size, dim, key=k_w, dtype=jnp.float32)

    # Token ids span the FULL vocab, so ~3/4 fall outside rank 0's shard and
    # must come back as zero rows.
    x = jax.random.randint(k_tok, (batch, seq), 0, vocab_size, dtype=jnp.int32)

    # Reference: same math as the PyTorch forward (rank-0 partial).
    mask = (x < emb.vocab_start_idx) | (x >= emb.vocab_end_idx)
    local = jnp.where(mask, 0, x - emb.vocab_start_idx)
    y_ref = jnp.where(mask[..., None], 0.0, emb.weight[local])

    # Fast path: shard resident in VMEM, one-hot MXU gather (auto-selected).
    y_fast = jax.block_until_ready(emb(x))
    # Gather path: weight in HBM, row DMAs straight into the output block
    # (forced here to exercise both kernels; tb=8 -> 2 grid steps).
    y_gather = jax.block_until_ready(
        emb(x, tokens_per_block=8, force_path="gather"))

    assert y_fast.shape == (batch, seq, dim)
    assert y_gather.shape == (batch, seq, dim)
    assert jnp.allclose(y_fast, y_ref, atol=1e-5, rtol=1e-5)
    assert jnp.allclose(y_gather, y_ref, atol=1e-6, rtol=1e-6)

    print("KERNEL_OK")
</pallas_src>

<mosaic_0001>
module attributes {stable_mosaic.version = 11 : i64} {
  func.func @_embedding_onehot_kernel(%arg0: i32, %arg1: memref<16x1xi32, #tpu.memory_space<vmem>>, %arg2: memref<512x256xf32, #tpu.memory_space<vmem>>, %arg3: memref<16x256xf32, #tpu.memory_space<vmem>>) attributes {dimension_semantics = [#tpu.dimension_semantics<parallel>], iteration_bounds = array<i64: 1>, scalar_prefetch = 0 : i64, scratch_operands = 0 : i64, tpu.core_type = #tpu.core_type<tc>, window_params = [{transform_indices = @transform_0, window_bounds = array<i64: 16, 1>}, {pipeline_mode = #tpu.pipeline_mode<synchronous>, transform_indices = @transform_1, window_bounds = array<i64: 512, 256>}, {transform_indices = @transform_2, window_bounds = array<i64: 16, 256>}]} {
    %c0 = arith.constant 0 : index
    %c0_0 = arith.constant 0 : index
    %0 = vector.load %arg1[%c0, %c0_0] : memref<16x1xi32, #tpu.memory_space<vmem>>, vector<16x1xi32>
    %c0_i32 = arith.constant 0 : i32
    %1 = vector.broadcast %c0_i32 : i32 to vector<16x1xi32>
    %2 = arith.subi %0, %1 : vector<16x1xi32>
    %3 = tpu.iota {dimensions = array<i32: 1>} : vector<16x512xi32>
    %4 = vector.broadcast %2 : vector<16x1xi32> to vector<16x512xi32>
    %5 = arith.cmpi eq, %4, %3 : vector<16x512xi32>
    %6 = arith.extui %5 : vector<16x512xi1> to vector<16x512xi32>
    %7 = arith.sitofp %6 : vector<16x512xi32> to vector<16x512xf32>
    %c0_1 = arith.constant 0 : index
    %c0_2 = arith.constant 0 : index
    %8 = vector.load %arg2[%c0_1, %c0_2] : memref<512x256xf32, #tpu.memory_space<vmem>>, vector<512x256xf32>
    %cst = arith.constant dense<0.000000e+00> : vector<16x256xf32>
    %9 = tpu.matmul %7, %8, %cst {dimension_numbers = #tpu.dot_dimension_numbers<[1], [0], [0], [1], [0, 0, 1, 1], [], []>, precision = #tpu.contract_precision<fp32>} : vector<16x512xf32>, vector<512x256xf32>, vector<16x256xf32> -> vector<16x256xf32>
    %c0_3 = arith.constant 0 : index
    %c0_4 = arith.constant 0 : index
    %10 = vector.load %arg3[%c0_3, %c0_4] : memref<16x256xf32, #tpu.memory_space<vmem>>, vector<16x256xf32>
    tpu.vector_store %arg3[%c0_3, %c0_4], %9 {strides = array<i32>} : memref<16x256xf32, #tpu.memory_space<vmem>>, vector<16x256xf32>,
    return
  }
  func.func @transform_0(%arg0: i32) -> (i32, i32) {
    %c0_i32 = arith.constant 0 : i32
    %c0_i32_0 = arith.constant 0 : i32
    return %arg0, %c0_i32 : i32, i32
  }
  func.func @transform_1(%arg0: i32) -> (i32, i32) {
    %c0_i32 = arith.constant 0 : i32
    %c0_i32_0 = arith.constant 0 : i32
    %c0_i32_1 = arith.constant 0 : i32
    return %c0_i32, %c0_i32_0 : i32, i32
  }
  func.func @transform_2(%arg0: i32) -> (i32, i32) {
    %c0_i32 = arith.constant 0 : i32
    %c0_i32_0 = arith.constant 0 : i32
    return %arg0, %c0_i32 : i32, i32
  }
}

</mosaic_0001>

<bundles_post_ra>
// kernel: tpu_custom_call.1
= control target key start
LH: loop header
LB: loop body
LE: loop exit
PB: predicated region body
PF: predicated region fallthrough
CT: control target
= control target key end

     0   :  { %7 = vsyncpa [#allocation3], 0  ;;  %s5773_s0 = inlined_call_operand.vmem [shape: s32[16,1], index: 0, kind: input, shape index: {}]   ;;  %s5774_s1 = inlined_call_operand.hbm [shape: f32[512,256], index: 1, kind: input, shape index: {}]   ;;  %s5775_s2 = inlined_call_operand.hbm [shape: f32[16,256], index: 2, kind: output, shape index: {}]  }
   0x1   :  { %8 = vsyncpa [#allocation4], 0  ;;  %s3804_s9 = smov [#allocation2]   ;;  %s3756_s13 = scalar_lea.hbm %s5774_s1, 16384 }
   0x2   :  { %s16_s10 = sshll.u32 %s3804_s9, 4  ;;  %p3757_p0 = scmp.ne.s32.totalorder %s5774_s1, %s3756_s13  ;;  %s17_s10 = int_to_ptr.vmem [resolvable:$true] %s16_s10 }
   0x3   :  { %p3760_p1 = scmp.lt.u32.totalorder %s3756_s13, %s5774_s1 }
   0x5   :  { %p3762_p2 = pnand %p3760_p1, %p3757_p0 }
   0x7   :  { %3765 = shalt.err (!%p3762_p2)
}
   0x8   :  { %s3766_s18 = scalar_lea.vmem %s17_s10, 16384  ;;  %p3771_p4 = scmp.lt.s32.totalorder %s17_s10, %s17_s10 }
   0x9   :  { %p3767_p3 = scmp.ne.s32.totalorder %s17_s10, %s3766_s18  ;;  %p3772_p5 = scmp.lt.s32.totalorder %s3766_s18, %s3766_s18 }
   0xb   :  { %p3773_p6 = por %p3772_p5, %p3771_p4 }
   0xd   :  { %p3774_p7 = pnand %p3773_p6, %p3767_p3 }
   0xf   :  { %3777 = shalt.err (!%p3774_p7)
}
  0x10   :  { %s3805_s19 = smov 256   ;;  %s3806_s20 = smov 16  }
  0x11   :  { %22 = dma.hbm_to_vmem [thread:$0]  %s5774_s1, 16384, %s17_s10, [#allocation3], %s3805_s19, %s3805_s19, %s3806_s20  }
  0x12   :  { %3800 = dma.done.wait [#allocation3], 16384  }
  0x13   :  { %3801 = vsyncadd [#allocation3], 4294950912  ;;  %v28_v0 = vlaneseq  ;;  %v3807_v1 = vmov 0   ;;  %v26_v3 = vld [vmem:[%s5773_s0] sm:$0xff]  ;;  %v27_v4 = vld [vmem:[%s5773_s0 + $0x8] sm:$0xff]  ;;  %s3810_s0 = smov [#allocation5]  }
  0x14   :  { %3755 = vset.pattern.permute.xlu0 %v3807_v1  ;;  %v64_v5 = vld [vmem:[#allocation2 + $0x8] sm:$0xff]  ;;  %v66_v8 = vld [vmem:[#allocation2 + $0x18] sm:$0xff]  ;;  %v63_v16 = vld [vmem:[#allocation2] sm:$0xff]  ;;  %s2892_s1 = sshll.u32 %s3810_s0, 4  ;;  %s2893_s1 = int_to_ptr.vmem [resolvable:$true] %s2892_s1 }
  0x15   :  { %v3841_v2 = vand.u32 127, %v28_v0  ;;  %34 = vperm.xlu0 %3755, %v26_v3   ;;  %v191_v9 = vand.u32 4294901760, %v64_v5  ;;  %v128_v10 = vld [vmem:[#allocation2 + $0x208] sm:$0xff]  ;;  %v130_v11 = vld [vmem:[#allocation2 + $0x218] sm:$0xff]  ;;  %v195_v13 = vand.u32 4294901760, %v66_v8  ;;  %v65_v17 = vld [vmem:[#allocation2 + $0x10] sm:$0xff]  ;;  %p3783_p9 = scmp.lt.s32.totalorder %s2893_s1, %s2893_s1 }
  0x16   :  { %v1537_v14 = vand.u32 4294901760, %v128_v10  ;;  %v1541_v15 = vand.u32 4294901760, %v130_v11  ;;  %v127_v18 = vld [vmem:[#allocation2 + $0x200] sm:$0xff]  ;;  %v193_v20 = vand.u32 4294901760, %v63_v16  ;;  %v197_v21 = vand.u32 4294901760, %v65_v17  ;;  %v129_v22 = vld [vmem:[#allocation2 + $0x210] sm:$0xff] }
  0x17   :  { %6306 = vst [vmem:[#allocation8_spill] sm:$0xff] %v3841_v2  ;;  %v3850_v6 = vadd.s32 128, %v3841_v2  ;;  %v3853_v7 = vadd.s32 256, %v3841_v2  ;;  %v3856_v12 = vadd.s32 384, %v3841_v2  ;;  %v3858_v19 = vsub.f32 %v64_v5, %v191_v9  ;;  %v68_v24 = vld [vmem:[#allocation2 + $0x28] sm:$0xff]  ;;  %v70_v25 = vld [vmem:[#allocation2 + $0x38] sm:$0xff] }
  0x18   :  { %v1539_v23 = vand.u32 4294901760, %v127_v18  ;;  %v3860_v26 = vpack.c.bf16 %v195_v13, %v191_v9  ;;  %v3862_v27 = vsub.f32 %v66_v8, %v195_v13  ;;  %v3864_v28 = vpack.c.bf16 %v1541_v15, %v1537_v14  ;;  %v132_v30 = vld [vmem:[#allocation2 + $0x228] sm:$0xff]  ;;  %v134_v31 = vld [vmem:[#allocation2 + $0x238] sm:$0xff]  ;;  %v67_v32 = vld [vmem:[#allocation2 + $0x20] sm:$0xff]  ;;  %s3778_s27 = scalar_lea.vmem %s2893_s1, 512 }
  0x19   :  { %6307 = vst [vmem:[#allocation9_spill] sm:$0xff] %v3850_v6  ;;  %6308 = vst [vmem:[#allocation10_spill] sm:$0xff] %v3853_v7  ;;  %v3866_v29 = vsub.f32 %v128_v10, %v1537_v14  ;;  %37 = vperm.xlu0 %3755, %v27_v4   ;;  %v3868_v33 = vsub.f32 %v130_v11, %v1541_v15  ;;  %v3870_v34 = vpack.c.bf16 %v197_v21, %v193_v20  ;;  %v69_v37 = vld [vmem:[#allocation2 + $0x30] sm:$0xff]  ;;  %v131_v46 = vld [vmem:[#allocation2 + $0x220] sm:$0xff]  ;;  %p3779_p8 = scmp.ne.s32.totalorder %s2893_s1, %s3778_s27  ;;  %p3784_p10 = scmp.lt.s32.totalorder %s3778_s27, %s3778_s27 }
  0x1a   :  { %6309 = vst [vmem:[#allocation11_spill] sm:$0xff] %v3856_v12  ;;  %6310 = vst [vmem:[#allocation12_spill] sm:$0xff] %v3858_v19  ;;  %v3872_v35 = vsub.f32 %v63_v16, %v193_v20  ;;  %v3874_v36 = vsub.f32 %v65_v17, %v197_v21  ;;  %2937 = vmatprep.subr.bf16.mxu1 %v3860_v26  ;;  %3321 = vmatprep.subr.bf16.mxu0 %v3864_v28  ;;  %v1543_v38 = vand.u32 4294901760, %v129_v22  ;;  %v133_v47 = vld [vmem:[#allocation2 + $0x230] sm:$0xff]  ;;  %v72_v52 = vld [vmem:[#allocation2 + $0x48] sm:$0xff] }
  0x1b   :  { %6311 = vst [vmem:[#allocation13_spill] sm:$0xff] %v3860_v26  ;;  %6312 = vst [vmem:[#allocation14_spill] sm:$0xff] %v3862_v27  ;;  %v3878_v39 = vsub.f32 %v127_v18, %v1539_v23  ;;  %v199_v40 = vand.u32 4294901760, %v68_v24  ;;  %v203_v41 = vand.u32 4294901760, %v70_v25  ;;  %2939 = vmatpush1.bf16.msra.mxu1 %v3870_v34  ;;  %v1545_v42 = vand.u32 4294901760, %v132_v30  ;;  %v74_v53 = vld [vmem:[#allocation2 + $0x58] sm:$0xff]  ;;  %p3785_p11 = por %p3784_p10, %p3783_p9 }
  0x1c   :  { %6313 = vst [vmem:[#allocation15_spill] sm:$0xff] %v3864_v28  ;;  %6314 = vst [vmem:[#allocation16_spill] sm:$0xff] %v3866_v29  ;;  %v1549_v43 = vand.u32 4294901760, %v134_v31  ;;  %v201_v44 = vand.u32 4294901760, %v67_v32  ;;  %v205_v45 = vand.u32 4294901760, %v69_v37  ;;  %v3881_v48 = vpack.c.bf16 %v1543_v38, %v1539_v23  ;;  %v136_v54 = vld [vmem:[#allocation2 + $0x248] sm:$0xff] }
  0x1d   :  { %6315 = vst [vmem:[#allocation17_spill] sm:$0xff] %v3868_v33  ;;  %6316 = vst [vmem:[#allocation18_spill] sm:$0xff] %v3870_v34  ;;  %v3883_v49 = vsub.f32 %v129_v22, %v1543_v38  ;;  %v3885_v50 = vpack.c.bf16 %v203_v41, %v199_v40  ;;  %v3887_v51 = vsub.f32 %v68_v24, %v199_v40  ;;  %v138_v59 = vld [vmem:[#allocation2 + $0x258] sm:$0xff]  ;;  %v71_v60 = vld [vmem:[#allocation2 + $0x40] sm:$0xff]  ;;  %v1547_v1 = vand.u32 4294901760, %v131_v46  ;;  %p3786_p12 = pnand %p3785_p11, %p3779_p8 }
  0x1e   :  { %6317 = vst [vmem:[#allocation19_spill] sm:$0xff] %v3872_v35  ;;  %6318 = vst [vmem:[#allocation20_spill] sm:$0xff] %v3874_v36  ;;  %v3889_v55 = vsub.f32 %v70_v25, %v203_v41  ;;  %v3891_v56 = vpack.c.bf16 %v1549_v43, %v1545_v42  ;;  %v3893_v57 = vsub.f32 %v132_v30, %v1545_v42  ;;  %v73_v61 = vld [vmem:[#allocation2 + $0x50] sm:$0xff]  ;;  %3323 = vmatpush1.bf16.msra.mxu0 %v3881_v48  ;;  %v135_v14 = vld [vmem:[#allocation2 + $0x240] sm:$0xff] }
  0x1f   :  { %6319 = vst [vmem:[#allocation21_spill] sm:$0xff] %v3878_v39  ;;  %6320 = vst [vmem:[#allocation22_spill] sm:$0xff] %v3881_v48  ;;  %v3895_v58 = vsub.f32 %v134_v31, %v1549_v43  ;;  %2941 = vmatprep.subr.bf16.mxu1 %v3885_v50  ;;  %v3899_v62 = vpack.c.bf16 %v205_v45, %v201_v44  ;;  %v3901_v63 = vsub.f32 %v67_v32, %v201_v44  ;;  %v137_v15 = vld [vmem:[#allocation2 + $0x250] sm:$0xff]  ;;  %v76_v21 = vld [vmem:[#allocation2 + $0x68] sm:$0xff] }
  0x20   :  { %6321 = vst [vmem:[#allocation23_spill] sm:$0xff] %v3883_v49  ;;  %6322 = vst [vmem:[#allocation24_spill] sm:$0xff] %v3885_v50  ;;  %v3903_v0 = vsub.f32 %v69_v37, %v205_v45  ;;  %3325 = vmatprep.subr.bf16.mxu0 %v3891_v56  ;;  %v1551_v3 = vand.u32 4294901760, %v133_v47  ;;  %v207_v4 = vand.u32 4294901760, %v72_v52  ;;  %v211_v5 = vand.u32 4294901760, %v74_v53  ;;  %v78_v22 = vld [vmem:[#allocation2 + $0x78] sm:$0xff] }
  0x21   :  { %6323 = vst [vmem:[#allocation25_spill] sm:$0xff] %v3887_v51  ;;  %6324 = vst [vmem:[#allocation26_spill] sm:$0xff] %v3889_v55  ;;  %v1553_v8 = vand.u32 4294901760, %v136_v54  ;;  %2943 = vmatpush1.bf16.msra.mxu1 %v3899_v62  ;;  %v3907_v9 = vsub.f32 %v131_v46, %v1547_v1  ;;  %v1557_v10 = vand.u32 4294901760, %v138_v59  ;;  %v209_v11 = vand.u32 4294901760, %v71_v60  ;;  %v140_v23 = vld [vmem:[#allocation2 + $0x268] sm:$0xff] }
  0x22   :  { %6325 = vst [vmem:[#allocation27_spill] sm:$0xff] %v3891_v56  ;;  %6326 = vst [vmem:[#allocation28_spill] sm:$0xff] %v3893_v57  ;;  %v213_v13 = vand.u32 4294901760, %v73_v61  ;;  %v3909_v16 = vpack.c.bf16 %v1551_v3, %v1547_v1  ;;  %v3911_v17 = vsub.f32 %v133_v47, %v1551_v3  ;;  %v3913_v18 = vpack.c.bf16 %v211_v5, %v207_v4  ;;  %v142_v32 = vld [vmem:[#allocation2 + $0x278] sm:$0xff]  ;;  %v75_v37 = vld [vmem:[#allocation2 + $0x60] sm:$0xff] }
  0x23   :  { %6327 = vst [vmem:[#allocation29_spill] sm:$0xff] %v3895_v58  ;;  %6328 = vst [vmem:[#allocation30_spill] sm:$0xff] %v3899_v62  ;;  %v3915_v20 = vsub.f32 %v72_v52, %v207_v4  ;;  %v3917_v24 = vsub.f32 %v74_v53, %v211_v5  ;;  %v3919_v25 = vpack.c.bf16 %v1557_v10, %v1553_v8  ;;  %v77_v38 = vld [vmem:[#allocation2 + $0x70] sm:$0xff]  ;;  %v1555_v43 = vand.u32 4294901760, %v135_v14  ;;  %v139_v1 = vld [vmem:[#allocation2 + $0x260] sm:$0xff] }
  0x24   :  { %6329 = vst [vmem:[#allocation31_spill] sm:$0xff] %v3901_v63  ;;  %6330 = vst [vmem:[#allocation32_spill] sm:$0xff] %v3903_v0  ;;  %v3921_v30 = vsub.f32 %v136_v54, %v1553_v8  ;;  %v3923_v31 = vsub.f32 %v138_v59, %v1557_v10  ;;  %3327 = vmatpush1.bf16.msra.mxu0 %v3909_v16  ;;  %2945 = vmatprep.subr.bf16.mxu1 %v3913_v18  ;;  %v1559_v44 = vand.u32 4294901760, %v137_v15  ;;  %v141_v3 = vld [vmem:[#allocation2 + $0x270] sm:$0xff]  ;;  %v80_v8 = vld [vmem:[#allocation2 + $0x88] sm:$0xff] }
  0x25   :  { %6331 = vst [vmem:[#allocation33_spill] sm:$0xff] %v3907_v9  ;;  %6332 = vst [vmem:[#allocation34_spill] sm:$0xff] %v3909_v16  ;;  %v3927_v40 = vpack.c.bf16 %v213_v13, %v209_v11  ;;  %v3929_v41 = vsub.f32 %v71_v60, %v209_v11  ;;  %v3931_v42 = vsub.f32 %v73_v61, %v213_v13  ;;  %3329 = vmatprep.subr.bf16.mxu0 %v3919_v25  ;;  %v82_v10 = vld [vmem:[#allocation2 + $0x98] sm:$0xff]  ;;  %v144_v11 = vld [vmem:[#allocation2 + $0x288] sm:$0xff] }
  0x26   :  { %6333 = vst [vmem:[#allocation35_spill] sm:$0xff] %v3911_v17  ;;  %6334 = vst [vmem:[#allocation36_spill] sm:$0xff] %v3913_v18  ;;  %v215_v45 = vand.u32 4294901760, %v76_v21  ;;  %v219_v46 = vand.u32 4294901760, %v78_v22  ;;  %v1561_v47 = vand.u32 4294901760, %v140_v23  ;;  %v3935_v52 = vsub.f32 %v135_v14, %v1555_v43  ;;  %v146_v18 = vld [vmem:[#allocation2 + $0x298] sm:$0xff] }
  0x27   :  { %6335 = vst [vmem:[#allocation37_spill] sm:$0xff] %v3915_v20  ;;  %6336 = vst [vmem:[#allocation38_spill] sm:$0xff] %v3917_v24  ;;  %2947 = vmatpush1.bf16.msra.mxu1 %v3927_v40  ;;  %v1565_v53 = vand.u32 4294901760, %v142_v32  ;;  %v217_v54 = vand.u32 4294901760, %v75_v37  ;;  %v221_v59 = vand.u32 4294901760, %v77_v38  ;;  %v3937_v60 = vpack.c.bf16 %v1559_v44, %v1555_v43  ;;  %v79_v43 = vld [vmem:[#allocation2 + $0x80] sm:$0xff] }
  0x28   :  { %6337 = vst [vmem:[#allocation39_spill] sm:$0xff] %v3919_v25  ;;  %6338 = vst [vmem:[#allocation40_spill] sm:$0xff] %v3921_v30  ;;  %v3939_v61 = vsub.f32 %v137_v15, %v1559_v44  ;;  %v3941_v4 = vpack.c.bf16 %v219_v46, %v215_v45  ;;  %v3943_v5 = vsub.f32 %v76_v21, %v215_v45  ;;  %v81_v16 = vld [vmem:[#allocation2 + $0x90] sm:$0xff]  ;;  %v223_v45 = vand.u32 4294901760, %v80_v8  ;;  %v143_v62 = vld [vmem:[#allocation2 + $0x280] sm:$0xff] }
  0x29   :  { %6339 = vst [vmem:[#allocation41_spill] sm:$0xff] %v3923_v31  ;;  %6340 = vst [vmem:[#allocation42_spill] sm:$0xff] %v3927_v40  ;;  %v3945_v13 = vsub.f32 %v78_v22, %v219_v46  ;;  %v3947_v14 = vpack.c.bf16 %v1565_v53, %v1561_v47  ;;  %v3949_v40 = vsub.f32 %v140_v23, %v1561_v47  ;;  %3331 = vmatpush1.bf16.msra.mxu0 %v3937_v60  ;;  %v145_v56 = vld [vmem:[#allocation2 + $0x290] sm:$0xff]  ;;  %v86_v50 = vld [vmem:[#allocation2 + $0xb8] sm:$0xff] }
  0x2a   :  { %6341 = vst [vmem:[#allocation43_spill] sm:$0xff] %v3929_v41  ;;  %6342 = vst [vmem:[#allocation44_spill] sm:$0xff] %v3931_v42  ;;  %v3951_v25 = vsub.f32 %v142_v32, %v1565_v53  ;;  %2949 = vmatprep.subr.bf16.mxu1 %v3941_v4  ;;  %v3955_v15 = vpack.c.bf16 %v221_v59, %v217_v54  ;;  %v3957_v21 = vsub.f32 %v75_v37, %v217_v54  ;;  %v148_v48 = vld [vmem:[#allocation2 + $0x2a8] sm:$0xff]  ;;  %v150_v26 = vld [vmem:[#allocation2 + $0x2b8] sm:$0xff] }
  0x2b   :  { %6343 = vst [vmem:[#allocation45_spill] sm:$0xff] %v3935_v52  ;;  %6344 = vst [vmem:[#allocation46_spill] sm:$0xff] %v3937_v60  ;;  %v3959_v44 = vsub.f32 %v77_v38, %v221_v59  ;;  %v1563_v22 = vand.u32 4294901760, %v139_v1  ;;  %3333 = vmatprep.subr.bf16.mxu0 %v3947_v14  ;;  %v1567_v23 = vand.u32 4294901760, %v141_v3  ;;  %v227_v32 = vand.u32 4294901760, %v82_v10  ;;  %v85_v12 = vld [vmem:[#allocation2 + $0xb0] sm:$0xff] }
  0x2c   :  { %6345 = vst [vmem:[#allocation47_spill] sm:$0xff] %v3939_v61  ;;  %6346 = vst [vmem:[#allocation48_spill] sm:$0xff] %v3941_v4  ;;  %v1569_v46 = vand.u32 4294901760, %v144_v11  ;;  %2951 = vmatpush1.bf16.msra.mxu1 %v3955_v15  ;;  %v1573_v53 = vand.u32 4294901760, %v146_v18  ;;  %v225_v60 = vand.u32 4294901760, %v79_v43  ;;  %v229_v4 = vand.u32 4294901760, %v81_v16 }
  0x2d   :  { %6347 = vst [vmem:[#allocation49_spill] sm:$0xff] %v3943_v5  ;;  %6348 = vst [vmem:[#allocation50_spill] sm:$0xff] %v3945_v13  ;;  %v3963_v47 = vsub.f32 %v139_v1, %v1563_v22  ;;  %v3965_v37 = vpack.c.bf16 %v1567_v23, %v1563_v22  ;;  %v3967_v38 = vsub.f32 %v141_v3, %v1567_v23  ;;  %v83_v22 = vld [vmem:[#allocation2 + $0xa0] sm:$0xff]  ;;  %v149_v6 = vld [vmem:[#allocation2 + $0x2b0] sm:$0xff] }
  0x2e   :  { %6349 = vst [vmem:[#allocation51_spill] sm:$0xff] %v3947_v14  ;;  %6350 = vst [vmem:[#allocation52_spill] sm:$0xff] %v3949_v40  ;;  %v3969_v54 = vpack.c.bf16 %v227_v32, %v223_v45  ;;  %v3971_v59 = vsub.f32 %v80_v8, %v223_v45  ;;  %v84_v14 = vld [vmem:[#allocation2 + $0xa8] sm:$0xff]  ;;  %v3973_v34 = vsub.f32 %v82_v10, %v227_v32  ;;  %v1571_v10 = vand.u32 4294901760, %v143_v62  ;;  %v147_v7 = vld [vmem:[#allocation2 + $0x2a0] sm:$0xff] }
  0x2f   :  { %6351 = vst [vmem:[#allocation53_spill] sm:$0xff] %v3951_v25  ;;  %6352 = vst [vmem:[#allocation54_spill] sm:$0xff] %v3955_v15  ;;  %v3975_v1 = vpack.c.bf16 %v1573_v53, %v1569_v46  ;;  %v3977_v15 = vsub.f32 %v144_v11, %v1569_v46  ;;  %v3979_v28 = vsub.f32 %v146_v18, %v1573_v53  ;;  %3335 = vmatpush1.bf16.msra.mxu0 %v3965_v37  ;;  %v90_v2 = vld [vmem:[#allocation2 + $0xd8] sm:$0xff] }
  0x30   :  { %6353 = vst [vmem:[#allocation55_spill] sm:$0xff] %v3957_v21  ;;  %6354 = vst [vmem:[#allocation56_spill] sm:$0xff] %v3959_v44  ;;  %2953 = vmatprep.subr.bf16.mxu1 %v3969_v54  ;;  %v3983_v3 = vpack.c.bf16 %v229_v4, %v225_v60  ;;  %v3985_v8 = vsub.f32 %v79_v43, %v225_v60  ;;  %v3987_v23 = vsub.f32 %v81_v16, %v229_v4 }
  0x31   :  { %6355 = vst [vmem:[#allocation57_spill] sm:$0xff] %v3963_v47  ;;  %6356 = vst [vmem:[#allocation58_spill] sm:$0xff] %v3965_v37  ;;  %3337 = vmatprep.subr.bf16.mxu0 %v3975_v1  ;;  %v1575_v11 = vand.u32 4294901760, %v145_v56  ;;  %v231_v45 = vand.u32 4294901760, %v84_v14  ;;  %v235_v18 = vand.u32 4294901760, %v86_v50  ;;  %v1577_v32 = vand.u32 4294901760, %v148_v48 }
  0x32   :  { %6357 = vst [vmem:[#allocation59_spill] sm:$0xff] %v3967_v38  ;;  %6358 = vst [vmem:[#allocation60_spill] sm:$0xff] %v3969_v54  ;;  %2955 = vmatpush1.bf16.msra.mxu1 %v3983_v3  ;;  %v3991_v46 = vsub.f32 %v143_v62, %v1571_v10  ;;  %v1581_v53 = vand.u32 4294901760, %v150_v26  ;;  %v233_v37 = vand.u32 4294901760, %v83_v22  ;;  %v237_v54 = vand.u32 4294901760, %v85_v12 }
  0x33   :  { %6359 = vst [vmem:[#allocation61_spill] sm:$0xff] %v3971_v59  ;;  %6360 = vst [vmem:[#allocation62_spill] sm:$0xff] %v3973_v34  ;;  %v3993_v60 = vpack.c.bf16 %v1575_v11, %v1571_v10  ;;  %v3995_v16 = vsub.f32 %v145_v56, %v1575_v11  ;;  %v3997_v4 = vpack.c.bf16 %v235_v18, %v231_v45  ;;  %v87_v10 = vld [vmem:[#allocation2 + $0xc0] sm:$0xff] }
  0x34   :  { %6361 = vst [vmem:[#allocation63_spill] sm:$0xff] %v3975_v1  ;;  %6362 = vst [vmem:[#allocation64_spill] sm:$0xff] %v3977_v15  ;;  %v3999_v43 = vsub.f32 %v84_v14, %v231_v45  ;;  %v88_v1 = vld [vmem:[#allocation2 + $0xc8] sm:$0xff]  ;;  %v4003_v62 = vpack.c.bf16 %v1581_v53, %v1577_v32  ;;  %v89_v15 = vld [vmem:[#allocation2 + $0xd0] sm:$0xff]  ;;  %v4011_v56 = vpack.c.bf16 %v237_v54, %v233_v37 }
  0x35   :  { %6363 = vst [vmem:[#allocation65_spill] sm:$0xff] %v3979_v28  ;;  %6364 = vst [vmem:[#allocation66_spill] sm:$0xff] %v3983_v3  ;;  %v4005_v3 = vsub.f32 %v148_v48, %v1577_v32  ;;  %v154_v28 = vld [vmem:[#allocation2 + $0x2d8] sm:$0xff]  ;;  %3339 = vmatpush1.bf16.msra.mxu0 %v3993_v60  ;;  %2957 = vmatprep.subr.bf16.mxu1 %v3997_v4  ;;  %v4013_v14 = vsub.f32 %v83_v22, %v233_v37  ;;  %v1583_v48 = vand.u32 4294901760, %v149_v6 }
  0x36   :  { %6365 = vst [vmem:[#allocation67_spill] sm:$0xff] %v3985_v8  ;;  %6366 = vst [vmem:[#allocation68_spill] sm:$0xff] %v3987_v23  ;;  %v152_v23 = vld [vmem:[#allocation2 + $0x2c8] sm:$0xff]  ;;  %v4001_v8 = vsub.f32 %v86_v50, %v235_v18  ;;  %v4015_v11 = vsub.f32 %v85_v12, %v237_v54  ;;  %v1579_v50 = vand.u32 4294901760, %v147_v7  ;;  %3341 = vmatprep.subr.bf16.mxu0 %v4003_v62  ;;  %v239_v45 = vand.u32 4294901760, %v88_v1 }
  0x37   :  { %6367 = vst [vmem:[#allocation69_spill] sm:$0xff] %v3991_v46  ;;  %6368 = vst [vmem:[#allocation70_spill] sm:$0xff] %v3993_v60  ;;  %v4007_v46 = vsub.f32 %v150_v26, %v1581_v53  ;;  %v243_v26 = vand.u32 4294901760, %v90_v2  ;;  %v1585_v18 = vand.u32 4294901760, %v152_v23  ;;  %2959 = vmatpush1.bf16.msra.mxu1 %v4011_v56  ;;  %v1589_v53 = vand.u32 4294901760, %v154_v28 }
  0x38   :  { %6369 = vst [vmem:[#allocation71_spill] sm:$0xff] %v3995_v16  ;;  %6370 = vst [vmem:[#allocation72_spill] sm:$0xff] %v3997_v4  ;;  %v4019_v32 = vsub.f32 %v147_v7, %v1579_v50  ;;  %v241_v60 = vand.u32 4294901760, %v87_v10  ;;  %v245_v4 = vand.u32 4294901760, %v89_v15  ;;  %v4021_v37 = vpack.c.bf16 %v1583_v48, %v1579_v50  ;;  %v91_v50 = vld [vmem:[#allocation2 + $0xe0] sm:$0xff]  ;;  %v93_v16 = vld [vmem:[#allocation2 + $0xf0] sm:$0xff] }
  0x39   :  { %6371 = vst [vmem:[#allocation73_spill] sm:$0xff] %v3999_v43  ;;  %6372 = vst [vmem:[#allocation74_spill] sm:$0xff] %v4001_v8  ;;  %v4023_v12 = vsub.f32 %v149_v6, %v1583_v48  ;;  %v4025_v54 = vpack.c.bf16 %v243_v26, %v239_v45  ;;  %v4027_v22 = vsub.f32 %v88_v1, %v239_v45  ;;  %v158_v43 = vld [vmem:[#allocation2 + $0x2f8] sm:$0xff] }
  0x3a   :  { %6373 = vst [vmem:[#allocation75_spill] sm:$0xff] %v4003_v62  ;;  %6374 = vst [vmem:[#allocation76_spill] sm:$0xff] %v4005_v3  ;;  %v153_v3 = vld [vmem:[#allocation2 + $0x2d0] sm:$0xff]  ;;  %v92_v62 = vld [vmem:[#allocation2 + $0xe8] sm:$0xff]  ;;  %v4029_v8 = vsub.f32 %v90_v2, %v243_v26  ;;  %v4031_v7 = vpack.c.bf16 %v1589_v53, %v1585_v18  ;;  %3343 = vmatpush1.bf16.msra.mxu0 %v4021_v37  ;;  %v4039_v6 = vpack.c.bf16 %v245_v4, %v241_v60 }
  0x3b   :  { %6375 = vst [vmem:[#allocation77_spill] sm:$0xff] %v4007_v46  ;;  %6376 = vst [vmem:[#allocation78_spill] sm:$0xff] %v4011_v56  ;;  %v151_v46 = vld [vmem:[#allocation2 + $0x2c0] sm:$0xff]  ;;  %v4033_v56 = vsub.f32 %v152_v23, %v1585_v18  ;;  %2961 = vmatprep.subr.bf16.mxu1 %v4025_v54  ;;  %v4041_v1 = vsub.f32 %v87_v10, %v241_v60  ;;  %v4043_v48 = vsub.f32 %v89_v15, %v245_v4 }
  0x3c   :  { %6377 = vst [vmem:[#allocation79_spill] sm:$0xff] %v4013_v14  ;;  %6378 = vst [vmem:[#allocation80_spill] sm:$0xff] %v4015_v11  ;;  %v94_v11 = vld [vmem:[#allocation2 + $0xf8] sm:$0xff]  ;;  %v156_v14 = vld [vmem:[#allocation2 + $0x2e8] sm:$0xff]  ;;  %v1587_v2 = vand.u32 4294901760, %v151_v46  ;;  %3345 = vmatprep.subr.bf16.mxu0 %v4031_v7  ;;  %v1591_v23 = vand.u32 4294901760, %v153_v3  ;;  %2963 = vmatpush1.bf16.msra.mxu1 %v4039_v6 }
  0x3d   :  { %6379 = vst [vmem:[#allocation81_spill] sm:$0xff] %v4019_v32  ;;  %6380 = vst [vmem:[#allocation82_spill] sm:$0xff] %v4021_v37  ;;  %v4035_v32 = vsub.f32 %v154_v28, %v1589_v53  ;;  %v247_v45 = vand.u32 4294901760, %v92_v62  ;;  %v251_v28 = vand.u32 4294901760, %v94_v11  ;;  %v1593_v26 = vand.u32 4294901760, %v156_v14 }
  0x3e   :  { %6381 = vst [vmem:[#allocation83_spill] sm:$0xff] %v4023_v12  ;;  %6382 = vst [vmem:[#allocation84_spill] sm:$0xff] %v4025_v54  ;;  %v4047_v18 = vsub.f32 %v151_v46, %v1587_v2  ;;  %v1597_v53 = vand.u32 4294901760, %v158_v43  ;;  %v249_v37 = vand.u32 4294901760, %v91_v50  ;;  %v253_v54 = vand.u32 4294901760, %v93_v16  ;;  %v97_v12 = vld [vmem:[#allocation2 + $0x110] sm:$0xff] }
  0x3f   :  { %6383 = vst [vmem:[#allocation85_spill] sm:$0xff] %v4027_v22  ;;  %6384 = vst [vmem:[#allocation86_spill] sm:$0xff] %v4029_v8  ;;  %v4049_v60 = vpack.c.bf16 %v1591_v23, %v1587_v2  ;;  %v4051_v15 = vsub.f32 %v153_v3, %v1591_v23  ;;  %v4053_v4 = vpack.c.bf16 %v251_v28, %v247_v45  ;;  %v162_v22 = vld [vmem:[#allocation2 + $0x318] sm:$0xff]  ;;  %v95_v2 = vld [vmem:[#allocation2 + $0x100] sm:$0xff] }
  0x40   :  { %6385 = vst [vmem:[#allocation87_spill] sm:$0xff] %v4031_v7  ;;  %6386 = vst [vmem:[#allocation88_spill] sm:$0xff] %v4033_v56  ;;  %v157_v56 = vld [vmem:[#allocation2 + $0x2f0] sm:$0xff]  ;;  %v4055_v10 = vsub.f32 %v92_v62, %v247_v45  ;;  %v96_v7 = vld [vmem:[#allocation2 + $0x108] sm:$0xff]  ;;  %v4057_v8 = vsub.f32 %v94_v11, %v251_v28  ;;  %v4059_v46 = vpack.c.bf16 %v1597_v53, %v1593_v26 }
  0x41   :  { %6387 = vst [vmem:[#allocation89_spill] sm:$0xff] %v4035_v32  ;;  %6388 = vst [vmem:[#allocation90_spill] sm:$0xff] %v4039_v6  ;;  %v155_v32 = vld [vmem:[#allocation2 + $0x2e0] sm:$0xff]  ;;  %v4061_v6 = vsub.f32 %v156_v14, %v1593_v26  ;;  %3347 = vmatpush1.bf16.msra.mxu0 %v4049_v60  ;;  %2965 = vmatprep.subr.bf16.mxu1 %v4053_v4  ;;  %v4067_v3 = vpack.c.bf16 %v253_v54, %v249_v37  ;;  %v1599_v14 = vand.u32 4294901760, %v157_v56 }
  0x42   :  { %6389 = vst [vmem:[#allocation91_spill] sm:$0xff] %v4041_v1  ;;  %6390 = vst [vmem:[#allocation92_spill] sm:$0xff] %v4043_v48  ;;  %v98_v48 = vld [vmem:[#allocation2 + $0x118] sm:$0xff]  ;;  %v160_v1 = vld [vmem:[#allocation2 + $0x308] sm:$0xff]  ;;  %v4069_v62 = vsub.f32 %v91_v50, %v249_v37  ;;  %v4071_v23 = vsub.f32 %v93_v16, %v253_v54  ;;  %v1595_v11 = vand.u32 4294901760, %v155_v32  ;;  %3349 = vmatprep.subr.bf16.mxu0 %v4059_v46  ;;  %v255_v45 = vand.u32 4294901760, %v96_v7 }
  0x43   :  { %6391 = vst [vmem:[#allocation93_spill] sm:$0xff] %v4047_v18  ;;  %6392 = vst [vmem:[#allocation94_spill] sm:$0xff] %v4049_v60  ;;  %v4063_v18 = vsub.f32 %v158_v43, %v1597_v53  ;;  %v259_v43 = vand.u32 4294901760, %v98_v48  ;;  %v1601_v28 = vand.u32 4294901760, %v160_v1  ;;  %2967 = vmatpush1.bf16.msra.mxu1 %v4067_v3  ;;  %v1605_v53 = vand.u32 4294901760, %v162_v22 }
  0x44   :  { %6393 = vst [vmem:[#allocation95_spill] sm:$0xff] %v4051_v15  ;;  %6394 = vst [vmem:[#allocation96_spill] sm:$0xff] %v4053_v4  ;;  %v4075_v26 = vsub.f32 %v155_v32, %v1595_v11  ;;  %v257_v60 = vand.u32 4294901760, %v95_v2  ;;  %v261_v4 = vand.u32 4294901760, %v97_v12  ;;  %v4077_v37 = vpack.c.bf16 %v1599_v14, %v1595_v11  ;;  %v99_v11 = vld [vmem:[#allocation2 + $0x120] sm:$0xff]  ;;  %v101_v15 = vld [vmem:[#allocation2 + $0x130] sm:$0xff] }
  0x45   :  { %6395 = vst [vmem:[#allocation97_spill] sm:$0xff] %v4055_v10  ;;  %6396 = vst [vmem:[#allocation98_spill] sm:$0xff] %v4057_v8  ;;  %v4079_v16 = vsub.f32 %v157_v56, %v1599_v14  ;;  %v4081_v54 = vpack.c.bf16 %v259_v43, %v255_v45  ;;  %v4083_v50 = vsub.f32 %v96_v7, %v255_v45  ;;  %v166_v10 = vld [vmem:[#allocation2 + $0x338] sm:$0xff] }
  0x46   :  { %6397 = vst [vmem:[#allocation99_spill] sm:$0xff] %v4059_v46  ;;  %6398 = vst [vmem:[#allocation100_spill] sm:$0xff] %v4061_v6  ;;  %v161_v6 = vld [vmem:[#allocation2 + $0x310] sm:$0xff]  ;;  %v100_v46 = vld [vmem:[#allocation2 + $0x128] sm:$0xff]  ;;  %v4085_v8 = vsub.f32 %v98_v48, %v259_v43  ;;  %v4087_v32 = vpack.c.bf16 %v1605_v53, %v1601_v28  ;;  %3351 = vmatpush1.bf16.msra.mxu0 %v4077_v37  ;;  %v4095_v56 = vpack.c.bf16 %v261_v4, %v257_v60 }
  0x47   :  { %6399 = vst [vmem:[#allocation101_spill] sm:$0xff] %v4063_v18  ;;  %6400 = vst [vmem:[#allocation102_spill] sm:$0xff] %v4067_v3  ;;  %v159_v18 = vld [vmem:[#allocation2 + $0x300] sm:$0xff]  ;;  %v4089_v3 = vsub.f32 %v160_v1, %v1601_v28  ;;  %2969 = vmatprep.subr.bf16.mxu1 %v4081_v54  ;;  %v4097_v7 = vsub.f32 %v95_v2, %v257_v60  ;;  %v4099_v14 = vsub.f32 %v97_v12, %v261_v4 }
  0x48   :  { %6401 = vst [vmem:[#allocation103_spill] sm:$0xff] %v4069_v62  ;;  %6402 = vst [vmem:[#allocation104_spill] sm:$0xff] %v4071_v23  ;;  %v102_v23 = vld [vmem:[#allocation2 + $0x138] sm:$0xff]  ;;  %v164_v62 = vld [vmem:[#allocation2 + $0x328] sm:$0xff]  ;;  %v1603_v48 = vand.u32 4294901760, %v159_v18  ;;  %3353 = vmatprep.subr.bf16.mxu0 %v4087_v32  ;;  %v1607_v1 = vand.u32 4294901760, %v161_v6  ;;  %2971 = vmatpush1.bf16.msra.mxu1 %v4095_v56 }
  0x49   :  { %6403 = vst [vmem:[#allocation105_spill] sm:$0xff] %v4075_v26  ;;  %6404 = vst [vmem:[#allocation106_spill] sm:$0xff] %v4077_v37  ;;  %v4091_v26 = vsub.f32 %v162_v22, %v1605_v53  ;;  %v263_v45 = vand.u32 4294901760, %v100_v46  ;;  %v267_v22 = vand.u32 4294901760, %v102_v23  ;;  %v1609_v43 = vand.u32 4294901760, %v164_v62 }
  0x4a   :  { %6405 = vst [vmem:[#allocation107_spill] sm:$0xff] %v4079_v16  ;;  %6406 = vst [vmem:[#allocation108_spill] sm:$0xff] %v4081_v54  ;;  %v4103_v28 = vsub.f32 %v159_v18, %v1603_v48  ;;  %v1613_v53 = vand.u32 4294901760, %v166_v10  ;;  %v265_v37 = vand.u32 4294901760, %v99_v11  ;;  %v269_v54 = vand.u32 4294901760, %v101_v15  ;;  %v105_v16 = vld [vmem:[#allocation2 + $0x150] sm:$0xff] }
  0x4b   :  { %6407 = vst [vmem:[#allocation109_spill] sm:$0xff] %v4083_v50  ;;  %6408 = vst [vmem:[#allocation110_spill] sm:$0xff] %v4085_v8  ;;  %v4105_v60 = vpack.c.bf16 %v1607_v1, %v1603_v48  ;;  %v4107_v12 = vsub.f32 %v161_v6, %v1607_v1  ;;  %v4109_v4 = vpack.c.bf16 %v267_v22, %v263_v45  ;;  %v170_v50 = vld [vmem:[#allocation2 + $0x358] sm:$0xff]  ;;  %v103_v48 = vld [vmem:[#allocation2 + $0x140] sm:$0xff] }
  0x4c   :  { %6409 = vst [vmem:[#allocation111_spill] sm:$0xff] %v4087_v32  ;;  %6410 = vst [vmem:[#allocation112_spill] sm:$0xff] %v4089_v3  ;;  %v165_v3 = vld [vmem:[#allocation2 + $0x330] sm:$0xff]  ;;  %v4111_v2 = vsub.f32 %v100_v46, %v263_v45  ;;  %v104_v32 = vld [vmem:[#allocation2 + $0x148] sm:$0xff]  ;;  %v4113_v8 = vsub.f32 %v102_v23, %v267_v22  ;;  %v4115_v18 = vpack.c.bf16 %v1613_v53, %v1609_v43 }
  0x4d   :  { %6411 = vst [vmem:[#allocation113_spill] sm:$0xff] %v4091_v26  ;;  %6412 = vst [vmem:[#allocation114_spill] sm:$0xff] %v4095_v56  ;;  %v163_v26 = vld [vmem:[#allocation2 + $0x320] sm:$0xff]  ;;  %v4117_v56 = vsub.f32 %v164_v62, %v1609_v43  ;;  %3355 = vmatpush1.bf16.msra.mxu0 %v4105_v60  ;;  %2973 = vmatprep.subr.bf16.mxu1 %v4109_v4  ;;  %v4123_v6 = vpack.c.bf16 %v269_v54, %v265_v37  ;;  %v1615_v62 = vand.u32 4294901760, %v165_v3 }
  0x4e   :  { %6413 = vst [vmem:[#allocation115_spill] sm:$0xff] %v4097_v7  ;;  %6414 = vst [vmem:[#allocation116_spill] sm:$0xff] %v4099_v14  ;;  %v106_v14 = vld [vmem:[#allocation2 + $0x158] sm:$0xff]  ;;  %v168_v7 = vld [vmem:[#allocation2 + $0x348] sm:$0xff]  ;;  %v4125_v46 = vsub.f32 %v99_v11, %v265_v37  ;;  %v4127_v1 = vsub.f32 %v101_v15, %v269_v54  ;;  %v1611_v23 = vand.u32 4294901760, %v163_v26  ;;  %3357 = vmatprep.subr.bf16.mxu0 %v4115_v18  ;;  %v271_v45 = vand.u32 4294901760, %v104_v32 }
  0x4f   :  { %6415 = vst [vmem:[#allocation117_spill] sm:$0xff] %v4103_v28  ;;  %6416 = vst [vmem:[#allocation118_spill] sm:$0xff] %v4105_v60  ;;  %v4119_v28 = vsub.f32 %v166_v10, %v1613_v53  ;;  %v275_v10 = vand.u32 4294901760, %v106_v14  ;;  %v1617_v22 = vand.u32 4294901760, %v168_v7  ;;  %2975 = vmatpush1.bf16.msra.mxu1 %v4123_v6  ;;  %v1621_v53 = vand.u32 4294901760, %v170_v50 }
  0x50   :  { %6417 = vst [vmem:[#allocation119_spill] sm:$0xff] %v4107_v12  ;;  %6418 = vst [vmem:[#allocation120_spill] sm:$0xff] %v4109_v4  ;;  %v4131_v43 = vsub.f32 %v163_v26, %v1611_v23  ;;  %v273_v60 = vand.u32 4294901760, %v103_v48  ;;  %v277_v4 = vand.u32 4294901760, %v105_v16  ;;  %v4133_v37 = vpack.c.bf16 %v1615_v62, %v1611_v23  ;;  %v107_v23 = vld [vmem:[#allocation2 + $0x160] sm:$0xff]  ;;  %v109_v12 = vld [vmem:[#allocation2 + $0x170] sm:$0xff] }
  0x51   :  { %6419 = vst [vmem:[#allocation121_spill] sm:$0xff] %v4111_v2  ;;  %6420 = vst [vmem:[#allocation122_spill] sm:$0xff] %v4113_v8  ;;  %v4135_v15 = vsub.f32 %v165_v3, %v1615_v62  ;;  %v4137_v54 = vpack.c.bf16 %v275_v10, %v271_v45  ;;  %v4139_v11 = vsub.f32 %v104_v32, %v271_v45  ;;  %v174_v2 = vld [vmem:[#allocation2 + $0x378] sm:$0xff] }
  0x52   :  { %6421 = vst [vmem:[#allocation123_spill] sm:$0xff] %v4115_v18  ;;  %6422 = vst [vmem:[#allocation124_spill] sm:$0xff] %v4117_v56  ;;  %v169_v56 = vld [vmem:[#allocation2 + $0x350] sm:$0xff]  ;;  %v108_v18 = vld [vmem:[#allocation2 + $0x168] sm:$0xff]  ;;  %v4141_v8 = vsub.f32 %v106_v14, %v275_v10  ;;  %v4143_v26 = vpack.c.bf16 %v1621_v53, %v1617_v22  ;;  %3359 = vmatpush1.bf16.msra.mxu0 %v4133_v37  ;;  %v4151_v3 = vpack.c.bf16 %v277_v4, %v273_v60 }
  0x53   :  { %6423 = vst [vmem:[#allocation125_spill] sm:$0xff] %v4119_v28  ;;  %6424 = vst [vmem:[#allocation126_spill] sm:$0xff] %v4123_v6  ;;  %v167_v28 = vld [vmem:[#allocation2 + $0x340] sm:$0xff]  ;;  %v4145_v6 = vsub.f32 %v168_v7, %v1617_v22  ;;  %2977 = vmatprep.subr.bf16.mxu1 %v4137_v54  ;;  %v4153_v32 = vsub.f32 %v103_v48, %v273_v60  ;;  %v4155_v62 = vsub.f32 %v105_v16, %v277_v4 }
  0x54   :  { %6425 = vst [vmem:[#allocation127_spill] sm:$0xff] %v4125_v46  ;;  %6426 = vst [vmem:[#allocation128_spill] sm:$0xff] %v4127_v1  ;;  %v110_v1 = vld [vmem:[#allocation2 + $0x178] sm:$0xff]  ;;  %v172_v46 = vld [vmem:[#allocation2 + $0x368] sm:$0xff]  ;;  %v1619_v14 = vand.u32 4294901760, %v167_v28  ;;  %3361 = vmatprep.subr.bf16.mxu0 %v4143_v26  ;;  %v1623_v7 = vand.u32 4294901760, %v169_v56  ;;  %2979 = vmatpush1.bf16.msra.mxu1 %v4151_v3 }
  0x55   :  { %6427 = vst [vmem:[#allocation129_spill] sm:$0xff] %v4131_v43  ;;  %6428 = vst [vmem:[#allocation130_spill] sm:$0xff] %v4133_v37  ;;  %v4147_v43 = vsub.f32 %v170_v50, %v1621_v53  ;;  %v279_v45 = vand.u32 4294901760, %v108_v18  ;;  %v283_v50 = vand.u32 4294901760, %v110_v1  ;;  %v1625_v10 = vand.u32 4294901760, %v172_v46 }
  0x56   :  { %6429 = vst [vmem:[#allocation131_spill] sm:$0xff] %v4135_v15  ;;  %6430 = vst [vmem:[#allocation132_spill] sm:$0xff] %v4137_v54  ;;  %v4159_v22 = vsub.f32 %v167_v28, %v1619_v14  ;;  %v1629_v53 = vand.u32 4294901760, %v174_v2  ;;  %v281_v37 = vand.u32 4294901760, %v107_v23  ;;  %v285_v54 = vand.u32 4294901760, %v109_v12  ;;  %v113_v15 = vld [vmem:[#allocation2 + $0x190] sm:$0xff] }
  0x57   :  { %6431 = vst [vmem:[#allocation133_spill] sm:$0xff] %v4139_v11  ;;  %6432 = vst [vmem:[#allocation134_spill] sm:$0xff] %v4141_v8  ;;  %v4161_v60 = vpack.c.bf16 %v1623_v7, %v1619_v14  ;;  %v4163_v16 = vsub.f32 %v169_v56, %v1623_v7  ;;  %v4165_v4 = vpack.c.bf16 %v283_v50, %v279_v45  ;;  %v178_v11 = vld [vmem:[#allocation2 + $0x398] sm:$0xff]  ;;  %v111_v14 = vld [vmem:[#allocation2 + $0x180] sm:$0xff] }
  0x58   :  { %6433 = vst [vmem:[#allocation135_spill] sm:$0xff] %v4143_v26  ;;  %6434 = vst [vmem:[#allocation136_spill] sm:$0xff] %v4145_v6  ;;  %v173_v6 = vld [vmem:[#allocation2 + $0x370] sm:$0xff]  ;;  %v4167_v48 = vsub.f32 %v108_v18, %v279_v45  ;;  %v112_v26 = vld [vmem:[#allocation2 + $0x188] sm:$0xff]  ;;  %v4169_v8 = vsub.f32 %v110_v1, %v283_v50  ;;  %v4171_v28 = vpack.c.bf16 %v1629_v53, %v1625_v10 }
  0x59   :  { %6435 = vst [vmem:[#allocation137_spill] sm:$0xff] %v4147_v43  ;;  %6436 = vst [vmem:[#allocation138_spill] sm:$0xff] %v4151_v3  ;;  %v171_v43 = vld [vmem:[#allocation2 + $0x360] sm:$0xff]  ;;  %v4173_v3 = vsub.f32 %v172_v46, %v1625_v10  ;;  %3363 = vmatpush1.bf16.msra.mxu0 %v4161_v60  ;;  %2981 = vmatprep.subr.bf16.mxu1 %v4165_v4  ;;  %v4179_v56 = vpack.c.bf16 %v285_v54, %v281_v37  ;;  %v1631_v46 = vand.u32 4294901760, %v173_v6 }
  0x5a   :  { %6437 = vst [vmem:[#allocation139_spill] sm:$0xff] %v4153_v32  ;;  %6438 = vst [vmem:[#allocation140_spill] sm:$0xff] %v4155_v62  ;;  %v114_v62 = vld [vmem:[#allocation2 + $0x198] sm:$0xff]  ;;  %v176_v32 = vld [vmem:[#allocation2 + $0x388] sm:$0xff]  ;;  %v4181_v18 = vsub.f32 %v107_v23, %v281_v37  ;;  %v4183_v7 = vsub.f32 %v109_v12, %v285_v54  ;;  %v1627_v1 = vand.u32 4294901760, %v171_v43  ;;  %3365 = vmatprep.subr.bf16.mxu0 %v4171_v28  ;;  %v287_v45 = vand.u32 4294901760, %v112_v26 }
  0x5b   :  { %6439 = vst [vmem:[#allocation141_spill] sm:$0xff] %v4159_v22  ;;  %6440 = vst [vmem:[#allocation142_spill] sm:$0xff] %v4161_v60  ;;  %v4175_v22 = vsub.f32 %v174_v2, %v1629_v53  ;;  %v291_v2 = vand.u32 4294901760, %v114_v62  ;;  %v1633_v50 = vand.u32 4294901760, %v176_v32  ;;  %2983 = vmatpush1.bf16.msra.mxu1 %v4179_v56  ;;  %v1637_v53 = vand.u32 4294901760, %v178_v11 }
  0x5c   :  { %6441 = vst [vmem:[#allocation143_spill] sm:$0xff] %v4163_v16  ;;  %6442 = vst [vmem:[#allocation144_spill] sm:$0xff] %v4165_v4  ;;  %v4187_v10 = vsub.f32 %v171_v43, %v1627_v1  ;;  %v289_v60 = vand.u32 4294901760, %v111_v14  ;;  %v293_v4 = vand.u32 4294901760, %v113_v15  ;;  %v4189_v37 = vpack.c.bf16 %v1631_v46, %v1627_v1  ;;  %v115_v1 = vld [vmem:[#allocation2 + $0x1a0] sm:$0xff]  ;;  %v117_v16 = vld [vmem:[#allocation2 + $0x1b0] sm:$0xff] }
  0x5d   :  { %6443 = vst [vmem:[#allocation145_spill] sm:$0xff] %v4167_v48  ;;  %6444 = vst [vmem:[#allocation146_spill] sm:$0xff] %v4169_v8  ;;  %v4191_v12 = vsub.f32 %v173_v6, %v1631_v46  ;;  %v4193_v54 = vpack.c.bf16 %v291_v2, %v287_v45  ;;  %v4195_v23 = vsub.f32 %v112_v26, %v287_v45  ;;  %v182_v48 = vld [vmem:[#allocation2 + $0x3b8] sm:$0xff] }
  0x5e   :  { %6445 = vst [vmem:[#allocation147_spill] sm:$0xff] %v4171_v28  ;;  %6446 = vst [vmem:[#allocation148_spill] sm:$0xff] %v4173_v3  ;;  %v177_v3 = vld [vmem:[#allocation2 + $0x390] sm:$0xff]  ;;  %v116_v28 = vld [vmem:[#allocation2 + $0x1a8] sm:$0xff]  ;;  %v4197_v8 = vsub.f32 %v114_v62, %v291_v2  ;;  %v4199_v43 = vpack.c.bf16 %v1637_v53, %v1633_v50  ;;  %3367 = vmatpush1.bf16.msra.mxu0 %v4189_v37  ;;  %v4207_v6 = vpack.c.bf16 %v293_v4, %v289_v60 }
  0x5f   :  { %6447 = vst [vmem:[#allocation149_spill] sm:$0xff] %v4175_v22  ;;  %6448 = vst [vmem:[#allocation150_spill] sm:$0xff] %v4179_v56  ;;  %v175_v22 = vld [vmem:[#allocation2 + $0x380] sm:$0xff]  ;;  %v4201_v56 = vsub.f32 %v176_v32, %v1633_v50  ;;  %2985 = vmatprep.subr.bf16.mxu1 %v4193_v54  ;;  %v4209_v26 = vsub.f32 %v111_v14, %v289_v60  ;;  %v4211_v46 = vsub.f32 %v113_v15, %v293_v4 }
  0x60   :  { %6449 = vst [vmem:[#allocation151_spill] sm:$0xff] %v4181_v18  ;;  %6450 = vst [vmem:[#allocation152_spill] sm:$0xff] %v4183_v7  ;;  %v118_v7 = vld [vmem:[#allocation2 + $0x1b8] sm:$0xff]  ;;  %v180_v18 = vld [vmem:[#allocation2 + $0x3a8] sm:$0xff]  ;;  %v1635_v62 = vand.u32 4294901760, %v175_v22  ;;  %3369 = vmatprep.subr.bf16.mxu0 %v4199_v43  ;;  %v1639_v32 = vand.u32 4294901760, %v177_v3  ;;  %2987 = vmatpush1.bf16.msra.mxu1 %v4207_v6 }
  0x61   :  { %6451 = vst [vmem:[#allocation153_spill] sm:$0xff] %v4187_v10  ;;  %6452 = vst [vmem:[#allocation154_spill] sm:$0xff] %v4189_v37  ;;  %v4203_v10 = vsub.f32 %v178_v11, %v1637_v53  ;;  %v295_v45 = vand.u32 4294901760, %v116_v28  ;;  %v299_v11 = vand.u32 4294901760, %v118_v7  ;;  %v1641_v2 = vand.u32 4294901760, %v180_v18 }
  0x62   :  { %6453 = vst [vmem:[#allocation155_spill] sm:$0xff] %v4191_v12  ;;  %6454 = vst [vmem:[#allocation156_spill] sm:$0xff] %v4193_v54  ;;  %v4215_v50 = vsub.f32 %v175_v22, %v1635_v62  ;;  %v1645_v53 = vand.u32 4294901760, %v182_v48  ;;  %v297_v37 = vand.u32 4294901760, %v115_v1  ;;  %v301_v54 = vand.u32 4294901760, %v117_v16  ;;  %v121_v12 = vld [vmem:[#allocation2 + $0x1d0] sm:$0xff] }
  0x63   :  { %6455 = vst [vmem:[#allocation157_spill] sm:$0xff] %v4195_v23  ;;  %6456 = vst [vmem:[#allocation158_spill] sm:$0xff] %v4197_v8  ;;  %v4217_v60 = vpack.c.bf16 %v1639_v32, %v1635_v62  ;;  %v4219_v15 = vsub.f32 %v177_v3, %v1639_v32  ;;  %v4221_v4 = vpack.c.bf16 %v299_v11, %v295_v45  ;;  %v186_v23 = vld [vmem:[#allocation2 + $0x3d8] sm:$0xff]  ;;  %v119_v62 = vld [vmem:[#allocation2 + $0x1c0] sm:$0xff] }
  0x64   :  { %6457 = vst [vmem:[#allocation159_spill] sm:$0xff] %v4199_v43  ;;  %6458 = vst [vmem:[#allocation160_spill] sm:$0xff] %v4201_v56  ;;  %v181_v56 = vld [vmem:[#allocation2 + $0x3b0] sm:$0xff]  ;;  %v4223_v14 = vsub.f32 %v116_v28, %v295_v45  ;;  %v120_v43 = vld [vmem:[#allocation2 + $0x1c8] sm:$0xff]  ;;  %v4225_v8 = vsub.f32 %v118_v7, %v299_v11  ;;  %v4227_v22 = vpack.c.bf16 %v1645_v53, %v1641_v2 }
  0x65   :  { %6459 = vst [vmem:[#allocation161_spill] sm:$0xff] %v4203_v10  ;;  %6460 = vst [vmem:[#allocation162_spill] sm:$0xff] %v4207_v6  ;;  %v179_v10 = vld [vmem:[#allocation2 + $0x3a0] sm:$0xff]  ;;  %v4229_v6 = vsub.f32 %v180_v18, %v1641_v2  ;;  %3371 = vmatpush1.bf16.msra.mxu0 %v4217_v60  ;;  %2989 = vmatprep.subr.bf16.mxu1 %v4221_v4  ;;  %v4235_v3 = vpack.c.bf16 %v301_v54, %v297_v37  ;;  %v1647_v18 = vand.u32 4294901760, %v181_v56 }
  0x66   :  { %6461 = vst [vmem:[#allocation163_spill] sm:$0xff] %v4209_v26  ;;  %6462 = vst [vmem:[#allocation164_spill] sm:$0xff] %v4211_v46  ;;  %v122_v46 = vld [vmem:[#allocation2 + $0x1d8] sm:$0xff]  ;;  %v184_v26 = vld [vmem:[#allocation2 + $0x3c8] sm:$0xff]  ;;  %v4237_v28 = vsub.f32 %v115_v1, %v297_v37  ;;  %v4239_v32 = vsub.f32 %v117_v16, %v301_v54  ;;  %v1643_v7 = vand.u32 4294901760, %v179_v10  ;;  %3373 = vmatprep.subr.bf16.mxu0 %v4227_v22  ;;  %v303_v45 = vand.u32 4294901760, %v120_v43 }
  0x67   :  { %6463 = vst [vmem:[#allocation165_spill] sm:$0xff] %v4215_v50  ;;  %6464 = vst [vmem:[#allocation166_spill] sm:$0xff] %v4217_v60  ;;  %v4231_v50 = vsub.f32 %v182_v48, %v1645_v53  ;;  %v307_v48 = vand.u32 4294901760, %v122_v46  ;;  %v1649_v11 = vand.u32 4294901760, %v184_v26  ;;  %2991 = vmatpush1.bf16.msra.mxu1 %v4235_v3  ;;  %v1653_v53 = vand.u32 4294901760, %v186_v23 }
  0x68   :  { %6465 = vst [vmem:[#allocation167_spill] sm:$0xff] %v4219_v15  ;;  %6466 = vst [vmem:[#allocation168_spill] sm:$0xff] %v4221_v4  ;;  %v4243_v2 = vsub.f32 %v179_v10, %v1643_v7  ;;  %v305_v60 = vand.u32 4294901760, %v119_v62  ;;  %v309_v4 = vand.u32 4294901760, %v121_v12  ;;  %v4245_v37 = vpack.c.bf16 %v1647_v18, %v1643_v7  ;;  %v123_v7 = vld [vmem:[#allocation2 + $0x1e0] sm:$0xff]  ;;  %v125_v15 = vld [vmem:[#allocation2 + $0x1f0] sm:$0xff] }
  0x69   :  { %6467 = vst [vmem:[#allocation169_spill] sm:$0xff] %v4223_v14  ;;  %6468 = vst [vmem:[#allocation170_spill] sm:$0xff] %v4225_v8  ;;  %v4247_v16 = vsub.f32 %v181_v56, %v1647_v18  ;;  %v4249_v54 = vpack.c.bf16 %v307_v48, %v303_v45  ;;  %v4251_v1 = vsub.f32 %v120_v43, %v303_v45  ;;  %v190_v14 = vld [vmem:[#allocation2 + $0x3f8] sm:$0xff] }
  0x6a   :  { %6469 = vst [vmem:[#allocation171_spill] sm:$0xff] %v4227_v22  ;;  %6470 = vst [vmem:[#allocation172_spill] sm:$0xff] %v4229_v6  ;;  %v185_v6 = vld [vmem:[#allocation2 + $0x3d0] sm:$0xff]  ;;  %v124_v22 = vld [vmem:[#allocation2 + $0x1e8] sm:$0xff]  ;;  %v4253_v8 = vsub.f32 %v122_v46, %v307_v48  ;;  %v4255_v10 = vpack.c.bf16 %v1653_v53, %v1649_v11  ;;  %3375 = vmatpush1.bf16.msra.mxu0 %v4245_v37  ;;  %v4263_v56 = vpack.c.bf16 %v309_v4, %v305_v60 }
  0x6b   :  { %6471 = vst [vmem:[#allocation173_spill] sm:$0xff] %v4231_v50  ;;  %6472 = vst [vmem:[#allocation174_spill] sm:$0xff] %v4235_v3  ;;  %v183_v50 = vld [vmem:[#allocation2 + $0x3c0] sm:$0xff]  ;;  %v4257_v3 = vsub.f32 %v184_v26, %v1649_v11  ;;  %2993 = vmatprep.subr.bf16.mxu1 %v4249_v54  ;;  %v4265_v43 = vsub.f32 %v119_v62, %v305_v60  ;;  %v4267_v18 = vsub.f32 %v121_v12, %v309_v4  ;;  %v189_v62 = vld [vmem:[#allocation2 + $0x3f0] sm:$0xff] }
  0x6c   :  { %6473 = vst [vmem:[#allocation175_spill] sm:$0xff] %v4237_v28  ;;  %6474 = vst [vmem:[#allocation176_spill] sm:$0xff] %v4239_v32  ;;  %v126_v32 = vld [vmem:[#allocation2 + $0x1f8] sm:$0xff]  ;;  %v188_v28 = vld [vmem:[#allocation2 + $0x3e8] sm:$0xff]  ;;  %v1651_v46 = vand.u32 4294901760, %v183_v50  ;;  %3377 = vmatprep.subr.bf16.mxu0 %v4255_v10  ;;  %v1655_v26 = vand.u32 4294901760, %v185_v6  ;;  %2995 = vmatpush1.bf16.msra.mxu1 %v4263_v56 }
  0x6d   :  { %6475 = vst [vmem:[#allocation177_spill] sm:$0xff] %v4243_v2  ;;  %6476 = vst [vmem:[#allocation178_spill] sm:$0xff] %v4245_v37  ;;  %v4259_v2 = vsub.f32 %v186_v23, %v1653_v53  ;;  %v311_v45 = vand.u32 4294901760, %v124_v22  ;;  %v315_v23 = vand.u32 4294901760, %v126_v32  ;;  %v1657_v48 = vand.u32 4294901760, %v188_v28 }
  0x6e   :  { %6477 = vst [vmem:[#allocation179_spill] sm:$0xff] %v4247_v16  ;;  %6478 = vst [vmem:[#allocation180_spill] sm:$0xff] %v4249_v54  ;;  %v4271_v11 = vsub.f32 %v183_v50, %v1651_v46  ;;  %v1661_v53 = vand.u32 4294901760, %v190_v14  ;;  %v313_v37 = vand.u32 4294901760, %v123_v7  ;;  %v317_v54 = vand.u32 4294901760, %v125_v15 }
  0x6f   :  { %6479 = vst [vmem:[#allocation181_spill] sm:$0xff] %v4251_v1  ;;  %6480 = vst [vmem:[#allocation182_spill] sm:$0xff] %v4253_v8  ;;  %v4275_v60 = vsub.f32 %v185_v6, %v1655_v26  ;;  %v4277_v12 = vpack.c.bf16 %v315_v23, %v311_v45  ;;  %v4279_v4 = vsub.f32 %v124_v22, %v311_v45  ;;  %v5979_v45 = vand.u32 4294901760, %v3858_v19 }
  0x70   :  { %6481 = vst [vmem:[#allocation183_spill] sm:$0xff] %v4255_v10  ;;  %6482 = vst [vmem:[#allocation184_spill] sm:$0xff] %v4257_v3  ;;  %v4273_v3 = vpack.c.bf16 %v1655_v26, %v1651_v46  ;;  %v4281_v10 = vsub.f32 %v126_v32, %v315_v23  ;;  %v4287_v50 = vsub.f32 %v190_v14, %v1661_v53  ;;  %v1663_v32 = vand.u32 4294901760, %v189_v62 }
  0x71   :  { %6483 = vst [vmem:[#allocation185_spill] sm:$0xff] %v4259_v2  ;;  %6484 = vst [vmem:[#allocation186_spill] sm:$0xff] %v4263_v56  ;;  %v187_v2 = vld [vmem:[#allocation2 + $0x3e0] sm:$0xff]  ;;  %v4285_v56 = vsub.f32 %v188_v28, %v1657_v48  ;;  %2997 = vmatprep.subr.bf16.mxu1 %v4277_v12  ;;  %v4291_v46 = vpack.c.bf16 %v317_v54, %v313_v37  ;;  %v4293_v6 = vsub.f32 %v123_v7, %v313_v37 }
  0x72   :  { %6485 = vst [vmem:[#allocation187_spill] sm:$0xff] %v4265_v43  ;;  %6486 = vst [vmem:[#allocation188_spill] sm:$0xff] %v4267_v18  ;;  %v4283_v18 = vpack.c.bf16 %v1661_v53, %v1657_v48  ;;  %3379 = vmatpush1.bf16.msra.mxu0 %v4273_v3  ;;  %v4295_v26 = vsub.f32 %v125_v15, %v317_v54  ;;  %v1659_v22 = vand.u32 4294901760, %v187_v2  ;;  %v5982_v28 = vand.u32 4294901760, %v3862_v27 }
  0x73   :  { %6487 = vst [vmem:[#allocation189_spill] sm:$0xff] %v4271_v11  ;;  %6488 = vst [vmem:[#allocation190_spill] sm:$0xff] %v4273_v3  ;;  %2999 = vmatpush1.bf16.msra.mxu1 %v4291_v46  ;;  %v4309_v7 = vsub.f32 %v189_v62, %v1663_v32  ;;  %v355_v53 = vsub.f32 %v3858_v19, %v5979_v45  ;;  %v6503_v37 = vand.u32 4294901760, %v3868_v33 }
  0x74   :  { %6489 = vst [vmem:[#allocation191_spill] sm:$0xff] %v4275_v60  ;;  %6490 = vst [vmem:[#allocation192_spill] sm:$0xff] %v4277_v12  ;;  %3381 = vmatprep.subr.bf16.mxu0 %v4283_v18  ;;  %v4302_v23 = vsub.f32 %v187_v2, %v1659_v22  ;;  %v4307_v54 = vpack.c.bf16 %v1663_v32, %v1659_v22  ;;  %v367_v14 = vsub.f32 %v3862_v27, %v5982_v28 }
  0x75   :  { %6491 = vst [vmem:[#allocation193_spill] sm:$0xff] %v4279_v4  ;;  %6492 = vst [vmem:[#allocation194_spill] sm:$0xff] %v4281_v10  ;;  %v6502_v2 = vand.u32 4294901760, %v3866_v29  ;;  %v1713_v15 = vsub.f32 %v3868_v33, %v6503_v37  ;;  %v6504_v22 = vand.u32 4294901760, %v3872_v35  ;;  %v6505_v32 = vand.u32 4294901760, %v3874_v36 }
  0x76   :  { %6493 = vst [vmem:[#allocation195_spill] sm:$0xff] %v4283_v18  ;;  %6494 = vst [vmem:[#allocation196_spill] sm:$0xff] %v4285_v56  ;;  %3383 = vmatpush1.bf16.msra.mxu0 %v4307_v54  ;;  %v368_v28 = vand.u32 4294901760, %v367_v14  ;;  %v6002_v18 = vand.u32 4294901760, %v3878_v39 }
  0x77   :  { %6495 = vst [vmem:[#allocation197_spill] sm:$0xff] %v4287_v50  ;;  %6496 = vst [vmem:[#allocation198_spill] sm:$0xff] %v4291_v46  ;;  %v1701_v48 = vsub.f32 %v3866_v29, %v6502_v2  ;;  %v361_v62 = vsub.f32 %v3872_v35, %v6504_v22  ;;  %v373_v45 = vsub.f32 %v3874_v36, %v6505_v32  ;;  %v356_v46 = vand.u32 4294901760, %v355_v53 }
  0x78   :  { %6497 = vst [vmem:[#allocation199_spill] sm:$0xff] %v4293_v6  ;;  %6498 = vst [vmem:[#allocation200_spill] sm:$0xff] %v4295_v26  ;;  %v6000_v2 = vand.u32 4294901760, %v3883_v49  ;;  %v1714_v3 = vand.u32 4294901760, %v1713_v15  ;;  %v1707_v22 = vsub.f32 %v3878_v39, %v6002_v18  ;;  %v5997_v53 = vand.u32 4294901760, %v3887_v51 }
  0x79   :  { %6499 = vst [vmem:[#allocation201_spill] sm:$0xff] %v4302_v23  ;;  %6500 = vst [vmem:[#allocation202_spill] sm:$0xff] %v4307_v54  ;;  %v1702_v12 = vand.u32 4294901760, %v1701_v48  ;;  %v362_v29 = vand.u32 4294901760, %v361_v62  ;;  %v374_v37 = vand.u32 4294901760, %v373_v45  ;;  %v3000_v33 = vpack.c.bf16 %v368_v28, %v356_v46 }
  0x7a   :  { %6501 = vst [vmem:[#allocation203_spill] sm:$0xff] %v4309_v7  ;;  %v1719_v32 = vsub.f32 %v3883_v49, %v6000_v2  ;;  %v5998_v36 = vand.u32 4294901760, %v3889_v55  ;;  %v5999_v48 = vand.u32 4294901760, %v3893_v57  ;;  %v1708_v45 = vand.u32 4294901760, %v1707_v22 }
  0x7b   :  { %v3384_v14 = vpack.c.bf16 %v1714_v3, %v1702_v12  ;;  %v4339_v54 = vpack.c.bf16 %v374_v37, %v362_v29  ;;  %3001 = vmatprep.subr.bf16.mxu1 %v3000_v33  ;;  %v379_v28 = vsub.f32 %v3887_v51, %v5997_v53  ;;  %v6001_v15 = vand.u32 4294901760, %v3895_v58 }
  0x7c   :  { %v1720_v46 = vand.u32 4294901760, %v1719_v32  ;;  %v391_v3 = vsub.f32 %v3889_v55, %v5998_v36  ;;  %v1725_v29 = vsub.f32 %v3893_v57, %v5999_v48  ;;  %v6003_v12 = vand.u32 4294901760, %v3901_v63 }
  0x7d   :  { %3385 = vmatprep.subr.bf16.mxu0 %v3384_v14  ;;  %v6004_v33 = vand.u32 4294901760, %v3903_v0  ;;  %v380_v37 = vand.u32 4294901760, %v379_v28  ;;  %v1737_v22 = vsub.f32 %v3895_v58, %v6001_v15  ;;  %v6009_v32 = vand.u32 4294901760, %v3907_v9 }
  0x7e   :  { %v4355_v62 = vpack.c.bf16 %v1720_v46, %v1708_v45  ;;  %v392_v14 = vand.u32 4294901760, %v391_v3  ;;  %v1726_v53 = vand.u32 4294901760, %v1725_v29  ;;  %v385_v36 = vsub.f32 %v3901_v63, %v6003_v12 }
  0x7f   :  { %v397_v48 = vsub.f32 %v3903_v0, %v6004_v33  ;;  %v1738_v2 = vand.u32 4294901760, %v1737_v22  ;;  %v1731_v45 = vsub.f32 %v3907_v9, %v6009_v32  ;;  %v6007_v46 = vand.u32 4294901760, %v3911_v17 }
  0x80   :  { %v4371_v28 = vpack.c.bf16 %v392_v14, %v380_v37  ;;  %v386_v15 = vand.u32 4294901760, %v385_v36  ;;  %v6008_v29 = vand.u32 4294901760, %v3915_v20  ;;  %v6010_v22 = vand.u32 4294901760, %v3917_v24 }
  0x81   :  { %v398_v3 = vand.u32 4294901760, %v397_v48  ;;  %v4374_v18 = vpack.c.bf16 %v1738_v2, %v1726_v53  ;;  %v1732_v12 = vand.u32 4294901760, %v1731_v45  ;;  %v1743_v33 = vsub.f32 %v3911_v17, %v6007_v46 }
  0x82   :  { %v403_v37 = vsub.f32 %v3915_v20, %v6008_v29  ;;  %v6015_v36 = vand.u32 4294901760, %v3921_v30  ;;  %v6016_v48 = vand.u32 4294901760, %v3923_v31  ;;  %v415_v2 = vsub.f32 %v3917_v24, %v6010_v22 }
  0x83   :  { %v4380_v0 = vpack.c.bf16 %v398_v3, %v386_v15  ;;  %v1744_v14 = vand.u32 4294901760, %v1743_v33  ;;  %v6021_v53 = vand.u32 4294901760, %v3929_v41  ;;  %v6022_v45 = vand.u32 4294901760, %v3931_v42 }
  0x84   :  { %v404_v46 = vand.u32 4294901760, %v403_v37  ;;  %v1749_v15 = vsub.f32 %v3921_v30, %v6015_v36  ;;  %v1761_v3 = vsub.f32 %v3923_v31, %v6016_v48  ;;  %v6025_v29 = vand.u32 4294901760, %v3935_v52 }
  0x85   :  { %v4399_v33 = vpack.c.bf16 %v1744_v14, %v1732_v12  ;;  %v416_v32 = vand.u32 4294901760, %v415_v2  ;;  %v409_v22 = vsub.f32 %v3929_v41, %v6021_v53  ;;  %v421_v37 = vsub.f32 %v3931_v42, %v6022_v45 }
  0x86   :  { %v1750_v24 = vand.u32 4294901760, %v1749_v15  ;;  %v1762_v20 = vand.u32 4294901760, %v1761_v3  ;;  %v1755_v36 = vsub.f32 %v3935_v52, %v6025_v29  ;;  %v6023_v48 = vand.u32 4294901760, %v3939_v61 }
  0x87   :  { %v4411_v31 = vpack.c.bf16 %v416_v32, %v404_v46  ;;  %v410_v12 = vand.u32 4294901760, %v409_v22  ;;  %v422_v14 = vand.u32 4294901760, %v421_v37  ;;  %v6024_v2 = vand.u32 4294901760, %v3943_v5 }
  0x88   :  { %v4414_v30 = vpack.c.bf16 %v1762_v20, %v1750_v24  ;;  %v1756_v53 = vand.u32 4294901760, %v1755_v36  ;;  %v1767_v15 = vsub.f32 %v3939_v61, %v6023_v48  ;;  %v6026_v3 = vand.u32 4294901760, %v3945_v13 }
  0x89   :  { %v4420_v45 = vpack.c.bf16 %v422_v14, %v410_v12  ;;  %v427_v32 = vsub.f32 %v3943_v5, %v6024_v2  ;;  %v6031_v46 = vand.u32 4294901760, %v3949_v40  ;;  %v6032_v22 = vand.u32 4294901760, %v3951_v25 }
  0x8a   :  { %v1768_v37 = vand.u32 4294901760, %v1767_v15  ;;  %v439_v20 = vsub.f32 %v3945_v13, %v6026_v3  ;;  %v6037_v24 = vand.u32 4294901760, %v3957_v21  ;;  %v6038_v36 = vand.u32 4294901760, %v3959_v44 }
  0x8b   :  { %v428_v48 = vand.u32 4294901760, %v427_v32  ;;  %v1773_v12 = vsub.f32 %v3949_v40, %v6031_v46  ;;  %v1785_v14 = vsub.f32 %v3951_v25, %v6032_v22  ;;  %v6039_v2 = vand.u32 4294901760, %v3963_v47 }
  0x8c   :  { %v4439_v15 = vpack.c.bf16 %v1768_v37, %v1756_v53  ;;  %v440_v29 = vand.u32 4294901760, %v439_v20  ;;  %v433_v3 = vsub.f32 %v3957_v21, %v6037_v24  ;;  %v445_v32 = vsub.f32 %v3959_v44, %v6038_v36 }
  0x8d   :  { %v1774_v13 = vand.u32 4294901760, %v1773_v12  ;;  %v1786_v5 = vand.u32 4294901760, %v1785_v14  ;;  %v1779_v46 = vsub.f32 %v3963_v47, %v6039_v2  ;;  %v6042_v22 = vand.u32 4294901760, %v3967_v38 }
  0x8e   :  { %v4451_v25 = vpack.c.bf16 %v440_v29, %v428_v48  ;;  %v434_v53 = vand.u32 4294901760, %v433_v3  ;;  %v446_v37 = vand.u32 4294901760, %v445_v32  ;;  %v6047_v20 = vand.u32 4294901760, %v3971_v59  ;;  %v6506_v48 = vld [vmem:[#allocation64_spill] sm:$0xff]  ;;  %v6507_v32 = vld [vmem:[#allocation65_spill] sm:$0xff] }
  0x8f   :  { %v4454_v40 = vpack.c.bf16 %v1786_v5, %v1774_v13  ;;  %v1780_v24 = vand.u32 4294901760, %v1779_v46  ;;  %v1791_v12 = vsub.f32 %v3967_v38, %v6042_v22  ;;  %v6052_v14 = vand.u32 4294901760, %v3973_v34  ;;  %v6508_v13 = vld [vmem:[#allocation67_spill] sm:$0xff]  ;;  %v6509_v22 = vld [vmem:[#allocation68_spill] sm:$0xff] }
  0x90   :  { %v4460_v36 = vpack.c.bf16 %v446_v37, %v434_v53  ;;  %v451_v29 = vsub.f32 %v3971_v59, %v6047_v20  ;;  %v6057_v3 = vand.u32 4294901760, %v6506_v48  ;;  %v6058_v2 = vand.u32 4294901760, %v6507_v32  ;;  %v6510_v20 = vld [vmem:[#allocation69_spill] sm:$0xff] }
  0x91   :  { %v1792_v47 = vand.u32 4294901760, %v1791_v12  ;;  %v463_v5 = vsub.f32 %v3973_v34, %v6052_v14  ;;  %v6065_v46 = vand.u32 4294901760, %v6508_v13  ;;  %v6066_v38 = vand.u32 4294901760, %v6509_v22 }
  0x92   :  { %v452_v44 = vand.u32 4294901760, %v451_v29  ;;  %v1797_v53 = vsub.f32 %v6506_v48, %v6057_v3  ;;  %v1809_v37 = vsub.f32 %v6507_v32, %v6058_v2  ;;  %v6068_v59 = vand.u32 4294901760, %v6510_v20  ;;  %v6511_v2 = vld [vmem:[#allocation71_spill] sm:$0xff] }
  0x93   :  { %v4479_v12 = vpack.c.bf16 %v1792_v47, %v1780_v24  ;;  %v464_v21 = vand.u32 4294901760, %v463_v5  ;;  %v457_v14 = vsub.f32 %v6508_v13, %v6065_v46  ;;  %v469_v29 = vsub.f32 %v6509_v22, %v6066_v38  ;;  %v6512_v5 = vld [vmem:[#allocation73_spill] sm:$0xff] }
  0x94   :  { %v1798_v34 = vand.u32 4294901760, %v1797_v53  ;;  %v1810_v61 = vand.u32 4294901760, %v1809_v37  ;;  %v1803_v3 = vsub.f32 %v6510_v20, %v6068_v59  ;;  %v6070_v32 = vand.u32 4294901760, %v6511_v2  ;;  %v6513_v37 = vld [vmem:[#allocation74_spill] sm:$0xff] }
  0x95   :  { %v4491_v48 = vpack.c.bf16 %v464_v21, %v452_v44  ;;  %v458_v47 = vand.u32 4294901760, %v457_v14  ;;  %v470_v24 = vand.u32 4294901760, %v469_v29  ;;  %v6073_v52 = vand.u32 4294901760, %v6512_v5  ;;  %v6514_v44 = vld [vmem:[#allocation76_spill] sm:$0xff]  ;;  %v6515_v29 = vld [vmem:[#allocation77_spill] sm:$0xff] }
  0x96   :  { %v4494_v42 = vpack.c.bf16 %v1810_v61, %v1798_v34  ;;  %v1804_v46 = vand.u32 4294901760, %v1803_v3  ;;  %v1815_v53 = vsub.f32 %v6511_v2, %v6070_v32  ;;  %v6077_v38 = vand.u32 4294901760, %v6513_v37  ;;  %v6516_v61 = vld [vmem:[#allocation79_spill] sm:$0xff]  ;;  %v6517_v32 = vld [vmem:[#allocation80_spill] sm:$0xff] }
  0x97   :  { %v4500_v22 = vpack.c.bf16 %v470_v24, %v458_v47  ;;  %v475_v21 = vsub.f32 %v6512_v5, %v6073_v52  ;;  %v6081_v14 = vand.u32 4294901760, %v6514_v44  ;;  %v6082_v59 = vand.u32 4294901760, %v6515_v29  ;;  %v6518_v52 = vld [vmem:[#allocation81_spill] sm:$0xff] }
  0x98   :  { %v1816_v20 = vand.u32 4294901760, %v1815_v53  ;;  %v487_v34 = vsub.f32 %v6513_v37, %v6077_v38  ;;  %v6089_v3 = vand.u32 4294901760, %v6516_v61  ;;  %v6090_v2 = vand.u32 4294901760, %v6517_v32 }
  0x99   :  { %v476_v13 = vand.u32 4294901760, %v475_v21  ;;  %v1821_v47 = vsub.f32 %v6514_v44, %v6081_v14  ;;  %v1833_v24 = vsub.f32 %v6515_v29, %v6082_v59  ;;  %v6092_v5 = vand.u32 4294901760, %v6518_v52  ;;  %v6519_v59 = vld [vmem:[#allocation83_spill] sm:$0xff] }
  0x9a   :  { %v4519_v53 = vpack.c.bf16 %v1816_v20, %v1804_v46  ;;  %v488_v41 = vand.u32 4294901760, %v487_v34  ;;  %v481_v38 = vsub.f32 %v6516_v61, %v6089_v3  ;;  %v493_v21 = vsub.f32 %v6517_v32, %v6090_v2  ;;  %v6520_v34 = vld [vmem:[#allocation85_spill] sm:$0xff] }
  0x9b   :  { %v1822_v37 = vand.u32 4294901760, %v1821_v47  ;;  %v1834_v17 = vand.u32 4294901760, %v1833_v24  ;;  %v1827_v14 = vsub.f32 %v6518_v52, %v6092_v5  ;;  %v6094_v29 = vand.u32 4294901760, %v6519_v59  ;;  %v6521_v24 = vld [vmem:[#allocation86_spill] sm:$0xff] }
  0x9c   :  { %v4531_v44 = vpack.c.bf16 %v488_v41, %v476_v13  ;;  %v482_v20 = vand.u32 4294901760, %v481_v38  ;;  %v494_v46 = vand.u32 4294901760, %v493_v21  ;;  %v6097_v9 = vand.u32 4294901760, %v6520_v34  ;;  %v6522_v13 = vld [vmem:[#allocation88_spill] sm:$0xff]  ;;  %v6523_v21 = vld [vmem:[#allocation89_spill] sm:$0xff] }
  0x9d   :  { %v4534_v63 = vpack.c.bf16 %v1834_v17, %v1822_v37  ;;  %v1828_v3 = vand.u32 4294901760, %v1827_v14  ;;  %v1839_v47 = vsub.f32 %v6519_v59, %v6094_v29  ;;  %v6101_v2 = vand.u32 4294901760, %v6521_v24  ;;  %v6524_v37 = vld [vmem:[#allocation91_spill] sm:$0xff]  ;;  %v6525_v29 = vld [vmem:[#allocation92_spill] sm:$0xff] }
  0x9e   :  { %v4540_v32 = vpack.c.bf16 %v494_v46, %v482_v20  ;;  %v499_v41 = vsub.f32 %v6520_v34, %v6097_v9  ;;  %v6102_v38 = vand.u32 4294901760, %v6522_v13  ;;  %v6105_v5 = vand.u32 4294901760, %v6523_v21  ;;  %v6526_v9 = vld [vmem:[#allocation93_spill] sm:$0xff] }
  0x9f   :  { %v1840_v52 = vand.u32 4294901760, %v1839_v47  ;;  %v511_v17 = vsub.f32 %v6521_v24, %v6101_v2  ;;  %v6106_v14 = vand.u32 4294901760, %v6524_v37  ;;  %v6108_v59 = vand.u32 4294901760, %v6525_v29 }
  0xa0   :  { %v500_v61 = vand.u32 4294901760, %v499_v41  ;;  %v1845_v20 = vsub.f32 %v6522_v13, %v6102_v38  ;;  %v1857_v46 = vsub.f32 %v6523_v21, %v6105_v5  ;;  %v6109_v34 = vand.u32 4294901760, %v6526_v9  ;;  %v4571_v38 = vpop.permute.xlu0 %34  ;;  %v6529_v5 = vld [vmem:[#allocation8_spill] sm:$0xff] }
  0xa1   :  { %v4559_v47 = vpack.c.bf16 %v1840_v52, %v1828_v3  ;;  %v512_v58 = vand.u32 4294901760, %v511_v17  ;;  %v4564_v2 = vsub.f32 %v6524_v37, %v6106_v14  ;;  %v4569_v41 = vsub.f32 %v6525_v29, %v6108_v59  ;;  %6527 = vst [vmem:[#allocation204_spill] sm:$0xff] %v4571_v38  ;;  %v6528_v3 = vld [vmem:[#allocation95_spill] sm:$0xff]  ;;  %v6530_v14 = vld [vmem:[#allocation9_spill] sm:$0xff]  ;;  %v6531_v37 = vld [vmem:[#allocation10_spill] sm:$0xff] }
  0xa2   :  { %v1846_v13 = vand.u32 4294901760, %v1845_v20  ;;  %v1858_v24 = vand.u32 4294901760, %v1857_v46  ;;  %v4576_v52 = vsub.f32 %v6526_v9, %v6109_v34  ;;  %vm39_vm0 = vcmp.eq.s32.totalorder %v4571_v38, %v6529_v5  ;;  %v6532_v59 = vld [vmem:[#allocation11_spill] sm:$0xff] }
  0xa3   :  { %vm40_vm1 = vcmp.eq.s32.totalorder %v4571_v38, %v6530_v14  ;;  %vm41_vm2 = vcmp.eq.s32.totalorder %v4571_v38, %v6531_v37  ;;  %vm42_vm3 = vcmp.eq.s32.totalorder %v4571_v38, %v6532_v59  ;;  %v3808_v20 = vmov 0.0   ;;  %v6642_v38 = vld [vmem:[#allocation49_spill] sm:$0xff] }
  0xa4   :  { %v2905_v46 = vsel %vm40_vm1, 1.0, %v3808_v20  ;;  %v2907_v34 = vsel %vm42_vm3, 1.0, %v3808_v20  ;;  %v2904_v17 = vsel %vm39_vm0, 1.0, %v3808_v20  ;;  %v2906_v9 = vsel %vm41_vm2, 1.0, %v3808_v20  ;;  %v4607_v51 = vpop.permute.xlu0 %37 }
  0xa5   :  { %v4599_v29 = vsub.f32 %v2905_v46, %v2905_v46  ;;  %v4601_v21 = vsub.f32 %v2907_v34, %v2907_v34  ;;  %v4603_v57 = vsub.f32 %v2904_v17, %v2904_v17  ;;  %v4605_v55 = vsub.f32 %v2906_v9, %v2906_v9  ;;  %6537 = vst [vmem:[#allocation209_spill] sm:$0xff] %v4607_v51 }
  0xa6   :  { %v4609_v49 = vpack.c.bf16 %v512_v58, %v500_v61  ;;  %v4611_v39 = vpack.c.bf16 %v1858_v24, %v1846_v13  ;;  %v506_v35 = vand.u32 4294901760, %v4564_v2  ;;  %v518_v27 = vand.u32 4294901760, %v4569_v41 }
  0xa7   :  { %6533 = vst [vmem:[#allocation205_spill] sm:$0xff] %v4599_v29  ;;  %6534 = vst [vmem:[#allocation206_spill] sm:$0xff] %v4601_v21  ;;  %vm43_vm4 = vcmp.eq.s32.totalorder %v4607_v51, %v6529_v5  ;;  %vm44_vm5 = vcmp.eq.s32.totalorder %v4607_v51, %v6530_v14  ;;  %vm45_vm6 = vcmp.eq.s32.totalorder %v4607_v51, %v6531_v37  ;;  %v6133_v17 = vand.u32 4294901760, %v4599_v29  ;;  %v6644_v14 = vld [vmem:[#allocation52_spill] sm:$0xff] }
  0xa8   :  { %6535 = vst [vmem:[#allocation207_spill] sm:$0xff] %v4603_v57  ;;  %6536 = vst [vmem:[#allocation208_spill] sm:$0xff] %v4605_v55  ;;  %vm46_vm7 = vcmp.eq.s32.totalorder %v4607_v51, %v6532_v59  ;;  %v2908_v58 = vsel %vm43_vm4, 1.0, %v3808_v20  ;;  %v2909_v9 = vsel %vm44_vm5, 1.0, %v3808_v20  ;;  %v2910_v2 = vsel %vm45_vm6, 1.0, %v3808_v20 }
  0xa9   :  { %v2911_v61 = vsel %vm46_vm7, 1.0, %v3808_v20  ;;  %v4635_v34 = vsub.f32 %v2909_v9, %v2909_v9  ;;  %v4637_v24 = vsub.f32 %v2908_v58, %v2908_v58  ;;  %v4641_v41 = vsub.f32 %v2910_v2, %v2910_v2 }
  0xaa   :  { %v4639_v13 = vsub.f32 %v2911_v61, %v2911_v61  ;;  %v6136_v46 = vand.u32 4294901760, %v4601_v21  ;;  %v6139_v5 = vand.u32 4294901760, %v4603_v57  ;;  %v322_v2 = vsub.f32 %v4599_v29, %v6133_v17 }
  0xab   :  { %6538 = vst [vmem:[#allocation210_spill] sm:$0xff] %v4635_v34  ;;  %6539 = vst [vmem:[#allocation211_spill] sm:$0xff] %v4637_v24  ;;  %v6542_v19 = vand.u32 4294901760, %v4605_v55  ;;  %v6543_v9 = vand.u32 4294901760, %v4635_v34  ;;  %v6545_v29 = vand.u32 4294901760, %v4637_v24 }
  0xac   :  { %6540 = vst [vmem:[#allocation212_spill] sm:$0xff] %v4639_v13  ;;  %6541 = vst [vmem:[#allocation213_spill] sm:$0xff] %v4641_v41  ;;  %v1668_v61 = vsub.f32 %v4601_v21, %v6136_v46  ;;  %v328_v37 = vsub.f32 %v4603_v57, %v6139_v5  ;;  %v6544_v51 = vand.u32 4294901760, %v4639_v13  ;;  %v6546_v21 = vand.u32 4294901760, %v4641_v41 }
  0xad   :  { %v1674_v20 = vsub.f32 %v4605_v55, %v6542_v19  ;;  %v338_v58 = vsub.f32 %v4635_v34, %v6543_v9  ;;  %v344_v46 = vsub.f32 %v4637_v24, %v6545_v29  ;;  %v323_v57 = vand.u32 4294901760, %v322_v2  ;;  %v6554_v2 = vld [vmem:[#allocation105_spill] sm:$0xff] }
  0xae   :  { %v1684_v17 = vsub.f32 %v4639_v13, %v6544_v51  ;;  %v1690_v5 = vsub.f32 %v4641_v41, %v6546_v21  ;;  %v1669_v7 = vand.u32 4294901760, %v1668_v61  ;;  %v329_v23 = vand.u32 4294901760, %v328_v37  ;;  %v6548_v13 = vld [vmem:[#allocation97_spill] sm:$0xff]  ;;  %v6549_v37 = vld [vmem:[#allocation98_spill] sm:$0xff] }
  0xaf   :  { %v1675_v19 = vand.u32 4294901760, %v1674_v20  ;;  %v339_v55 = vand.u32 4294901760, %v338_v58  ;;  %v345_v6 = vand.u32 4294901760, %v344_v46  ;;  %324 = vmatprep.mubr.f32.mxu1 %v323_v57  ;;  %v4675_v34 = vpack.c.bf16 %v518_v27, %v506_v35  ;;  %v6550_v58 = vld [vmem:[#allocation100_spill] sm:$0xff]  ;;  %v6551_v46 = vld [vmem:[#allocation101_spill] sm:$0xff]  ;;  %v6552_v57 = vld [vmem:[#allocation103_spill] sm:$0xff] }
  0xb0   :  { %v1685_v26 = vand.u32 4294901760, %v1684_v17  ;;  %v1691_v9 = vand.u32 4294901760, %v1690_v5  ;;  %1670 = vmatprep.mubr.f32.mxu0 %v1669_v7  ;;  %v1852_v51 = vand.u32 4294901760, %v4576_v52  ;;  %v6547_v29 = vand.u32 4294901760, %v6528_v3  ;;  %330 = vmatmul.mubr.f32.vlgmr.msra.gmra.mrb[0].mxu1 %v329_v23  ;;  %v6553_v52 = vld [vmem:[#allocation104_spill] sm:$0xff]  ;;  %v6652_v59 = vld [vmem:[#allocation205_spill] sm:$0xff] }
  0xb1   :  { %v6156_v21 = vand.u32 4294901760, %v6548_v13  ;;  %1676 = vmatmul.mubr.f32.vlgmr.msra.gmra.mrb[0].mxu0 %v1675_v19  ;;  %v6154_v20 = vand.u32 4294901760, %v6549_v37  ;;  %v6155_v17 = vand.u32 4294901760, %v6550_v58  ;;  %v6157_v5 = vand.u32 4294901760, %v6551_v46  ;;  %3003 = vmatpush1.bf16.msra.mxu1 %v4339_v54 }
  0xb2   :  { %v1863_v24 = vsub.f32 %v6528_v3, %v6547_v29  ;;  %v6160_v7 = vand.u32 4294901760, %v6552_v57  ;;  %3387 = vmatpush1.bf16.msra.mxu0 %v4355_v62  ;;  %v6158_v23 = vand.u32 4294901760, %v6553_v52  ;;  %340 = vmatprep.mubr.f32.mxu1 %v339_v55 }
  0xb3   :  { %v523_v35 = vsub.f32 %v6548_v13, %v6156_v21  ;;  %3005 = vmatprep.subr.bf16.mxu1 %v4371_v28  ;;  %v535_v19 = vsub.f32 %v6549_v37, %v6154_v20  ;;  %v1869_v54 = vsub.f32 %v6550_v58, %v6155_v17  ;;  %v1881_v62 = vsub.f32 %v6551_v46, %v6157_v5  ;;  %v6583_v46 = vld [vmem:[#allocation143_spill] sm:$0xff] }
  0xb4   :  { %v1864_v27 = vand.u32 4294901760, %v1863_v24  ;;  %v6555_v24 = vld [vmem:[#allocation107_spill] sm:$0xff]  ;;  %1686 = vmatprep.mubr.f32.mxu0 %v1685_v26  ;;  %3389 = vmatprep.subr.bf16.mxu0 %v4374_v18  ;;  %v529_v20 = vsub.f32 %v6552_v57, %v6160_v7  ;;  %v541_v17 = vsub.f32 %v6553_v52, %v6158_v23  ;;  %v6556_v26 = vand.u32 4294901760, %v6554_v2  ;;  %v6557_v23 = vld [vmem:[#allocation109_spill] sm:$0xff]  ;;  %v6576_v52 = vld [vmem:[#allocation134_spill] sm:$0xff] }
  0xb5   :  { %v6159_v29 = vand.u32 4294901760, %v6555_v24  ;;  %v524_v28 = vand.u32 4294901760, %v523_v35  ;;  %346 = vmatmul.mubr.f32.gmra.mrb[2].mxu1 %v345_v6  ;;  %1692 = vmatmul.mubr.f32.gmra.mrb[2].mxu0 %v1691_v9  ;;  %v536_v21 = vand.u32 4294901760, %v535_v19  ;;  %v1870_v5 = vand.u32 4294901760, %v1869_v54 }
  0xb6   :  { %v4705_v55 = vpack.c.bf16 %v1864_v27, %v1852_v51  ;;  %v1882_v61 = vand.u32 4294901760, %v1881_v62  ;;  %v1875_v18 = vsub.f32 %v6554_v2, %v6556_v26  ;;  %3007 = vmatpush1.bf16.msra.mxu1 %v4380_v0  ;;  %3391 = vmatpush1.bf16.msra.mxu0 %v4399_v33  ;;  %v530_v51 = vand.u32 4294901760, %v529_v20 }
  0xb7   :  { %v542_v27 = vand.u32 4294901760, %v541_v17  ;;  %v1887_v35 = vsub.f32 %v6555_v24, %v6159_v29  ;;  %v6163_v6 = vand.u32 4294901760, %v6557_v23  ;;  %v6161_v9 = vmov 1.0   ;;  %v6558_v17 = vld [vmem:[#allocation110_spill] sm:$0xff]  ;;  %3009 = vmatprep.subr.bf16.mxu1 %v4411_v31  ;;  %3393 = vmatprep.subr.bf16.mxu0 %v4414_v30  ;;  %v6559_v29 = vld [vmem:[#allocation112_spill] sm:$0xff] }
  0xb8   :  { %2912 = vmatprep.mubr.msk.f32.mxu1 %vm40_vm1, %v6161_v9  ;;  %2924 = vmatprep.mubr.msk.f32.mxu0 %vm42_vm3, %v6161_v9  ;;  %v4730_v0 = vpack.c.bf16 %v536_v21, %v524_v28  ;;  %v4732_v33 = vpack.c.bf16 %v1882_v61, %v1870_v5  ;;  %v1876_v20 = vand.u32 4294901760, %v1875_v18  ;;  %v6164_v19 = vand.u32 4294901760, %v6558_v17  ;;  %v6560_v5 = vld [vmem:[#allocation113_spill] sm:$0xff]  ;;  %v6561_v28 = vld [vmem:[#allocation115_spill] sm:$0xff]  ;;  %v6562_v31 = vld [vmem:[#allocation116_spill] sm:$0xff] }
  0xb9   :  { %v4737_v54 = vpack.c.bf16 %v542_v27, %v530_v51  ;;  %v1888_v62 = vand.u32 4294901760, %v1887_v35  ;;  %v547_v26 = vsub.f32 %v6557_v23, %v6163_v6  ;;  %v6165_v7 = vand.u32 4294901760, %v6559_v29  ;;  %v6563_v35 = vld [vmem:[#allocation117_spill] sm:$0xff] }
  0xba   :  { %v559_v21 = vsub.f32 %v6558_v17, %v6164_v19  ;;  %v6168_v61 = vand.u32 4294901760, %v6560_v5  ;;  %v6171_v18 = vand.u32 4294901760, %v6561_v28  ;;  %v6173_v9 = vand.u32 4294901760, %v6562_v31  ;;  %3011 = vmatpush1.bf16.msra.mxu1 %v4420_v45  ;;  %3395 = vmatpush1.bf16.msra.mxu0 %v4439_v15 }
  0xbb   :  { %v4751_v30 = vpack.c.bf16 %v1888_v62, %v1876_v20  ;;  %v548_v51 = vand.u32 4294901760, %v547_v26  ;;  %v1893_v27 = vsub.f32 %v6559_v29, %v6165_v7  ;;  %v6172_v6 = vand.u32 4294901760, %v6563_v35  ;;  %3013 = vmatprep.subr.bf16.mxu1 %v4451_v25  ;;  %3397 = vmatprep.subr.bf16.mxu0 %v4454_v40  ;;  %v6564_v26 = vld [vmem:[#allocation119_spill] sm:$0xff] }
  0xbc   :  { %v560_v19 = vand.u32 4294901760, %v559_v21  ;;  %v1905_v45 = vsub.f32 %v6560_v5, %v6168_v61  ;;  %v553_v15 = vsub.f32 %v6561_v28, %v6171_v18  ;;  %v565_v20 = vsub.f32 %v6562_v31, %v6173_v9  ;;  %v6565_v21 = vld [vmem:[#allocation121_spill] sm:$0xff]  ;;  %v6566_v9 = vld [vmem:[#allocation122_spill] sm:$0xff] }
  0xbd   :  { %v1894_v62 = vand.u32 4294901760, %v1893_v27  ;;  %v1899_v25 = vsub.f32 %v6563_v35, %v6172_v6  ;;  %v6176_v40 = vand.u32 4294901760, %v6564_v26  ;;  %v6175_v7 = vand.u32 4294901760, %v6565_v21 }
  0xbe   :  { %v4773_v41 = vpack.c.bf16 %v560_v19, %v548_v51  ;;  %v1906_v61 = vand.u32 4294901760, %v1905_v45  ;;  %v554_v5 = vand.u32 4294901760, %v553_v15  ;;  %v566_v29 = vand.u32 4294901760, %v565_v20  ;;  %3015 = vmatpush1.bf16.msra.mxu1 %v4460_v36  ;;  %3399 = vmatpush1.bf16.msra.mxu0 %v4479_v12  ;;  %v6567_v12 = vld [vmem:[#allocation124_spill] sm:$0xff]  ;;  %v6568_v45 = vld [vmem:[#allocation125_spill] sm:$0xff] }
  0xbf   :  { %v1900_v18 = vand.u32 4294901760, %v1899_v25  ;;  %v1911_v27 = vsub.f32 %v6564_v26, %v6176_v40  ;;  %v571_v6 = vsub.f32 %v6565_v21, %v6175_v7  ;;  %v6178_v17 = vand.u32 4294901760, %v6566_v9  ;;  %3017 = vmatprep.subr.bf16.mxu1 %v4491_v48  ;;  %3401 = vmatprep.subr.bf16.mxu0 %v4494_v42  ;;  %v6569_v40 = vld [vmem:[#allocation127_spill] sm:$0xff] }
  0xc0   :  { %v4786_v19 = vpack.c.bf16 %v1906_v61, %v1894_v62  ;;  %v4788_v36 = vpack.c.bf16 %v566_v29, %v554_v5  ;;  %v6179_v51 = vand.u32 4294901760, %v6567_v12  ;;  %v6181_v15 = vand.u32 4294901760, %v6568_v45  ;;  %v6570_v29 = vld [vmem:[#allocation128_spill] sm:$0xff]  ;;  %v6571_v61 = vld [vmem:[#allocation129_spill] sm:$0xff] }
  0xc1   :  { %v1912_v20 = vand.u32 4294901760, %v1911_v27  ;;  %v572_v25 = vand.u32 4294901760, %v571_v6  ;;  %v583_v7 = vsub.f32 %v6566_v9, %v6178_v17  ;;  %v6182_v23 = vand.u32 4294901760, %v6569_v40 }
  0xc2   :  { %v1917_v42 = vsub.f32 %v6567_v12, %v6179_v51  ;;  %v1929_v48 = vsub.f32 %v6568_v45, %v6181_v15  ;;  %3019 = vmatpush1.bf16.msra.mxu1 %v4500_v22  ;;  %3403 = vmatpush1.bf16.msra.mxu0 %v4519_v53  ;;  %v6572_v51 = vld [vmem:[#allocation131_spill] sm:$0xff]  ;;  %v6573_v62 = vand.u32 4294901760, %v6570_v29  ;;  %v6574_v53 = vand.u32 4294901760, %v6571_v61 }
  0xc3   :  { %v4806_v6 = vpack.c.bf16 %v1912_v20, %v1900_v18  ;;  %v584_v27 = vand.u32 4294901760, %v583_v7  ;;  %v577_v17 = vsub.f32 %v6569_v40, %v6182_v23  ;;  %v6186_v24 = vand.u32 4294901760, %v6572_v51  ;;  %3021 = vmatprep.subr.bf16.mxu1 %v4531_v44  ;;  %3405 = vmatprep.subr.bf16.mxu0 %v4534_v63  ;;  %v6575_v44 = vld [vmem:[#allocation133_spill] sm:$0xff] }
  0xc4   :  { %v1918_v15 = vand.u32 4294901760, %v1917_v42  ;;  %v1930_v5 = vand.u32 4294901760, %v1929_v48  ;;  %v589_v22 = vsub.f32 %v6570_v29, %v6573_v62  ;;  %v1923_v7 = vsub.f32 %v6571_v61, %v6574_v53  ;;  %v6578_v53 = vld [vmem:[#allocation137_spill] sm:$0xff] }
  0xc5   :  { %v4820_v18 = vpack.c.bf16 %v584_v27, %v572_v25  ;;  %v578_v20 = vand.u32 4294901760, %v577_v17  ;;  %v1935_v23 = vsub.f32 %v6572_v51, %v6186_v24  ;;  %v6187_v2 = vand.u32 4294901760, %v6575_v44  ;;  %v6577_v25 = vld [vmem:[#allocation136_spill] sm:$0xff] }
  0xc6   :  { %v4826_v63 = vpack.c.bf16 %v1930_v5, %v1918_v15  ;;  %v590_v42 = vand.u32 4294901760, %v589_v22  ;;  %v1924_v48 = vand.u32 4294901760, %v1923_v7  ;;  %v6188_v57 = vand.u32 4294901760, %v6576_v52  ;;  %3023 = vmatpush1.bf16.msra.mxu1 %v4540_v32  ;;  %3407 = vmatpush1.bf16.msra.mxu0 %v4559_v47  ;;  %v6579_v47 = vld [vmem:[#allocation139_spill] sm:$0xff]  ;;  %v6580_v5 = vld [vmem:[#allocation140_spill] sm:$0xff] }
  0xc7   :  { %v1936_v62 = vand.u32 4294901760, %v1935_v23  ;;  %v595_v17 = vsub.f32 %v6575_v44, %v6187_v2  ;;  %v6189_v27 = vand.u32 4294901760, %v6577_v25  ;;  %3025 = vmatprep.subr.bf16.mxu1 %v4609_v49  ;;  %3409 = vmatprep.subr.bf16.mxu0 %v4611_v39  ;;  %v6192_v23 = vand.u32 4294901760, %v6579_v47 }
  0xc8   :  { %v4838_v15 = vpack.c.bf16 %v590_v42, %v578_v20  ;;  %v607_v32 = vsub.f32 %v6576_v52, %v6188_v57  ;;  %v6195_v22 = vand.u32 4294901760, %v6580_v5  ;;  %v6581_v49 = vand.u32 4294901760, %v6578_v53 }
  0xc9   :  { %v4845_v7 = vpack.c.bf16 %v1936_v62, %v1924_v48  ;;  %v596_v2 = vand.u32 4294901760, %v595_v17  ;;  %v1941_v24 = vsub.f32 %v6577_v25, %v6189_v27  ;;  %v601_v42 = vsub.f32 %v6579_v47, %v6192_v23  ;;  %v6582_v48 = vld [vmem:[#allocation141_spill] sm:$0xff] }
  0xca   :  { %v1953_v39 = vsub.f32 %v6578_v53, %v6581_v49  ;;  %v608_v20 = vand.u32 4294901760, %v607_v32  ;;  %v613_v57 = vsub.f32 %v6580_v5, %v6195_v22  ;;  %v6199_v62 = vand.u32 4294901760, %v6582_v48  ;;  %3027 = vmatpush1.bf16.msra.mxu1 %v4675_v34  ;;  %3411 = vmatpush1.bf16.msra.mxu0 %v4705_v55  ;;  %v6584_v49 = vld [vmem:[#allocation145_spill] sm:$0xff] }
  0xcb   :  { %v1942_v17 = vand.u32 4294901760, %v1941_v24  ;;  %v6197_v58 = vand.u32 4294901760, %v6583_v46  ;;  %v6198_v32 = vand.u32 4294901760, %v6584_v49  ;;  %3029 = vmatprep.subr.bf16.mxu1 %v4730_v0  ;;  %3413 = vmatprep.subr.bf16.mxu0 %v4732_v33  ;;  %v602_v37 = vand.u32 4294901760, %v601_v42  ;;  %v6586_v33 = vld [vmem:[#allocation148_spill] sm:$0xff] }
  0xcc   :  { %v1954_v27 = vand.u32 4294901760, %v1953_v39  ;;  %v3040_v23 = vpack.c.bf16 %v608_v20, %v596_v2  ;;  %v614_v13 = vand.u32 4294901760, %v613_v57  ;;  %v1947_v22 = vsub.f32 %v6582_v48, %v6199_v62  ;;  %v6585_v39 = vld [vmem:[#allocation146_spill] sm:$0xff]  ;;  %v6587_v20 = vld [vmem:[#allocation149_spill] sm:$0xff] }
  0xcd   :  { %v1959_v24 = vsub.f32 %v6583_v46, %v6197_v58  ;;  %v619_v55 = vsub.f32 %v6584_v49, %v6198_v32  ;;  %v6200_v0 = vand.u32 4294901760, %v6585_v39  ;;  %v6204_v57 = vand.u32 4294901760, %v6586_v33  ;;  %v6588_v32 = vld [vmem:[#allocation151_spill] sm:$0xff] }
  0xce   :  { %v3424_v34 = vpack.c.bf16 %v1954_v27, %v1942_v17  ;;  %v4876_v3 = vpack.c.bf16 %v614_v13, %v602_v37  ;;  %v1948_v2 = vand.u32 4294901760, %v1947_v22  ;;  %v6205_v42 = vand.u32 4294901760, %v6587_v20  ;;  %3031 = vmatpush1.bf16.msra.mxu1 %v4737_v54  ;;  %3415 = vmatpush1.bf16.msra.mxu0 %v4751_v30  ;;  %v6589_v54 = vld [vmem:[#allocation152_spill] sm:$0xff]  ;;  %v6590_v22 = vld [vmem:[#allocation153_spill] sm:$0xff] }
  0xcf   :  { %v1960_v27 = vand.u32 4294901760, %v1959_v24  ;;  %v620_v17 = vand.u32 4294901760, %v619_v55  ;;  %v631_v58 = vsub.f32 %v6585_v39, %v6200_v0  ;;  %v6207_v62 = vand.u32 4294901760, %v6588_v32  ;;  %3033 = vmatprep.subr.bf16.mxu1 %v4773_v41  ;;  %3417 = vmatprep.subr.bf16.mxu0 %v4786_v19  ;;  %v6591_v39 = vld [vmem:[#allocation155_spill] sm:$0xff] }
  0xd0   :  { %v1965_v13 = vsub.f32 %v6586_v33, %v6204_v57  ;;  %v1977_v37 = vsub.f32 %v6587_v20, %v6205_v42  ;;  %v6206_v30 = vand.u32 4294901760, %v6589_v54  ;;  %v6209_v24 = vand.u32 4294901760, %v6590_v22 }
  0xd1   :  { %v3426_v55 = vpack.c.bf16 %v1960_v27, %v1948_v2  ;;  %v632_v0 = vand.u32 4294901760, %v631_v58  ;;  %v625_v41 = vsub.f32 %v6588_v32, %v6207_v62  ;;  %v6211_v19 = vand.u32 4294901760, %v6591_v39 }
  0xd2   :  { %v1966_v49 = vand.u32 4294901760, %v1965_v13  ;;  %v1978_v46 = vand.u32 4294901760, %v1977_v37  ;;  %v637_v57 = vsub.f32 %v6589_v54, %v6206_v30  ;;  %v1971_v42 = vsub.f32 %v6590_v22, %v6209_v24  ;;  %3035 = vmatpush1.bf16.msra.mxu1 %v4788_v36  ;;  %3419 = vmatpush1.bf16.msra.mxu0 %v4806_v6  ;;  %v6592_v13 = vld [vmem:[#allocation157_spill] sm:$0xff]  ;;  %v6593_v24 = vld [vmem:[#allocation158_spill] sm:$0xff] }
  0xd3   :  { %v3044_v58 = vpack.c.bf16 %v632_v0, %v620_v17  ;;  %v626_v2 = vand.u32 4294901760, %v625_v41  ;;  %v1983_v27 = vsub.f32 %v6591_v39, %v6211_v19  ;;  %v6213_v37 = vand.u32 4294901760, %v6592_v13  ;;  %3037 = vmatprep.subr.bf16.mxu1 %v4820_v18  ;;  %3421 = vmatprep.subr.bf16.mxu0 %v4826_v63  ;;  %v6594_v0 = vld [vmem:[#allocation160_spill] sm:$0xff]  ;;  %v6595_v41 = vld [vmem:[#allocation161_spill] sm:$0xff]  ;;  %v6596_v63 = vld [vmem:[#allocation163_spill] sm:$0xff] }
  0xd4   :  { %v3428_v30 = vpack.c.bf16 %v1978_v46, %v1966_v49  ;;  %v638_v62 = vand.u32 4294901760, %v637_v57  ;;  %v1972_v54 = vand.u32 4294901760, %v1971_v42  ;;  %v6214_v22 = vand.u32 4294901760, %v6593_v24  ;;  %v6597_v49 = vld [vmem:[#allocation164_spill] sm:$0xff] }
  0xd5   :  { %v1984_v36 = vand.u32 4294901760, %v1983_v27  ;;  %v643_v6 = vsub.f32 %v6592_v13, %v6213_v37  ;;  %v6215_v17 = vand.u32 4294901760, %v6594_v0  ;;  %v6219_v19 = vand.u32 4294901760, %v6595_v41 }
  0xd6   :  { %v3046_v39 = vpack.c.bf16 %v638_v62, %v626_v2  ;;  %v655_v18 = vsub.f32 %v6593_v24, %v6214_v22  ;;  %v6220_v46 = vand.u32 4294901760, %v6596_v63  ;;  %v6221_v57 = vand.u32 4294901760, %v6597_v49  ;;  %3039 = vmatpush1.bf16.msra.mxu1 %v4838_v15  ;;  %3423 = vmatpush1.bf16.msra.mxu0 %v4845_v7  ;;  %v6598_v7 = vld [vmem:[#allocation165_spill] sm:$0xff] }
  0xd7   :  { %v3430_v42 = vpack.c.bf16 %v1984_v36, %v1972_v54  ;;  %v644_v27 = vand.u32 4294901760, %v643_v6  ;;  %v1989_v37 = vsub.f32 %v6594_v0, %v6215_v17  ;;  %v2001_v62 = vsub.f32 %v6595_v41, %v6219_v19  ;;  %3041 = vmatprep.subr.bf16.mxu1 %v3040_v23  ;;  %3425 = vmatprep.subr.bf16.mxu0 %v3424_v34  ;;  %v6599_v17 = vld [vmem:[#allocation167_spill] sm:$0xff]  ;;  %v6600_v24 = vld [vmem:[#allocation169_spill] sm:$0xff] }
  0xd8   :  { %v656_v2 = vand.u32 4294901760, %v655_v18  ;;  %v649_v22 = vsub.f32 %v6596_v63, %v6220_v46  ;;  %v661_v15 = vsub.f32 %v6597_v49, %v6221_v57  ;;  %v6222_v54 = vand.u32 4294901760, %v6598_v7  ;;  %v6601_v57 = vld [vmem:[#allocation170_spill] sm:$0xff] }
  0xd9   :  { %v1990_v36 = vand.u32 4294901760, %v1989_v37  ;;  %v2002_v6 = vand.u32 4294901760, %v2001_v62  ;;  %v6224_v0 = vand.u32 4294901760, %v6599_v17  ;;  %v6226_v13 = vand.u32 4294901760, %v6600_v24 }
  0xda   :  { %v3048_v19 = vpack.c.bf16 %v656_v2, %v644_v27  ;;  %v650_v23 = vand.u32 4294901760, %v649_v22  ;;  %v662_v34 = vand.u32 4294901760, %v661_v15  ;;  %v1995_v18 = vsub.f32 %v6598_v7, %v6222_v54  ;;  %3043 = vmatpush1.bf16.msra.mxu1 %v4876_v3  ;;  %3427 = vmatpush1.bf16.msra.mxu0 %v3426_v55  ;;  %v6602_v15 = vld [vmem:[#allocation172_spill] sm:$0xff]  ;;  %v6603_v7 = vld [vmem:[#allocation173_spill] sm:$0xff] }
  0xdb   :  { %v3432_v46 = vpack.c.bf16 %v2002_v6, %v1990_v36  ;;  %v2007_v37 = vsub.f32 %v6599_v17, %v6224_v0  ;;  %v667_v62 = vsub.f32 %v6600_v24, %v6226_v13  ;;  %v6227_v27 = vand.u32 4294901760, %v6601_v57  ;;  %3045 = vmatprep.subr.bf16.mxu1 %v3044_v58  ;;  %3429 = vmatprep.subr.bf16.mxu0 %v3428_v30  ;;  %v6604_v0 = vld [vmem:[#allocation175_spill] sm:$0xff]  ;;  %v6605_v58 = vld [vmem:[#allocation176_spill] sm:$0xff] }
  0xdc   :  { %v3050_v22 = vpack.c.bf16 %v662_v34, %v650_v23  ;;  %v1996_v2 = vand.u32 4294901760, %v1995_v18  ;;  %v6229_v54 = vand.u32 4294901760, %v6602_v15  ;;  %v6231_v3 = vand.u32 4294901760, %v6603_v7  ;;  %v6606_v34 = vld [vmem:[#allocation177_spill] sm:$0xff] }
  0xdd   :  { %v2008_v55 = vand.u32 4294901760, %v2007_v37  ;;  %v668_v36 = vand.u32 4294901760, %v667_v62  ;;  %v679_v6 = vsub.f32 %v6601_v57, %v6227_v27  ;;  %v6234_v17 = vand.u32 4294901760, %v6604_v0 }
  0xde   :  { %v2013_v13 = vsub.f32 %v6602_v15, %v6229_v54  ;;  %v2025_v30 = vsub.f32 %v6603_v7, %v6231_v3  ;;  %v6232_v23 = vand.u32 4294901760, %v6605_v58  ;;  %v6233_v18 = vand.u32 4294901760, %v6606_v34  ;;  %3047 = vmatpush1.bf16.msra.mxu1 %v3046_v39  ;;  %3431 = vmatpush1.bf16.msra.mxu0 %v3430_v42  ;;  %v6684_v7 = vld [vmem:[#allocation71_spill] sm:$0xff] }
  0xdf   :  { %v3434_v37 = vpack.c.bf16 %v2008_v55, %v1996_v2  ;;  %v680_v62 = vand.u32 4294901760, %v679_v6  ;;  %v673_v27 = vsub.f32 %v6604_v0, %v6234_v17  ;;  %v6235_v57 = vand.u32 4294901760, %v4247_v16  ;;  %3049 = vmatprep.subr.bf16.mxu1 %v3048_v19  ;;  %3433 = vmatprep.subr.bf16.mxu0 %v3432_v46 }
  0xe0   :  { %v2014_v54 = vand.u32 4294901760, %v2013_v13  ;;  %v2026_v15 = vand.u32 4294901760, %v2025_v30  ;;  %v685_v3 = vsub.f32 %v6605_v58, %v6232_v23  ;;  %v2019_v39 = vsub.f32 %v6606_v34, %v6233_v18  ;;  %v6675_v34 = vld [vmem:[#allocation64_spill] sm:$0xff] }
  0xe1   :  { %v3052_v42 = vpack.c.bf16 %v680_v62, %v668_v36  ;;  %v674_v2 = vand.u32 4294901760, %v673_v27  ;;  %v2031_v55 = vsub.f32 %v4247_v16, %v6235_v57  ;;  %v6239_v6 = vand.u32 4294901760, %v4251_v1  ;;  %v6607_v36 = vld [vmem:[#allocation184_spill] sm:$0xff]  ;;  %v6608_v62 = vld [vmem:[#allocation185_spill] sm:$0xff] }
  0xe2   :  { %v3436_v19 = vpack.c.bf16 %v2026_v15, %v2014_v54  ;;  %v686_v46 = vand.u32 4294901760, %v685_v3  ;;  %v2020_v13 = vand.u32 4294901760, %v2019_v39  ;;  %v6237_v30 = vand.u32 4294901760, %v4253_v8  ;;  %3051 = vmatpush1.bf16.msra.mxu1 %v3050_v22  ;;  %3435 = vmatpush1.bf16.msra.mxu0 %v3434_v37  ;;  %v6609_v22 = vld [vmem:[#allocation188_spill] sm:$0xff] }
  0xe3   :  { %v2032_v23 = vand.u32 4294901760, %v2031_v55  ;;  %v691_v18 = vsub.f32 %v4251_v1, %v6239_v6  ;;  %v6236_v27 = vand.u32 4294901760, %v6607_v36  ;;  %v6238_v17 = vand.u32 4294901760, %v6608_v62  ;;  %3053 = vmatprep.subr.bf16.mxu1 %v3052_v42 }
  0xe4   :  { %3437 = vmatprep.subr.bf16.mxu0 %v3436_v19  ;;  %v3054_v57 = vpack.c.bf16 %v686_v46, %v674_v2  ;;  %v703_v54 = vsub.f32 %v4253_v8, %v6237_v30  ;;  %v6240_v15 = vand.u32 4294901760, %v4265_v43  ;;  %v6243_v3 = vand.u32 4294901760, %v6609_v22  ;;  %v6690_v8 = vld [vmem:[#allocation80_spill] sm:$0xff] }
  0xe5   :  { %v3438_v37 = vpack.c.bf16 %v2032_v23, %v2020_v13  ;;  %v692_v39 = vand.u32 4294901760, %v691_v18  ;;  %v2037_v55 = vsub.f32 %v6607_v36, %v6236_v27  ;;  %v2049_v42 = vsub.f32 %v6608_v62, %v6238_v17  ;;  %v6689_v36 = vld [vmem:[#allocation79_spill] sm:$0xff] }
  0xe6   :  { %v704_v19 = vand.u32 4294901760, %v703_v54  ;;  %v697_v2 = vsub.f32 %v4265_v43, %v6240_v15  ;;  %v709_v46 = vsub.f32 %v6609_v22, %v6243_v3  ;;  %v6247_v23 = vand.u32 4294901760, %v4271_v11  ;;  %3055 = vmatpush1.bf16.msra.mxu1 %v3054_v57 }
  0xe7   :  { %3439 = vmatpush1.bf16.msra.mxu0 %v3438_v37  ;;  %v2038_v18 = vand.u32 4294901760, %v2037_v55  ;;  %v2050_v13 = vand.u32 4294901760, %v2049_v42  ;;  %v6244_v27 = vand.u32 4294901760, %v4275_v60  ;;  %v6245_v30 = vand.u32 4294901760, %v4279_v4 }
  0xe8   :  { %v3056_v17 = vpack.c.bf16 %v704_v19, %v692_v39  ;;  %v698_v54 = vand.u32 4294901760, %v697_v2  ;;  %v710_v6 = vand.u32 4294901760, %v709_v46  ;;  %v2043_v15 = vsub.f32 %v4271_v11, %v6247_v23  ;;  %v6613_v23 = vld [vmem:[#allocation203_spill] sm:$0xff]  ;;  %v6617_v11 = vld [vmem:[#allocation17_spill] sm:$0xff] }
  0xe9   :  { %v3440_v43 = vpack.c.bf16 %v2050_v13, %v2038_v18  ;;  %v2055_v3 = vsub.f32 %v4275_v60, %v6244_v27  ;;  %v715_v57 = vsub.f32 %v4279_v4, %v6245_v30  ;;  %v6246_v37 = vand.u32 4294901760, %v4281_v10  ;;  %v6610_v13 = vld [vmem:[#allocation199_spill] sm:$0xff] }
  0xea   :  { %3057 = vmatprep.subr.bf16.mxu1 %v3056_v17  ;;  %v3058_v55 = vpack.c.bf16 %v710_v6, %v698_v54  ;;  %v2044_v39 = vand.u32 4294901760, %v2043_v15  ;;  %v6252_v42 = vand.u32 4294901760, %v4285_v56  ;;  %v6253_v19 = vand.u32 4294901760, %v4287_v50  ;;  %v6611_v15 = vld [vmem:[#allocation200_spill] sm:$0xff] }
  0xeb   :  { %3441 = vmatprep.subr.bf16.mxu0 %v3440_v43  ;;  %v2056_v2 = vand.u32 4294901760, %v2055_v3  ;;  %v716_v46 = vand.u32 4294901760, %v715_v57  ;;  %v727_v18 = vsub.f32 %v4281_v10, %v6246_v37  ;;  %v6256_v27 = vand.u32 4294901760, %v6610_v13  ;;  %v6612_v43 = vld [vmem:[#allocation201_spill] sm:$0xff] }
  0xec   :  { %3059 = vmatpush1.bf16.msra.mxu1 %v3058_v55  ;;  %v2061_v17 = vsub.f32 %v4285_v56, %v6252_v42  ;;  %v2073_v6 = vsub.f32 %v4287_v50, %v6253_v19  ;;  %v6262_v54 = vand.u32 4294901760, %v6611_v15  ;;  %v6266_v3 = vand.u32 4294901760, %v6612_v43  ;;  %v6615_v56 = vld [vmem:[#allocation14_spill] sm:$0xff] }
  0xed   :  { %v3442_v57 = vpack.c.bf16 %v2056_v2, %v2044_v39  ;;  %v728_v30 = vand.u32 4294901760, %v727_v18  ;;  %v721_v37 = vsub.f32 %v6610_v13, %v6256_v27  ;;  %v6267_v55 = vand.u32 4294901760, %v6613_v23 }
  0xee   :  { %v2062_v10 = vand.u32 4294901760, %v2061_v17  ;;  %v2074_v4 = vand.u32 4294901760, %v2073_v6  ;;  %v733_v42 = vsub.f32 %v6611_v15, %v6262_v54  ;;  %v2067_v19 = vsub.f32 %v6612_v43, %v6266_v3  ;;  %v6614_v6 = vld [vmem:[#allocation12_spill] sm:$0xff]  ;;  %v6646_v43 = vld [vmem:[#allocation55_spill] sm:$0xff] }
  0xef   :  { %3443 = vmatpush1.bf16.msra.mxu0 %v3442_v57  ;;  %v3060_v50 = vpack.c.bf16 %v728_v30, %v716_v46  ;;  %v722_v39 = vand.u32 4294901760, %v721_v37  ;;  %v2079_v2 = vsub.f32 %v6613_v23, %v6267_v55  ;;  %v3064_v60 = vpack.c.bf16 %v6615_v56, %v6614_v6  ;;  %v6616_v15 = vld [vmem:[#allocation16_spill] sm:$0xff]  ;;  %v6618_v30 = vld [vmem:[#allocation19_spill] sm:$0xff]  ;;  %v6645_v6 = vld [vmem:[#allocation53_spill] sm:$0xff] }
  0xf0   :  { %v3444_v18 = vpack.c.bf16 %v2074_v4, %v2062_v10  ;;  %v734_v27 = vand.u32 4294901760, %v733_v42  ;;  %v2068_v13 = vand.u32 4294901760, %v2067_v19  ;;  %v3448_v3 = vpack.c.bf16 %v6617_v11, %v6616_v15  ;;  %v6619_v37 = vld [vmem:[#allocation20_spill] sm:$0xff]  ;;  %v6620_v10 = vld [vmem:[#allocation21_spill] sm:$0xff]  ;;  %v6621_v4 = vld [vmem:[#allocation23_spill] sm:$0xff] }
  0xf1   :  { %3061 = vmatprep.subr.bf16.mxu1 %v3060_v50  ;;  %v2080_v17 = vand.u32 4294901760, %v2079_v2  ;;  %v3066_v46 = vpack.c.bf16 %v6619_v37, %v6618_v30  ;;  %v3450_v50 = vpack.c.bf16 %v6621_v4, %v6620_v10  ;;  %v6622_v42 = vld [vmem:[#allocation25_spill] sm:$0xff]  ;;  %v6623_v19 = vld [vmem:[#allocation26_spill] sm:$0xff]  ;;  %v6624_v55 = vmov 1.0   ;;  %v6631_v37 = vld [vmem:[#allocation35_spill] sm:$0xff] }
  0xf2   :  { %3445 = vmatprep.subr.bf16.mxu0 %v3444_v18  ;;  %v3062_v54 = vpack.c.bf16 %v734_v27, %v722_v39  ;;  %v3068_v2 = vpack.c.bf16 %v6623_v19, %v6622_v42  ;;  %v6626_v39 = vld [vmem:[#allocation28_spill] sm:$0xff]  ;;  %v6628_v18 = vld [vmem:[#allocation31_spill] sm:$0xff]  ;;  %v6632_v30 = vld [vmem:[#allocation37_spill] sm:$0xff]  ;;  %v3460_v23 = vpack.c.bf16 %v6645_v6, %v6644_v14 }
  0xf3   :  { %v3446_v57 = vpack.c.bf16 %v2080_v17, %v2068_v13  ;;  %v6627_v13 = vld [vmem:[#allocation29_spill] sm:$0xff]  ;;  %v6633_v11 = vld [vmem:[#allocation38_spill] sm:$0xff]  ;;  %v6654_v19 = vld [vmem:[#allocation143_spill] sm:$0xff] }
  0xf4   :  { %3063 = vmatpush1.bf16.msra.mxu1 %v3062_v54  ;;  %v3452_v54 = vpack.c.bf16 %v6627_v13, %v6626_v39  ;;  %v3072_v4 = vpack.c.bf16 %v6633_v11, %v6632_v30  ;;  %v6636_v13 = vld [vmem:[#allocation40_spill] sm:$0xff]  ;;  %v6637_v39 = vld [vmem:[#allocation41_spill] sm:$0xff]  ;;  %v6643_v11 = vld [vmem:[#allocation50_spill] sm:$0xff] }
  0xf5   :  { %3447 = vmatpush1.bf16.msra.mxu0 %v3446_v57  ;;  %3065 = vmatprep.subr.bf16.mxu1 %v3064_v60  ;;  %v6629_v60 = vld [vmem:[#allocation32_spill] sm:$0xff]  ;;  %v6630_v57 = vld [vmem:[#allocation33_spill] sm:$0xff]  ;;  %v3456_v10 = vpack.c.bf16 %v6637_v39, %v6636_v13  ;;  %v3076_v30 = vpack.c.bf16 %v6643_v11, %v6642_v38  ;;  %v6661_v42 = vld [vmem:[#allocation158_spill] sm:$0xff] }
  0xf6   :  { %3449 = vmatprep.subr.bf16.mxu0 %v3448_v3  ;;  %v3070_v17 = vpack.c.bf16 %v6629_v60, %v6628_v18  ;;  %v3454_v3 = vpack.c.bf16 %v6631_v37, %v6630_v57  ;;  %v6638_v60 = vld [vmem:[#allocation43_spill] sm:$0xff]  ;;  %v6639_v18 = vld [vmem:[#allocation44_spill] sm:$0xff]  ;;  %v6640_v37 = vld [vmem:[#allocation45_spill] sm:$0xff] }
  0xf7   :  { %2913 = vmatmul.mubr.msk.f32.vlgmr.msra.gmra.mrb[0].mxu1 %vm39_vm0, %v6624_v55  ;;  %v3074_v15 = vpack.c.bf16 %v6639_v18, %v6638_v60  ;;  %v6641_v57 = vld [vmem:[#allocation47_spill] sm:$0xff]  ;;  %v6647_v39 = vld [vmem:[#allocation56_spill] sm:$0xff]  ;;  %v6648_v18 = vld [vmem:[#allocation57_spill] sm:$0xff] }
  0xf8   :  { %2925 = vmatmul.mubr.msk.f32.vlgmr.msra.gmra.mrb[0].mxu0 %vm41_vm2, %v6624_v55  ;;  %2914 = vmatprep.mubr.msk.f32.mxu1 %vm44_vm5, %v6624_v55  ;;  %v3458_v56 = vpack.c.bf16 %v6641_v57, %v6640_v37  ;;  %v3078_v13 = vpack.c.bf16 %v6647_v39, %v6646_v43  ;;  %v6649_v60 = vld [vmem:[#allocation59_spill] sm:$0xff]  ;;  %v6651_v37 = vld [vmem:[#allocation62_spill] sm:$0xff]  ;;  %v6655_v27 = vld [vmem:[#allocation145_spill] sm:$0xff] }
  0xf9   :  { %3067 = vmatpush1.bf16.msra.mxu1 %v3066_v46  ;;  %2926 = vmatprep.mubr.msk.f32.mxu0 %vm46_vm7, %v6624_v55  ;;  %v3462_v57 = vpack.c.bf16 %v6649_v60, %v6648_v18  ;;  %v6650_v46 = vld [vmem:[#allocation61_spill] sm:$0xff]  ;;  %v6662_v11 = vld [vmem:[#allocation160_spill] sm:$0xff]  ;;  %v6665_v39 = vld [vmem:[#allocation170_spill] sm:$0xff] }
  0xfa   :  { %3451 = vmatpush1.bf16.msra.mxu0 %v3450_v50  ;;  %3069 = vmatprep.subr.bf16.mxu1 %v3068_v2  ;;  %v3080_v22 = vpack.c.bf16 %v6651_v37, %v6650_v46  ;;  %v6653_v50 = vld [vmem:[#allocation206_spill] sm:$0xff]  ;;  %v6658_v18 = vld [vmem:[#allocation153_spill] sm:$0xff]  ;;  %v6659_v2 = vld [vmem:[#allocation155_spill] sm:$0xff] }
  0xfb   :  { %2915 = vmatmul.mubr.msk.f32.gmra.mrb[2].mxu1 %vm43_vm4, %v6624_v55  ;;  %3453 = vmatprep.subr.bf16.mxu0 %v3452_v54  ;;  %v6656_v46 = vld [vmem:[#allocation146_spill] sm:$0xff]  ;;  %v6660_v6 = vld [vmem:[#allocation157_spill] sm:$0xff]  ;;  %v6664_v37 = vld [vmem:[#allocation167_spill] sm:$0xff] }
  0xfc   :  { %2927 = vmatmul.mubr.msk.f32.gmra.mrb[2].mxu0 %vm45_vm6, %v6624_v55  ;;  %947 = vmatprep.mubr.f32.mxu1 %v6652_v59  ;;  %v6663_v54 = vld [vmem:[#allocation165_spill] sm:$0xff]  ;;  %v6680_v59 = vld [vmem:[#allocation203_spill] sm:$0xff]  ;;  %v6682_v38 = vld [vmem:[#allocation68_spill] sm:$0xff] }
  0xfd   :  { %3071 = vmatpush1.bf16.msra.mxu1 %v3070_v17  ;;  %2293 = vmatprep.mubr.f32.mxu0 %v6653_v50  ;;  %v6657_v17 = vld [vmem:[#allocation152_spill] sm:$0xff]  ;;  %v6669_v55 = vld [vmem:[#allocation189_spill] sm:$0xff] }
  0xfe   :  { %3455 = vmatpush1.bf16.msra.mxu0 %v3454_v3  ;;  %3073 = vmatprep.subr.bf16.mxu1 %v3072_v4  ;;  %v6668_v50 = vld [vmem:[#allocation188_spill] sm:$0xff]  ;;  %v6676_v3 = vld [vmem:[#allocation65_spill] sm:$0xff] }
  0xff   :  { %3457 = vmatprep.subr.bf16.mxu0 %v3456_v10  ;;  %v6670_v10 = vld [vmem:[#allocation191_spill] sm:$0xff]  ;;  %v3464_v1 = vpack.c.bf16 %v6676_v3, %v6675_v34  ;;  %v6678_v4 = vld [vmem:[#allocation200_spill] sm:$0xff]  ;;  %v6685_v14 = vld [vmem:[#allocation73_spill] sm:$0xff] }
 0x100   :  { %v6687_v3 = vld [vmem:[#allocation76_spill] sm:$0xff]  ;;  %v6688_v34 = vld [vmem:[#allocation77_spill] sm:$0xff] }
 0x101   :  { %3075 = vmatpush1.bf16.msra.mxu1 %v3074_v15  ;;  %v6683_v15 = vld [vmem:[#allocation69_spill] sm:$0xff]  ;;  %v3468_v58 = vpack.c.bf16 %v6688_v34, %v6687_v3 }
 0x102   :  { %3459 = vmatpush1.bf16.msra.mxu0 %v3458_v56  ;;  %3077 = vmatprep.subr.bf16.mxu1 %v3076_v30  ;;  %v6681_v30 = vld [vmem:[#allocation67_spill] sm:$0xff]  ;;  %v3466_v43 = vpack.c.bf16 %v6684_v7, %v6683_v15  ;;  %v3086_v56 = vpack.c.bf16 %v6690_v8, %v6689_v36  ;;  %v6695_v7 = vld [vmem:[#allocation88_spill] sm:$0xff]  ;;  %v6696_v15 = vld [vmem:[#allocation89_spill] sm:$0xff] }
 0x103   :  { %3461 = vmatprep.subr.bf16.mxu0 %v3460_v23  ;;  %v3082_v60 = vpack.c.bf16 %v6682_v38, %v6681_v30  ;;  %v6686_v23 = vld [vmem:[#allocation74_spill] sm:$0xff]  ;;  %v6692_v38 = vld [vmem:[#allocation83_spill] sm:$0xff] }
 0x104   :  { %v3084_v0 = vpack.c.bf16 %v6686_v23, %v6685_v14  ;;  %v6694_v30 = vld [vmem:[#allocation86_spill] sm:$0xff]  ;;  %v3472_v23 = vpack.c.bf16 %v6696_v15, %v6695_v7  ;;  %v6698_v14 = vld [vmem:[#allocation92_spill] sm:$0xff]  ;;  %v6700_v8 = vld [vmem:[#allocation95_spill] sm:$0xff] }
 0x105   :  { %3079 = vmatpush1.bf16.msra.mxu1 %v3078_v13  ;;  %v6691_v13 = vld [vmem:[#allocation81_spill] sm:$0xff]  ;;  %v6702_v36 = vld [vmem:[#allocation98_spill] sm:$0xff] }
 0x106   :  { %3463 = vmatpush1.bf16.msra.mxu0 %v3462_v57  ;;  %3081 = vmatprep.subr.bf16.mxu1 %v3080_v22  ;;  %v3470_v57 = vpack.c.bf16 %v6692_v38, %v6691_v13  ;;  %v6693_v22 = vld [vmem:[#allocation85_spill] sm:$0xff]  ;;  %v6703_v38 = vld [vmem:[#allocation100_spill] sm:$0xff] }
 0x107   :  { %3465 = vmatprep.subr.bf16.mxu0 %v3464_v1  ;;  %v3088_v62 = vpack.c.bf16 %v6694_v30, %v6693_v22  ;;  %v6697_v1 = vld [vmem:[#allocation91_spill] sm:$0xff]  ;;  %v6704_v13 = vld [vmem:[#allocation101_spill] sm:$0xff]  ;;  %v6706_v22 = vld [vmem:[#allocation104_spill] sm:$0xff] }
 0x108   :  { %v3090_v34 = vpack.c.bf16 %v6698_v14, %v6697_v1  ;;  %v3476_v30 = vpack.c.bf16 %v6704_v13, %v6703_v38  ;;  %v6708_v14 = vld [vmem:[#allocation107_spill] sm:$0xff]  ;;  %v6710_v1 = vld [vmem:[#allocation110_spill] sm:$0xff] }
 0x109   :  { %3083 = vmatpush1.bf16.msra.mxu1 %v3082_v60  ;;  %v6699_v60 = vld [vmem:[#allocation93_spill] sm:$0xff] }
 0x10a   :  { %3467 = vmatpush1.bf16.msra.mxu0 %v3466_v43  ;;  %3085 = vmatprep.subr.bf16.mxu1 %v3084_v0  ;;  %v3474_v43 = vpack.c.bf16 %v6700_v8, %v6699_v60  ;;  %v6701_v0 = vld [vmem:[#allocation97_spill] sm:$0xff]  ;;  %v6711_v8 = vld [vmem:[#allocation112_spill] sm:$0xff] }
 0x10b   :  { %3469 = vmatprep.subr.bf16.mxu0 %v3468_v58  ;;  %v3092_v3 = vpack.c.bf16 %v6702_v36, %v6701_v0  ;;  %v6705_v58 = vld [vmem:[#allocation103_spill] sm:$0xff]  ;;  %v6712_v60 = vld [vmem:[#allocation113_spill] sm:$0xff] }
 0x10c   :  { %v3094_v15 = vpack.c.bf16 %v6706_v22, %v6705_v58  ;;  %v3480_v36 = vpack.c.bf16 %v6712_v60, %v6711_v8 }
 0x10d   :  { %3087 = vmatpush1.bf16.msra.mxu1 %v3086_v56  ;;  %v6707_v56 = vld [vmem:[#allocation105_spill] sm:$0xff] }
 0x10e   :  { %3471 = vmatpush1.bf16.msra.mxu0 %v3470_v57  ;;  %3089 = vmatprep.subr.bf16.mxu1 %v3088_v62  ;;  %v3478_v57 = vpack.c.bf16 %v6708_v14, %v6707_v56  ;;  %v6709_v62 = vld [vmem:[#allocation109_spill] sm:$0xff] }
 0x10f   :  { %3473 = vmatprep.subr.bf16.mxu0 %v3472_v23  ;;  %v3096_v7 = vpack.c.bf16 %v6710_v1, %v6709_v62  ;;  %v6715_v23 = vpack.c.bf16 %v6566_v9, %v6565_v21 }
 0x111   :  { %3091 = vmatpush1.bf16.msra.mxu1 %v3090_v34  ;;  %v6713_v34 = vpack.c.bf16 %v6562_v31, %v6561_v28 }
 0x112   :  { %3475 = vmatpush1.bf16.msra.mxu0 %v3474_v43  ;;  %3093 = vmatprep.subr.bf16.mxu1 %v3092_v3  ;;  %v6714_v3 = vpack.c.bf16 %v6564_v26, %v6563_v35  ;;  %v6720_v43 = vpack.c.bf16 %v6578_v53, %v6577_v25 }
 0x113   :  { %3477 = vmatprep.subr.bf16.mxu0 %v3476_v30  ;;  %v6716_v30 = vpack.c.bf16 %v6568_v45, %v6567_v12 }
 0x115   :  { %3095 = vmatpush1.bf16.msra.mxu1 %v3094_v15  ;;  %v6719_v15 = vpack.c.bf16 %v6576_v52, %v6575_v44 }
 0x116   :  { %3479 = vmatpush1.bf16.msra.mxu0 %v3478_v57  ;;  %3097 = vmatprep.subr.bf16.mxu1 %v3096_v7  ;;  %v6717_v7 = vpack.c.bf16 %v6570_v29, %v6569_v40  ;;  %v6721_v57 = vpack.c.bf16 %v6580_v5, %v6579_v47 }
 0x117   :  { %3481 = vmatprep.subr.bf16.mxu0 %v3480_v36  ;;  %v6718_v36 = vpack.c.bf16 %v6572_v51, %v6571_v61 }
 0x119   :  { %3099 = vmatpush1.bf16.msra.mxu1 %v6713_v34  ;;  %v6722_v34 = vpack.c.bf16 %v6654_v19, %v6582_v48 }
 0x11a   :  { %3483 = vmatpush1.bf16.msra.mxu0 %v6714_v3  ;;  %3101 = vmatprep.subr.bf16.mxu1 %v6715_v23  ;;  %v6723_v3 = vpack.c.bf16 %v6656_v46, %v6655_v27  ;;  %v6724_v23 = vpack.c.bf16 %v6587_v20, %v6586_v33 }
 0x11b   :  { %3485 = vmatprep.subr.bf16.mxu0 %v6716_v30  ;;  %v6725_v30 = vpack.c.bf16 %v6657_v17, %v6588_v32 }
 0x11d   :  { %3103 = vmatpush1.bf16.msra.mxu1 %v6717_v7  ;;  %v6726_v7 = vpack.c.bf16 %v6659_v2, %v6658_v18 }
 0x11e   :  { %3487 = vmatpush1.bf16.msra.mxu0 %v6718_v36  ;;  %3105 = vmatprep.subr.bf16.mxu1 %v6719_v15  ;;  %v6727_v36 = vpack.c.bf16 %v6661_v42, %v6660_v6  ;;  %v6728_v15 = vpack.c.bf16 %v6595_v41, %v6662_v11 }
 0x11f   :  { %3489 = vmatprep.subr.bf16.mxu0 %v6720_v43  ;;  %v6729_v43 = vpack.c.bf16 %v6597_v49, %v6596_v63  ;;  %v6741_v63 = vld [vmem:[#allocation181_spill] sm:$0xff] }
 0x121   :  { %3107 = vmatpush1.bf16.msra.mxu1 %v6721_v57  ;;  %v6730_v57 = vpack.c.bf16 %v6664_v37, %v6663_v54  ;;  %v6744_v54 = vld [vmem:[#allocation184_spill] sm:$0xff] }
 0x122   :  { %3491 = vmatpush1.bf16.msra.mxu0 %v6722_v34  ;;  %3109 = vmatprep.subr.bf16.mxu1 %v6723_v3  ;;  %v6731_v34 = vpack.c.bf16 %v6665_v39, %v6600_v24  ;;  %v6732_v3 = vld [vmem:[#allocation173_spill] sm:$0xff]  ;;  %v6839_v24 = vld [vmem:[#allocation198_spill] sm:$0xff] }
 0x123   :  { %3493 = vmatprep.subr.bf16.mxu0 %v6724_v23  ;;  %v6733_v23 = vld [vmem:[#allocation172_spill] sm:$0xff] }
 0x125   :  { %3111 = vmatpush1.bf16.msra.mxu1 %v6725_v30  ;;  %v6734_v30 = vpack.c.bf16 %v6732_v3, %v6733_v23 }
 0x126   :  { %3495 = vmatpush1.bf16.msra.mxu0 %v6726_v7  ;;  %3113 = vmatprep.subr.bf16.mxu1 %v6727_v36  ;;  %v6735_v7 = vld [vmem:[#allocation176_spill] sm:$0xff]  ;;  %v6736_v36 = vld [vmem:[#allocation175_spill] sm:$0xff] }
 0x127   :  { %3497 = vmatprep.subr.bf16.mxu0 %v6728_v15  ;;  %v6737_v41 = vpack.c.bf16 %v6735_v7, %v6736_v36  ;;  %v6738_v15 = vld [vmem:[#allocation177_spill] sm:$0xff] }
 0x128   :  { %v6739_v49 = vpack.c.bf16 %v4247_v16, %v6738_v15  ;;  %v6750_v7 = vld [vmem:[#allocation193_spill] sm:$0xff]  ;;  %v6753_v15 = vld [vmem:[#allocation196_spill] sm:$0xff] }
 0x129   :  { %3115 = vmatpush1.bf16.msra.mxu1 %v6729_v43  ;;  %v6740_v43 = vld [vmem:[#allocation182_spill] sm:$0xff] }
 0x12a   :  { %3499 = vmatpush1.bf16.msra.mxu0 %v6730_v57  ;;  %3117 = vmatprep.subr.bf16.mxu1 %v6731_v34  ;;  %v6742_v37 = vpack.c.bf16 %v6740_v43, %v6741_v63  ;;  %v6743_v57 = vld [vmem:[#allocation185_spill] sm:$0xff]  ;;  %v6746_v34 = vld [vmem:[#allocation187_spill] sm:$0xff] }
 0x12b   :  { %3501 = vmatprep.subr.bf16.mxu0 %v6734_v30  ;;  %v6745_v39 = vpack.c.bf16 %v6743_v57, %v6744_v54  ;;  %v6747_v3 = vpack.c.bf16 %v6668_v50, %v6746_v34  ;;  %v6748_v30 = vpack.c.bf16 %v6670_v10, %v6669_v55  ;;  %v6760_v10 = vld [vmem:[#allocation15_spill] sm:$0xff]  ;;  %v6777_v55 = vld [vmem:[#allocation36_spill] sm:$0xff]  ;;  %v6780_v34 = vld [vmem:[#allocation46_spill] sm:$0xff] }
 0x12c   :  { %v6782_v54 = vld [vmem:[#allocation51_spill] sm:$0xff] }
 0x12d   :  { %3119 = vmatpush1.bf16.msra.mxu1 %v6737_v41  ;;  %v6749_v41 = vld [vmem:[#allocation194_spill] sm:$0xff] }
 0x12e   :  { %3503 = vmatpush1.bf16.msra.mxu0 %v6739_v49  ;;  %3121 = vmatprep.subr.bf16.mxu1 %v6742_v37  ;;  %v6751_v16 = vpack.c.bf16 %v6749_v41, %v6750_v7  ;;  %v6752_v49 = vld [vmem:[#allocation197_spill] sm:$0xff]  ;;  %v6755_v37 = vld [vmem:[#allocation199_spill] sm:$0xff]  ;;  %v6762_v41 = vld [vmem:[#allocation208_spill] sm:$0xff] }
 0x12f   :  { %3505 = vmatprep.subr.bf16.mxu0 %v6745_v39  ;;  %v6754_v43 = vpack.c.bf16 %v6752_v49, %v6753_v15  ;;  %v6756_v57 = vpack.c.bf16 %v6678_v4, %v6755_v37  ;;  %v6757_v39 = vld [vmem:[#allocation201_spill] sm:$0xff]  ;;  %v6764_v49 = vld [vmem:[#allocation18_spill] sm:$0xff] }
 0x130   :  { %v6758_v50 = vpack.c.bf16 %v6680_v59, %v6757_v39  ;;  %v6766_v4 = vld [vmem:[#allocation22_spill] sm:$0xff]  ;;  %v6768_v59 = vld [vmem:[#allocation211_spill] sm:$0xff] }
 0x131   :  { %3123 = vmatpush1.bf16.msra.mxu1 %v6747_v3  ;;  %v6759_v3 = vld [vmem:[#allocation13_spill] sm:$0xff]  ;;  %v6773_v37 = vld [vmem:[#allocation30_spill] sm:$0xff] }
 0x132   :  { %3507 = vmatpush1.bf16.msra.mxu0 %v6748_v30  ;;  %3125 = vmatprep.subr.bf16.mxu1 %v6751_v16  ;;  %v6761_v30 = vld [vmem:[#allocation207_spill] sm:$0xff]  ;;  %v6763_v16 = vld [vmem:[#allocation210_spill] sm:$0xff] }
 0x133   :  { %3509 = vmatprep.subr.bf16.mxu0 %v6754_v43  ;;  %v6765_v43 = vld [vmem:[#allocation212_spill] sm:$0xff]  ;;  %v6774_v15 = vld [vmem:[#allocation206_spill] sm:$0xff] }
 0x134   :  { %v6775_v7 = vand.u32 4294901760, %v6774_v15  ;;  %v6785_v15 = vld [vmem:[#allocation60_spill] sm:$0xff] }
 0x135   :  { %3127 = vmatpush1.bf16.msra.mxu1 %v6756_v57  ;;  %v6767_v57 = vld [vmem:[#allocation24_spill] sm:$0xff] }
 0x136   :  { %3511 = vmatpush1.bf16.msra.mxu0 %v6758_v50  ;;  %3129 = vmatprep.subr.bf16.mxu1 %v6759_v3  ;;  %v6769_v50 = vld [vmem:[#allocation27_spill] sm:$0xff]  ;;  %v6770_v3 = vld [vmem:[#allocation213_spill] sm:$0xff] }
 0x137   :  { %3513 = vmatprep.subr.bf16.mxu0 %v6760_v10  ;;  %v6771_v10 = vld [vmem:[#allocation205_spill] sm:$0xff] }
 0x138   :  { %950 = vmatmul.mubr.f32.vlgmr.msra.gmra.mrb[0].mxu1 %v6761_v30  ;;  %v6772_v39 = vand.u32 4294901760, %v6771_v10  ;;  %v6783_v10 = vld [vmem:[#allocation54_spill] sm:$0xff] }
 0x139   :  { %2296 = vmatmul.mubr.f32.vlgmr.msra.gmra.mrb[0].mxu0 %v6762_v41  ;;  %957 = vmatprep.mubr.f32.mxu1 %v6763_v16 }
 0x13a   :  { %3131 = vmatpush1.bf16.msra.mxu1 %v6764_v49  ;;  %2303 = vmatprep.mubr.f32.mxu0 %v6765_v43  ;;  %v6776_v49 = vld [vmem:[#allocation34_spill] sm:$0xff] }
 0x13b   :  { %3515 = vmatpush1.bf16.msra.mxu0 %v6766_v4  ;;  %3133 = vmatprep.subr.bf16.mxu1 %v6767_v57  ;;  %v6778_v4 = vld [vmem:[#allocation39_spill] sm:$0xff]  ;;  %v6779_v57 = vld [vmem:[#allocation42_spill] sm:$0xff] }
 0x13c   :  { %960 = vmatmul.mubr.f32.gmra.mrb[2].mxu1 %v6768_v59  ;;  %3517 = vmatprep.subr.bf16.mxu0 %v6769_v50  ;;  %v6781_v50 = vld [vmem:[#allocation48_spill] sm:$0xff] }
 0x13d   :  { %2306 = vmatmul.mubr.f32.gmra.mrb[2].mxu0 %v6770_v3  ;;  %1097 = vmatprep.mubr.f32.mxu1 %v6772_v39  ;;  %v6784_v39 = vld [vmem:[#allocation58_spill] sm:$0xff] }
 0x13e   :  { %3135 = vmatpush1.bf16.msra.mxu1 %v6773_v37  ;;  %2443 = vmatprep.mubr.f32.mxu0 %v6775_v7  ;;  %v6786_v7 = vld [vmem:[#allocation63_spill] sm:$0xff]  ;;  %v6832_v37 = vld [vmem:[#allocation14_spill] sm:$0xff] }
 0x13f   :  { %3519 = vmatpush1.bf16.msra.mxu0 %v6776_v49  ;;  %3137 = vmatprep.subr.bf16.mxu1 %v6777_v55  ;;  %v6787_v49 = vld [vmem:[#allocation66_spill] sm:$0xff] }
 0x140   :  { %3521 = vmatprep.subr.bf16.mxu0 %v6778_v4  ;;  %v6788_v55 = vld [vmem:[#allocation70_spill] sm:$0xff]  ;;  %v6789_v4 = vld [vmem:[#allocation72_spill] sm:$0xff] }
 0x142   :  { %3139 = vmatpush1.bf16.msra.mxu1 %v6779_v57  ;;  %v6790_v57 = vld [vmem:[#allocation75_spill] sm:$0xff] }
 0x143   :  { %3523 = vmatpush1.bf16.msra.mxu0 %v6780_v34  ;;  %3141 = vmatprep.subr.bf16.mxu1 %v6781_v50  ;;  %v6791_v34 = vld [vmem:[#allocation78_spill] sm:$0xff] }
 0x144   :  { %3525 = vmatprep.subr.bf16.mxu0 %v6782_v54  ;;  %v6792_v50 = vld [vmem:[#allocation82_spill] sm:$0xff]  ;;  %v6793_v54 = vld [vmem:[#allocation84_spill] sm:$0xff] }
 0x146   :  { %3143 = vmatpush1.bf16.msra.mxu1 %v6783_v10  ;;  %v6794_v10 = vld [vmem:[#allocation87_spill] sm:$0xff] }
 0x147   :  { %3527 = vmatpush1.bf16.msra.mxu0 %v6784_v39  ;;  %3145 = vmatprep.subr.bf16.mxu1 %v6785_v15  ;;  %v6795_v39 = vld [vmem:[#allocation90_spill] sm:$0xff] }
 0x148   :  { %3529 = vmatprep.subr.bf16.mxu0 %v6786_v7  ;;  %v6796_v15 = vld [vmem:[#allocation94_spill] sm:$0xff]  ;;  %v6797_v7 = vld [vmem:[#allocation96_spill] sm:$0xff] }
 0x14a   :  { %3147 = vmatpush1.bf16.msra.mxu1 %v6787_v49  ;;  %v6798_v49 = vld [vmem:[#allocation99_spill] sm:$0xff] }
 0x14b   :  { %3531 = vmatpush1.bf16.msra.mxu0 %v6788_v55  ;;  %3149 = vmatprep.subr.bf16.mxu1 %v6789_v4  ;;  %v6799_v55 = vld [vmem:[#allocation102_spill] sm:$0xff] }
 0x14c   :  { %3533 = vmatprep.subr.bf16.mxu0 %v6790_v57  ;;  %v6800_v4 = vld [vmem:[#allocation106_spill] sm:$0xff]  ;;  %v6801_v57 = vld [vmem:[#allocation108_spill] sm:$0xff] }
 0x14e   :  { %3151 = vmatpush1.bf16.msra.mxu1 %v6791_v34  ;;  %v6802_v34 = vld [vmem:[#allocation111_spill] sm:$0xff] }
 0x14f   :  { %3535 = vmatpush1.bf16.msra.mxu0 %v6792_v50  ;;  %3153 = vmatprep.subr.bf16.mxu1 %v6793_v54  ;;  %v6803_v50 = vld [vmem:[#allocation114_spill] sm:$0xff] }
 0x150   :  { %3537 = vmatprep.subr.bf16.mxu0 %v6794_v10  ;;  %v6804_v54 = vld [vmem:[#allocation118_spill] sm:$0xff]  ;;  %v6805_v10 = vld [vmem:[#allocation120_spill] sm:$0xff] }
 0x152   :  { %3155 = vmatpush1.bf16.msra.mxu1 %v6795_v39  ;;  %v6806_v39 = vld [vmem:[#allocation123_spill] sm:$0xff] }
 0x153   :  { %3539 = vmatpush1.bf16.msra.mxu0 %v6796_v15  ;;  %3157 = vmatprep.subr.bf16.mxu1 %v6797_v7  ;;  %v6807_v15 = vld [vmem:[#allocation126_spill] sm:$0xff] }
 0x154   :  { %3541 = vmatprep.subr.bf16.mxu0 %v6798_v49  ;;  %v6808_v7 = vld [vmem:[#allocation130_spill] sm:$0xff]  ;;  %v6809_v49 = vld [vmem:[#allocation132_spill] sm:$0xff] }
 0x156   :  { %3159 = vmatpush1.bf16.msra.mxu1 %v6799_v55  ;;  %v6810_v55 = vld [vmem:[#allocation135_spill] sm:$0xff] }
 0x157   :  { %3543 = vmatpush1.bf16.msra.mxu0 %v6800_v4  ;;  %3161 = vmatprep.subr.bf16.mxu1 %v6801_v57  ;;  %v6811_v4 = vld [vmem:[#allocation138_spill] sm:$0xff] }
 0x158   :  { %3545 = vmatprep.subr.bf16.mxu0 %v6802_v34  ;;  %v6812_v57 = vld [vmem:[#allocation142_spill] sm:$0xff]  ;;  %v6813_v34 = vld [vmem:[#allocation144_spill] sm:$0xff] }
 0x15a   :  { %3163 = vmatpush1.bf16.msra.mxu1 %v6803_v50  ;;  %v6814_v50 = vld [vmem:[#allocation147_spill] sm:$0xff] }
 0x15b   :  { %3547 = vmatpush1.bf16.msra.mxu0 %v6804_v54  ;;  %3165 = vmatprep.subr.bf16.mxu1 %v6805_v10  ;;  %v6815_v54 = vld [vmem:[#allocation150_spill] sm:$0xff] }
 0x15c   :  { %3549 = vmatprep.subr.bf16.mxu0 %v6806_v39  ;;  %v6816_v10 = vld [vmem:[#allocation154_spill] sm:$0xff]  ;;  %v6817_v39 = vld [vmem:[#allocation156_spill] sm:$0xff] }
 0x15e   :  { %3167 = vmatpush1.bf16.msra.mxu1 %v6807_v15  ;;  %v6818_v15 = vld [vmem:[#allocation159_spill] sm:$0xff] }
 0x15f   :  { %3551 = vmatpush1.bf16.msra.mxu0 %v6808_v7  ;;  %3169 = vmatprep.subr.bf16.mxu1 %v6809_v49  ;;  %v6819_v7 = vld [vmem:[#allocation162_spill] sm:$0xff] }
 0x160   :  { %3553 = vmatprep.subr.bf16.mxu0 %v6810_v55  ;;  %v6820_v49 = vld [vmem:[#allocation166_spill] sm:$0xff]  ;;  %v6821_v55 = vld [vmem:[#allocation168_spill] sm:$0xff] }
 0x162   :  { %3171 = vmatpush1.bf16.msra.mxu1 %v6811_v4  ;;  %v6822_v4 = vld [vmem:[#allocation171_spill] sm:$0xff] }
 0x163   :  { %3555 = vmatpush1.bf16.msra.mxu0 %v6812_v57  ;;  %3173 = vmatprep.subr.bf16.mxu1 %v6813_v34  ;;  %v6823_v57 = vld [vmem:[#allocation174_spill] sm:$0xff] }
 0x164   :  { %3557 = vmatprep.subr.bf16.mxu0 %v6814_v50  ;;  %v6824_v34 = vld [vmem:[#allocation178_spill] sm:$0xff]  ;;  %v6825_v50 = vld [vmem:[#allocation180_spill] sm:$0xff] }
 0x166   :  { %3175 = vmatpush1.bf16.msra.mxu1 %v6815_v54  ;;  %v6826_v54 = vld [vmem:[#allocation183_spill] sm:$0xff] }
 0x167   :  { %3559 = vmatpush1.bf16.msra.mxu0 %v6816_v10  ;;  %3177 = vmatprep.subr.bf16.mxu1 %v6817_v39  ;;  %v6827_v10 = vld [vmem:[#allocation186_spill] sm:$0xff] }
 0x168   :  { %3561 = vmatprep.subr.bf16.mxu0 %v6818_v15  ;;  %v6828_v39 = vld [vmem:[#allocation190_spill] sm:$0xff]  ;;  %v6829_v15 = vld [vmem:[#allocation192_spill] sm:$0xff] }
 0x16a   :  { %3179 = vmatpush1.bf16.msra.mxu1 %v6819_v7  ;;  %v6830_v7 = vld [vmem:[#allocation12_spill] sm:$0xff] }
 0x16b   :  { %3563 = vmatpush1.bf16.msra.mxu0 %v6820_v49  ;;  %3181 = vmatprep.subr.bf16.mxu1 %v6821_v55  ;;  %v6831_v49 = vand.u32 4294901760, %v6830_v7  ;;  %v6833_v55 = vand.u32 4294901760, %v6832_v37  ;;  %v6845_v37 = vld [vmem:[#allocation21_spill] sm:$0xff] }
 0x16c   :  { %3565 = vmatprep.subr.bf16.mxu0 %v6822_v4  ;;  %v6834_v4 = vld [vmem:[#allocation195_spill] sm:$0xff] }
 0x16d   :  { %v3192_v63 = vpack.c.bf16 %v6833_v55, %v6831_v49  ;;  %v6846_v55 = vand.u32 4294901760, %v6845_v37  ;;  %v6847_v49 = vld [vmem:[#allocation23_spill] sm:$0xff]  ;;  %v6863_v37 = vld [vmem:[#allocation32_spill] sm:$0xff] }
 0x16e   :  { %3183 = vmatpush1.bf16.msra.mxu1 %v6823_v57  ;;  %v6835_v57 = vld [vmem:[#allocation16_spill] sm:$0xff] }
 0x16f   :  { %3567 = vmatpush1.bf16.msra.mxu0 %v6824_v34  ;;  %3185 = vmatprep.subr.bf16.mxu1 %v6825_v50  ;;  %v6836_v36 = vand.u32 4294901760, %v6835_v57  ;;  %v6837_v34 = vld [vmem:[#allocation17_spill] sm:$0xff] }
 0x170   :  { %3569 = vmatprep.subr.bf16.mxu0 %v6826_v54  ;;  %v6838_v23 = vand.u32 4294901760, %v6837_v34  ;;  %v6840_v54 = vld [vmem:[#allocation202_spill] sm:$0xff]  ;;  %v6849_v57 = vld [vmem:[#allocation25_spill] sm:$0xff] }
 0x171   :  { %v6850_v6 = vand.u32 4294901760, %v6849_v57  ;;  %v6851_v34 = vld [vmem:[#allocation26_spill] sm:$0xff]  ;;  %v6869_v57 = vld [vmem:[#allocation37_spill] sm:$0xff] }
 0x172   :  { %3187 = vmatpush1.bf16.msra.mxu1 %v6827_v10  ;;  %v3576_v50 = vpack.c.bf16 %v6838_v23, %v6836_v36  ;;  %v6852_v23 = vand.u32 4294901760, %v6851_v34  ;;  %v6870_v34 = vand.u32 4294901760, %v6869_v57 }
 0x173   :  { %3571 = vmatpush1.bf16.msra.mxu0 %v6828_v39  ;;  %3189 = vmatprep.subr.bf16.mxu1 %v6829_v15  ;;  %v6841_v39 = vld [vmem:[#allocation19_spill] sm:$0xff]  ;;  %v6843_v15 = vld [vmem:[#allocation20_spill] sm:$0xff] }
 0x174   :  { %3573 = vmatprep.subr.bf16.mxu0 %v6834_v4  ;;  %v6842_v10 = vand.u32 4294901760, %v6841_v39  ;;  %v6844_v11 = vand.u32 4294901760, %v6843_v15  ;;  %v6848_v4 = vand.u32 4294901760, %v6847_v49  ;;  %v3196_v36 = vpack.c.bf16 %v6852_v23, %v6850_v6  ;;  %v6856_v39 = vld [vmem:[#allocation29_spill] sm:$0xff] }
 0x175   :  { %v6857_v2 = vand.u32 4294901760, %v6856_v39 }
 0x176   :  { %3191 = vmatpush1.bf16.msra.mxu1 %v6839_v24  ;;  %v3194_v7 = vpack.c.bf16 %v6844_v11, %v6842_v10  ;;  %v3578_v42 = vpack.c.bf16 %v6848_v4, %v6846_v55  ;;  %v6853_v24 = vand.u32 4294901760, %v6761_v30  ;;  %v6858_v11 = vand.u32 4294901760, %v6762_v41  ;;  %v6861_v10 = vld [vmem:[#allocation31_spill] sm:$0xff]  ;;  %v6865_v55 = vld [vmem:[#allocation33_spill] sm:$0xff] }
 0x177   :  { %3575 = vmatpush1.bf16.msra.mxu0 %v6840_v54  ;;  %3193 = vmatprep.subr.bf16.mxu1 %v3192_v63  ;;  %v6854_v63 = vld [vmem:[#allocation28_spill] sm:$0xff]  ;;  %v6860_v4 = vand.u32 4294901760, %v6765_v43  ;;  %v6862_v6 = vand.u32 4294901760, %v6861_v10  ;;  %v6864_v30 = vand.u32 4294901760, %v6863_v37  ;;  %v6866_v49 = vand.u32 4294901760, %v6865_v55 }
 0x178   :  { %3577 = vmatprep.subr.bf16.mxu0 %v3576_v50  ;;  %v6855_v54 = vand.u32 4294901760, %v6854_v63  ;;  %v6859_v50 = vand.u32 4294901760, %v6763_v16  ;;  %v6871_v16 = vld [vmem:[#allocation38_spill] sm:$0xff]  ;;  %v6873_v43 = vand.u32 4294901760, %v6768_v59  ;;  %v6874_v63 = vld [vmem:[#allocation40_spill] sm:$0xff]  ;;  %v6883_v59 = vld [vmem:[#allocation43_spill] sm:$0xff] }
 0x179   :  { %1101 = vmatmul.mubr.f32.vlgmr.msra.gmra.mrb[0].mxu1 %v6853_v24  ;;  %v3198_v24 = vpack.c.bf16 %v6864_v30, %v6862_v6  ;;  %v6872_v23 = vand.u32 4294901760, %v6871_v16  ;;  %v6875_v39 = vand.u32 4294901760, %v6874_v63  ;;  %v6885_v30 = vld [vmem:[#allocation44_spill] sm:$0xff]  ;;  %v6891_v16 = vld [vmem:[#allocation49_spill] sm:$0xff] }
 0x17a   :  { %v3580_v15 = vpack.c.bf16 %v6857_v2, %v6855_v54  ;;  %2447 = vmatmul.mubr.f32.vlgmr.msra.gmra.mrb[0].mxu0 %v6858_v11  ;;  %1109 = vmatprep.mubr.f32.mxu1 %v6859_v50  ;;  %v6867_v2 = vld [vmem:[#allocation35_spill] sm:$0xff]  ;;  %v6876_v11 = vld [vmem:[#allocation41_spill] sm:$0xff]  ;;  %v6886_v55 = vand.u32 4294901760, %v6885_v30 }
 0x17b   :  { %3195 = vmatpush1.bf16.msra.mxu1 %v3194_v7  ;;  %2455 = vmatprep.mubr.f32.mxu0 %v6860_v4  ;;  %v6868_v54 = vand.u32 4294901760, %v6867_v2  ;;  %v3200_v7 = vpack.c.bf16 %v6872_v23, %v6870_v34  ;;  %v6877_v50 = vand.u32 4294901760, %v6876_v11  ;;  %v6879_v4 = vmov 1.0  }
 0x17c   :  { %3579 = vmatpush1.bf16.msra.mxu0 %v3578_v42  ;;  %3197 = vmatprep.subr.bf16.mxu1 %v3196_v36  ;;  %v6878_v36 = vand.u32 4294901760, %v6770_v3  ;;  %v6887_v3 = vld [vmem:[#allocation45_spill] sm:$0xff]  ;;  %v6892_v23 = vand.u32 4294901760, %v6891_v16 }
 0x17d   :  { %v3582_v41 = vpack.c.bf16 %v6868_v54, %v6866_v49  ;;  %1113 = vmatmul.mubr.f32.gmra.mrb[2].mxu1 %v6873_v43  ;;  %3581 = vmatprep.subr.bf16.mxu0 %v3580_v15  ;;  %v3584_v42 = vpack.c.bf16 %v6877_v50, %v6875_v39  ;;  %v6884_v15 = vand.u32 4294901760, %v6883_v59  ;;  %v6888_v2 = vand.u32 4294901760, %v6887_v3  ;;  %v6889_v54 = vld [vmem:[#allocation47_spill] sm:$0xff]  ;;  %v6895_v39 = vld [vmem:[#allocation52_spill] sm:$0xff]  ;;  %v6897_v50 = vld [vmem:[#allocation53_spill] sm:$0xff] }
 0x17e   :  { %2459 = vmatmul.mubr.f32.gmra.mrb[2].mxu0 %v6878_v36  ;;  %2916 = vmatprep.mubr.msk.f32.mxu1 %vm40_vm1, %v6879_v4  ;;  %v6890_v57 = vand.u32 4294901760, %v6889_v54  ;;  %v6896_v11 = vand.u32 4294901760, %v6895_v39  ;;  %v6898_v36 = vand.u32 4294901760, %v6897_v50  ;;  %v6903_v3 = vld [vmem:[#allocation57_spill] sm:$0xff]  ;;  %v6905_v54 = vld [vmem:[#allocation59_spill] sm:$0xff] }
 0x17f   :  { %3199 = vmatpush1.bf16.msra.mxu1 %v3198_v24  ;;  %2928 = vmatprep.mubr.msk.f32.mxu0 %vm42_vm3, %v6879_v4  ;;  %v3202_v49 = vpack.c.bf16 %v6886_v55, %v6884_v15  ;;  %v6893_v24 = vld [vmem:[#allocation50_spill] sm:$0xff]  ;;  %v6899_v15 = vld [vmem:[#allocation55_spill] sm:$0xff]  ;;  %v6913_v50 = vld [vmem:[#allocation65_spill] sm:$0xff] }
 0x180   :  { %3583 = vmatpush1.bf16.msra.mxu0 %v3582_v41  ;;  %3201 = vmatprep.subr.bf16.mxu1 %v3200_v7  ;;  %v3586_v34 = vpack.c.bf16 %v6890_v57, %v6888_v2  ;;  %v6894_v43 = vand.u32 4294901760, %v6893_v24  ;;  %v3588_v59 = vpack.c.bf16 %v6898_v36, %v6896_v11  ;;  %v6900_v41 = vand.u32 4294901760, %v6899_v15  ;;  %v6901_v7 = vld [vmem:[#allocation56_spill] sm:$0xff]  ;;  %v6909_v24 = vld [vmem:[#allocation62_spill] sm:$0xff] }
 0x181   :  { %3585 = vmatprep.subr.bf16.mxu0 %v3584_v42  ;;  %v6902_v30 = vand.u32 4294901760, %v6901_v7  ;;  %v6904_v2 = vand.u32 4294901760, %v6903_v3  ;;  %v6906_v57 = vand.u32 4294901760, %v6905_v54  ;;  %v6911_v11 = vld [vmem:[#allocation64_spill] sm:$0xff]  ;;  %v6914_v36 = vand.u32 4294901760, %v6913_v50  ;;  %v6919_v3 = vld [vmem:[#allocation69_spill] sm:$0xff] }
 0x182   :  { %v3204_v63 = vpack.c.bf16 %v6894_v43, %v6892_v23  ;;  %v6907_v23 = vld [vmem:[#allocation61_spill] sm:$0xff]  ;;  %v6910_v43 = vand.u32 4294901760, %v6909_v24  ;;  %v6921_v54 = vld [vmem:[#allocation71_spill] sm:$0xff]  ;;  %v6925_v24 = vld [vmem:[#allocation74_spill] sm:$0xff] }
 0x183   :  { %3203 = vmatpush1.bf16.msra.mxu1 %v3202_v49  ;;  %v3206_v55 = vpack.c.bf16 %v6902_v30, %v6900_v41  ;;  %v3590_v16 = vpack.c.bf16 %v6906_v57, %v6904_v2  ;;  %v6908_v42 = vand.u32 4294901760, %v6907_v23  ;;  %v6912_v49 = vand.u32 4294901760, %v6911_v11  ;;  %v6915_v41 = vld [vmem:[#allocation67_spill] sm:$0xff]  ;;  %v6929_v50 = vld [vmem:[#allocation77_spill] sm:$0xff] }
 0x184   :  { %3587 = vmatpush1.bf16.msra.mxu0 %v3586_v34  ;;  %3205 = vmatprep.subr.bf16.mxu1 %v3204_v63  ;;  %v6916_v34 = vand.u32 4294901760, %v6915_v41  ;;  %v6917_v63 = vld [vmem:[#allocation68_spill] sm:$0xff]  ;;  %v6920_v2 = vand.u32 4294901760, %v6919_v3  ;;  %v6922_v57 = vand.u32 4294901760, %v6921_v54  ;;  %v6935_v3 = vld [vmem:[#allocation81_spill] sm:$0xff]  ;;  %v6937_v54 = vld [vmem:[#allocation83_spill] sm:$0xff] }
 0x185   :  { %v3208_v39 = vpack.c.bf16 %v6910_v43, %v6908_v42  ;;  %3589 = vmatprep.subr.bf16.mxu0 %v3588_v59  ;;  %v3592_v15 = vpack.c.bf16 %v6914_v36, %v6912_v49  ;;  %v6918_v7 = vand.u32 4294901760, %v6917_v63  ;;  %v6923_v42 = vld [vmem:[#allocation73_spill] sm:$0xff]  ;;  %v6926_v43 = vand.u32 4294901760, %v6925_v24  ;;  %v6927_v49 = vld [vmem:[#allocation76_spill] sm:$0xff]  ;;  %v6941_v24 = vld [vmem:[#allocation86_spill] sm:$0xff] }
 0x186   :  { %v3594_v23 = vpack.c.bf16 %v6922_v57, %v6920_v2  ;;  %v6924_v59 = vand.u32 4294901760, %v6923_v42  ;;  %v6930_v36 = vand.u32 4294901760, %v6929_v50  ;;  %v6936_v2 = vand.u32 4294901760, %v6935_v3  ;;  %v6945_v50 = vld [vmem:[#allocation89_spill] sm:$0xff] }
 0x187   :  { %3207 = vmatpush1.bf16.msra.mxu1 %v3206_v55  ;;  %v3210_v30 = vpack.c.bf16 %v6918_v7, %v6916_v34  ;;  %v6928_v55 = vand.u32 4294901760, %v6927_v49  ;;  %v6931_v34 = vld [vmem:[#allocation79_spill] sm:$0xff]  ;;  %v6938_v57 = vand.u32 4294901760, %v6937_v54  ;;  %v6951_v3 = vld [vmem:[#allocation93_spill] sm:$0xff] }
 0x188   :  { %3591 = vmatpush1.bf16.msra.mxu0 %v3590_v16  ;;  %3209 = vmatprep.subr.bf16.mxu1 %v3208_v39  ;;  %v3212_v11 = vpack.c.bf16 %v6926_v43, %v6924_v59  ;;  %v6932_v16 = vand.u32 4294901760, %v6931_v34  ;;  %v6933_v39 = vld [vmem:[#allocation80_spill] sm:$0xff]  ;;  %v6939_v59 = vld [vmem:[#allocation85_spill] sm:$0xff]  ;;  %v6942_v43 = vand.u32 4294901760, %v6941_v24  ;;  %v6953_v54 = vld [vmem:[#allocation95_spill] sm:$0xff] }
 0x189   :  { %3593 = vmatprep.subr.bf16.mxu0 %v3592_v15  ;;  %v3596_v41 = vpack.c.bf16 %v6930_v36, %v6928_v55  ;;  %v6934_v63 = vand.u32 4294901760, %v6933_v39  ;;  %v3598_v42 = vpack.c.bf16 %v6938_v57, %v6936_v2  ;;  %v6940_v15 = vand.u32 4294901760, %v6939_v59  ;;  %v6943_v55 = vld [vmem:[#allocation88_spill] sm:$0xff] }
 0x18a   :  { %v6946_v36 = vand.u32 4294901760, %v6945_v50  ;;  %v6952_v2 = vand.u32 4294901760, %v6951_v3  ;;  %v6954_v57 = vand.u32 4294901760, %v6953_v54  ;;  %v6977_v54 = vand.u32 4294901760, %v6570_v29 }
 0x18b   :  { %3211 = vmatpush1.bf16.msra.mxu1 %v3210_v30  ;;  %v3214_v7 = vpack.c.bf16 %v6934_v63, %v6932_v16  ;;  %v3216_v49 = vpack.c.bf16 %v6942_v43, %v6940_v15  ;;  %v6944_v30 = vand.u32 4294901760, %v6943_v55  ;;  %v6947_v16 = vld [vmem:[#allocation91_spill] sm:$0xff]  ;;  %v6956_v15 = vld [vmem:[#allocation98_spill] sm:$0xff]  ;;  %v6959_v55 = vand.u32 4294901760, %v6704_v13 }
 0x18c   :  { %3595 = vmatpush1.bf16.msra.mxu0 %v3594_v23  ;;  %3213 = vmatprep.subr.bf16.mxu1 %v3212_v11  ;;  %v6948_v23 = vand.u32 4294901760, %v6947_v16  ;;  %v6949_v11 = vld [vmem:[#allocation92_spill] sm:$0xff]  ;;  %v3602_v59 = vpack.c.bf16 %v6954_v57, %v6952_v2  ;;  %v6957_v24 = vand.u32 4294901760, %v6956_v15  ;;  %v6966_v13 = vand.u32 4294901760, %v6711_v8 }
 0x18d   :  { %3597 = vmatprep.subr.bf16.mxu0 %v3596_v41  ;;  %v3600_v34 = vpack.c.bf16 %v6946_v36, %v6944_v30  ;;  %v6950_v39 = vand.u32 4294901760, %v6949_v11  ;;  %v6955_v41 = vand.u32 4294901760, %v6701_v0  ;;  %v6962_v36 = vand.u32 4294901760, %v6707_v56 }
 0x18e   :  { %v6963_v0 = vand.u32 4294901760, %v6708_v14  ;;  %v6970_v14 = vand.u32 4294901760, %v6563_v35  ;;  %v6973_v8 = vand.u32 4294901760, %v6566_v9  ;;  %v6980_v57 = vand.u32 4294901760, %v6575_v44 }
 0x18f   :  { %3215 = vmatpush1.bf16.msra.mxu1 %v3214_v7  ;;  %v3218_v63 = vpack.c.bf16 %v6950_v39, %v6948_v23  ;;  %v3220_v43 = vpack.c.bf16 %v6957_v24, %v6955_v41  ;;  %v6958_v7 = vand.u32 4294901760, %v6703_v38  ;;  %v6965_v38 = vand.u32 4294901760, %v6710_v1 }
 0x190   :  { %3599 = vmatpush1.bf16.msra.mxu0 %v3598_v42  ;;  %3217 = vmatprep.subr.bf16.mxu1 %v3216_v49  ;;  %v6960_v42 = vand.u32 4294901760, %v6705_v58  ;;  %v6961_v49 = vand.u32 4294901760, %v6706_v22  ;;  %v3606_v16 = vpack.c.bf16 %v6963_v0, %v6962_v36  ;;  %v6967_v58 = vand.u32 4294901760, %v6712_v60 }
 0x191   :  { %3601 = vmatprep.subr.bf16.mxu0 %v3600_v34  ;;  %v3604_v30 = vpack.c.bf16 %v6959_v55, %v6958_v7  ;;  %v6964_v34 = vand.u32 4294901760, %v6709_v62  ;;  %v6968_v22 = vand.u32 4294901760, %v6561_v28  ;;  %v6969_v39 = vand.u32 4294901760, %v6562_v31 }
 0x192   :  { %v3222_v50 = vpack.c.bf16 %v6961_v49, %v6960_v42  ;;  %v3608_v11 = vpack.c.bf16 %v6967_v58, %v6966_v13  ;;  %v6971_v62 = vand.u32 4294901760, %v6564_v26  ;;  %v6974_v60 = vand.u32 4294901760, %v6567_v12  ;;  %v6997_v42 = vld [vmem:[#allocation157_spill] sm:$0xff] }
 0x193   :  { %3219 = vmatpush1.bf16.msra.mxu1 %v3218_v63  ;;  %v3224_v23 = vpack.c.bf16 %v6965_v38, %v6964_v34  ;;  %v3226_v56 = vpack.c.bf16 %v6969_v39, %v6968_v22  ;;  %v6972_v63 = vand.u32 4294901760, %v6565_v21  ;;  %v6975_v28 = vand.u32 4294901760, %v6568_v45  ;;  %v7009_v58 = vld [vmem:[#allocation165_spill] sm:$0xff]  ;;  %v7011_v22 = vld [vmem:[#allocation167_spill] sm:$0xff] }
 0x194   :  { %3603 = vmatpush1.bf16.msra.mxu0 %v3602_v59  ;;  %3221 = vmatprep.subr.bf16.mxu1 %v3220_v43  ;;  %v3610_v1 = vpack.c.bf16 %v6971_v62, %v6970_v14  ;;  %v6976_v31 = vand.u32 4294901760, %v6569_v40  ;;  %v6978_v26 = vand.u32 4294901760, %v6571_v61  ;;  %v6979_v21 = vand.u32 4294901760, %v6572_v51  ;;  %v7013_v14 = vld [vmem:[#allocation169_spill] sm:$0xff] }
 0x195   :  { %3605 = vmatprep.subr.bf16.mxu0 %v3604_v30  ;;  %v3228_v3 = vpack.c.bf16 %v6973_v8, %v6972_v63  ;;  %v3612_v2 = vpack.c.bf16 %v6975_v28, %v6974_v60  ;;  %v6981_v12 = vand.u32 4294901760, %v6576_v52  ;;  %v6982_v45 = vand.u32 4294901760, %v6577_v25  ;;  %v7019_v28 = vld [vmem:[#allocation173_spill] sm:$0xff] }
 0x196   :  { %v3230_v35 = vpack.c.bf16 %v6977_v54, %v6976_v31  ;;  %v3614_v9 = vpack.c.bf16 %v6979_v21, %v6978_v26  ;;  %v6983_v40 = vand.u32 4294901760, %v6578_v53  ;;  %v6984_v29 = vand.u32 4294901760, %v6579_v47  ;;  %v7021_v54 = vld [vmem:[#allocation175_spill] sm:$0xff]  ;;  %v7023_v26 = vld [vmem:[#allocation176_spill] sm:$0xff] }
 0x197   :  { %3223 = vmatpush1.bf16.msra.mxu1 %v3222_v50  ;;  %v3232_v59 = vpack.c.bf16 %v6981_v12, %v6980_v57  ;;  %v6985_v15 = vand.u32 4294901760, %v6580_v5  ;;  %v6986_v51 = vand.u32 4294901760, %v6582_v48  ;;  %v6987_v44 = vand.u32 4294901760, %v6654_v19  ;;  %v6999_v50 = vld [vmem:[#allocation158_spill] sm:$0xff]  ;;  %v7025_v57 = vld [vmem:[#allocation177_spill] sm:$0xff] }
 0x198   :  { %3607 = vmatpush1.bf16.msra.mxu0 %v3606_v16  ;;  %3225 = vmatprep.subr.bf16.mxu1 %v3224_v23  ;;  %v3616_v41 = vpack.c.bf16 %v6983_v40, %v6982_v45  ;;  %v6988_v24 = vand.u32 4294901760, %v6655_v27  ;;  %v6989_v25 = vand.u32 4294901760, %v6656_v46  ;;  %v6990_v53 = vand.u32 4294901760, %v6586_v33  ;;  %v6995_v27 = vld [vmem:[#allocation155_spill] sm:$0xff]  ;;  %v7003_v16 = vld [vmem:[#allocation161_spill] sm:$0xff]  ;;  %v7007_v23 = vld [vmem:[#allocation164_spill] sm:$0xff] }
 0x199   :  { %3609 = vmatprep.subr.bf16.mxu0 %v3608_v11  ;;  %v3234_v61 = vpack.c.bf16 %v6985_v15, %v6984_v29  ;;  %v3618_v52 = vpack.c.bf16 %v6987_v44, %v6986_v51  ;;  %v6991_v47 = vand.u32 4294901760, %v6587_v20  ;;  %v6992_v5 = vand.u32 4294901760, %v6588_v32  ;;  %v7001_v20 = vld [vmem:[#allocation160_spill] sm:$0xff]  ;;  %v7031_v15 = vld [vmem:[#allocation182_spill] sm:$0xff] }
 0x19a   :  { %v3236_v43 = vpack.c.bf16 %v6989_v25, %v6988_v24  ;;  %v6993_v55 = vand.u32 4294901760, %v6657_v17  ;;  %v6994_v19 = vand.u32 4294901760, %v6658_v18  ;;  %v6996_v30 = vand.u32 4294901760, %v6995_v27  ;;  %v7005_v17 = vld [vmem:[#allocation163_spill] sm:$0xff]  ;;  %v7033_v44 = vld [vmem:[#allocation184_spill] sm:$0xff]  ;;  %v7035_v24 = vld [vmem:[#allocation185_spill] sm:$0xff] }
 0x19b   :  { %3227 = vmatpush1.bf16.msra.mxu1 %v3226_v56  ;;  %v3620_v7 = vpack.c.bf16 %v6991_v47, %v6990_v53  ;;  %v6998_v49 = vand.u32 4294901760, %v6997_v42  ;;  %v7000_v33 = vand.u32 4294901760, %v6999_v50  ;;  %v7002_v0 = vand.u32 4294901760, %v7001_v20  ;;  %v7037_v53 = vld [vmem:[#allocation187_spill] sm:$0xff]  ;;  %v7045_v42 = vld [vmem:[#allocation193_spill] sm:$0xff]  ;;  %v7047_v50 = vld [vmem:[#allocation194_spill] sm:$0xff] }
 0x19c   :  { %3611 = vmatpush1.bf16.msra.mxu0 %v3610_v1  ;;  %3229 = vmatprep.subr.bf16.mxu1 %v3228_v3  ;;  %v3238_v48 = vpack.c.bf16 %v6993_v55, %v6992_v5  ;;  %v3622_v46 = vpack.c.bf16 %v6996_v30, %v6994_v19  ;;  %v7004_v32 = vand.u32 4294901760, %v7003_v16  ;;  %v7006_v38 = vand.u32 4294901760, %v7005_v17  ;;  %v7015_v1 = vld [vmem:[#allocation170_spill] sm:$0xff]  ;;  %v7017_v3 = vld [vmem:[#allocation172_spill] sm:$0xff]  ;;  %v7043_v27 = vld [vmem:[#allocation191_spill] sm:$0xff] }
 0x19d   :  { %3613 = vmatprep.subr.bf16.mxu0 %v3612_v2  ;;  %v3240_v36 = vpack.c.bf16 %v7000_v33, %v6998_v49  ;;  %v7008_v13 = vand.u32 4294901760, %v7007_v23  ;;  %v7010_v11 = vand.u32 4294901760, %v7009_v58  ;;  %v7012_v39 = vand.u32 4294901760, %v7011_v22  ;;  %v7049_v20 = vld [vmem:[#allocation196_spill] sm:$0xff]  ;;  %v7051_v16 = vld [vmem:[#allocation197_spill] sm:$0xff]  ;;  %v7053_v17 = vld [vmem:[#allocation199_spill] sm:$0xff] }
 0x19e   :  { %v3624_v34 = vpack.c.bf16 %v7004_v32, %v7002_v0  ;;  %v7014_v62 = vand.u32 4294901760, %v7013_v14  ;;  %v7016_v63 = vand.u32 4294901760, %v7015_v1  ;;  %v7018_v60 = vand.u32 4294901760, %v7017_v3  ;;  %v7055_v23 = vld [vmem:[#allocation200_spill] sm:$0xff]  ;;  %v7057_v58 = vld [vmem:[#allocation201_spill] sm:$0xff]  ;;  %v7059_v22 = vld [vmem:[#allocation203_spill] sm:$0xff] }
 0x19f   :  { %3231 = vmatpush1.bf16.msra.mxu1 %v3230_v35  ;;  %v3242_v18 = vpack.c.bf16 %v7008_v13, %v7006_v38  ;;  %v3626_v56 = vpack.c.bf16 %v7012_v39, %v7010_v11  ;;  %v7020_v2 = vand.u32 4294901760, %v7019_v28  ;;  %v7022_v35 = vand.u32 4294901760, %v7021_v54  ;;  %v7061_v14 = vld [vmem:[#allocation13_spill] sm:$0xff]  ;;  %v7066_v3 = vld [vmem:[#allocation18_spill] sm:$0xff]  ;;  %v7068_v28 = vld [vmem:[#allocation24_spill] sm:$0xff] }
 0x1a0   :  { %3615 = vmatpush1.bf16.msra.mxu0 %v3614_v9  ;;  %3233 = vmatprep.subr.bf16.mxu1 %v3232_v59  ;;  %v3244_v8 = vpack.c.bf16 %v7016_v63, %v7014_v62  ;;  %v7024_v21 = vand.u32 4294901760, %v7023_v26  ;;  %v7026_v12 = vand.u32 4294901760, %v7025_v57  ;;  %v7027_v59 = vld [vmem:[#allocation179_spill] sm:$0xff]  ;;  %v7036_v25 = vand.u32 4294901760, %v7035_v24  ;;  %v7071_v54 = vld [vmem:[#allocation34_spill] sm:$0xff]  ;;  %v7076_v57 = vld [vmem:[#allocation48_spill] sm:$0xff] }
 0x1a1   :  { %3617 = vmatprep.subr.bf16.mxu0 %v3616_v41  ;;  %v3628_v31 = vpack.c.bf16 %v7020_v2, %v7018_v60  ;;  %v7028_v45 = vand.u32 4294901760, %v7027_v59  ;;  %v7029_v41 = vld [vmem:[#allocation181_spill] sm:$0xff]  ;;  %v7038_v47 = vand.u32 4294901760, %v7037_v53  ;;  %v7044_v30 = vand.u32 4294901760, %v7043_v27  ;;  %v7062_v62 = vld [vmem:[#allocation15_spill] sm:$0xff]  ;;  %v7067_v60 = vld [vmem:[#allocation22_spill] sm:$0xff] }
 0x1a2   :  { %v3246_v9 = vpack.c.bf16 %v7024_v21, %v7022_v35  ;;  %v7030_v29 = vand.u32 4294901760, %v7029_v41  ;;  %v7046_v49 = vand.u32 4294901760, %v7045_v42  ;;  %v7048_v33 = vand.u32 4294901760, %v7047_v50  ;;  %v7069_v2 = vld [vmem:[#allocation27_spill] sm:$0xff]  ;;  %v7072_v35 = vld [vmem:[#allocation36_spill] sm:$0xff]  ;;  %v7074_v21 = vld [vmem:[#allocation42_spill] sm:$0xff] }
 0x1a3   :  { %3235 = vmatpush1.bf16.msra.mxu1 %v3234_v61  ;;  %v3630_v40 = vpack.c.bf16 %v7028_v45, %v7026_v12  ;;  %v7032_v61 = vand.u32 4294901760, %v7031_v15  ;;  %v7050_v0 = vand.u32 4294901760, %v7049_v20  ;;  %v7052_v32 = vand.u32 4294901760, %v7051_v16  ;;  %v7073_v26 = vld [vmem:[#allocation39_spill] sm:$0xff]  ;;  %v7078_v59 = vld [vmem:[#allocation54_spill] sm:$0xff]  ;;  %v7088_v24 = vld [vmem:[#allocation84_spill] sm:$0xff] }
 0x1a4   :  { %3619 = vmatpush1.bf16.msra.mxu0 %v3618_v52  ;;  %3237 = vmatprep.subr.bf16.mxu1 %v3236_v43  ;;  %v7034_v52 = vand.u32 4294901760, %v7033_v44  ;;  %v7054_v38 = vand.u32 4294901760, %v7053_v17  ;;  %v7056_v13 = vand.u32 4294901760, %v7055_v23  ;;  %v7058_v11 = vand.u32 4294901760, %v7057_v58  ;;  %v7077_v12 = vld [vmem:[#allocation51_spill] sm:$0xff]  ;;  %v7079_v45 = vld [vmem:[#allocation58_spill] sm:$0xff] }
 0x1a5   :  { %3621 = vmatprep.subr.bf16.mxu0 %v3620_v7  ;;  %v3248_v51 = vpack.c.bf16 %v7032_v61, %v7030_v29  ;;  %v7039_v7 = vld [vmem:[#allocation188_spill] sm:$0xff]  ;;  %v7060_v39 = vand.u32 4294901760, %v7059_v22  ;;  %v7081_v41 = vld [vmem:[#allocation63_spill] sm:$0xff]  ;;  %v7082_v29 = vld [vmem:[#allocation66_spill] sm:$0xff] }
 0x1a6   :  { %v3632_v43 = vpack.c.bf16 %v7036_v25, %v7034_v52  ;;  %v7040_v5 = vand.u32 4294901760, %v7039_v7  ;;  %v7083_v15 = vld [vmem:[#allocation70_spill] sm:$0xff]  ;;  %v7084_v61 = vld [vmem:[#allocation72_spill] sm:$0xff]  ;;  %v7089_v25 = vld [vmem:[#allocation87_spill] sm:$0xff] }
 0x1a7   :  { %3239 = vmatpush1.bf16.msra.mxu1 %v3238_v48  ;;  %v7041_v48 = vld [vmem:[#allocation189_spill] sm:$0xff]  ;;  %v7086_v44 = vld [vmem:[#allocation78_spill] sm:$0xff]  ;;  %v7093_v7 = vld [vmem:[#allocation99_spill] sm:$0xff] }
 0x1a8   :  { %3623 = vmatpush1.bf16.msra.mxu0 %v3622_v46  ;;  %3241 = vmatprep.subr.bf16.mxu1 %v3240_v36  ;;  %v3250_v55 = vpack.c.bf16 %v7040_v5, %v7038_v47  ;;  %v7042_v19 = vand.u32 4294901760, %v7041_v48  ;;  %v3252_v36 = vpack.c.bf16 %v7048_v33, %v7046_v49  ;;  %v7087_v52 = vld [vmem:[#allocation82_spill] sm:$0xff]  ;;  %v7092_v47 = vld [vmem:[#allocation96_spill] sm:$0xff]  ;;  %v7101_v42 = vld [vmem:[#allocation123_spill] sm:$0xff] }
 0x1a9   :  { %3625 = vmatprep.subr.bf16.mxu0 %v3624_v34  ;;  %v3636_v34 = vpack.c.bf16 %v7052_v32, %v7050_v0  ;;  %v7091_v53 = vld [vmem:[#allocation94_spill] sm:$0xff]  ;;  %v7096_v48 = vld [vmem:[#allocation108_spill] sm:$0xff]  ;;  %v7109_v32 = vld [vmem:[#allocation147_spill] sm:$0xff] }
 0x1aa   :  { %v3634_v46 = vpack.c.bf16 %v7044_v30, %v7042_v19  ;;  %v7094_v5 = vld [vmem:[#allocation102_spill] sm:$0xff]  ;;  %v7097_v19 = vld [vmem:[#allocation111_spill] sm:$0xff]  ;;  %v7104_v33 = vld [vmem:[#allocation132_spill] sm:$0xff] }
 0x1ab   :  { %3243 = vmatpush1.bf16.msra.mxu1 %v3242_v18  ;;  %v3254_v18 = vpack.c.bf16 %v7056_v13, %v7054_v38  ;;  %v7098_v27 = vld [vmem:[#allocation114_spill] sm:$0xff]  ;;  %v7108_v16 = vld [vmem:[#allocation144_spill] sm:$0xff]  ;;  %v7113_v23 = vld [vmem:[#allocation159_spill] sm:$0xff] }
 0x1ac   :  { %3627 = vmatpush1.bf16.msra.mxu0 %v3626_v56  ;;  %3245 = vmatprep.subr.bf16.mxu1 %v3244_v8  ;;  %v3638_v56 = vpack.c.bf16 %v7060_v39, %v7058_v11  ;;  %v7099_v30 = vld [vmem:[#allocation118_spill] sm:$0xff]  ;;  %v7112_v38 = vld [vmem:[#allocation156_spill] sm:$0xff]  ;;  %v7117_v11 = vld [vmem:[#allocation171_spill] sm:$0xff] }
 0x1ad   :  { %3629 = vmatprep.subr.bf16.mxu0 %v3628_v31  ;;  %v7070_v31 = vld [vmem:[#allocation30_spill] sm:$0xff]  ;;  %v7116_v58 = vld [vmem:[#allocation168_spill] sm:$0xff] }
 0x1ae   :  { %v7102_v49 = vld [vmem:[#allocation126_spill] sm:$0xff] }
 0x1af   :  { %3247 = vmatpush1.bf16.msra.mxu1 %v3246_v9  ;;  %v7075_v9 = vld [vmem:[#allocation46_spill] sm:$0xff] }
 0x1b0   :  { %3631 = vmatpush1.bf16.msra.mxu0 %v3630_v40  ;;  %3249 = vmatprep.subr.bf16.mxu1 %v3248_v51  ;;  %v7080_v40 = vld [vmem:[#allocation60_spill] sm:$0xff]  ;;  %v7085_v51 = vld [vmem:[#allocation75_spill] sm:$0xff]  ;;  %v7103_v50 = vld [vmem:[#allocation130_spill] sm:$0xff] }
 0x1b1   :  { %3633 = vmatprep.subr.bf16.mxu0 %v3632_v43  ;;  %v7090_v43 = vld [vmem:[#allocation90_spill] sm:$0xff] }
 0x1b2   :  { %v7106_v20 = vld [vmem:[#allocation138_spill] sm:$0xff] }
 0x1b3   :  { %3251 = vmatpush1.bf16.msra.mxu1 %v3250_v55  ;;  %v7095_v55 = vld [vmem:[#allocation106_spill] sm:$0xff] }
 0x1b4   :  { %3635 = vmatpush1.bf16.msra.mxu0 %v3634_v46  ;;  %3253 = vmatprep.subr.bf16.mxu1 %v3252_v36  ;;  %v7100_v46 = vld [vmem:[#allocation120_spill] sm:$0xff]  ;;  %v7105_v36 = vld [vmem:[#allocation135_spill] sm:$0xff]  ;;  %v7107_v0 = vld [vmem:[#allocation142_spill] sm:$0xff] }
 0x1b5   :  { %3637 = vmatprep.subr.bf16.mxu0 %v3636_v34  ;;  %v7110_v34 = vld [vmem:[#allocation150_spill] sm:$0xff] }
 0x1b6   :  { %v7111_v17 = vld [vmem:[#allocation154_spill] sm:$0xff] }
 0x1b7   :  { %3255 = vmatpush1.bf16.msra.mxu1 %v3254_v18  ;;  %v7114_v13 = vld [vmem:[#allocation162_spill] sm:$0xff] }
 0x1b8   :  { %3639 = vmatpush1.bf16.msra.mxu0 %v3638_v56  ;;  %3257 = vmatprep.subr.bf16.mxu1 %v7061_v14  ;;  %v7115_v18 = vld [vmem:[#allocation166_spill] sm:$0xff]  ;;  %v7120_v56 = vld [vmem:[#allocation180_spill] sm:$0xff]  ;;  %v7121_v14 = vld [vmem:[#allocation183_spill] sm:$0xff] }
 0x1b9   :  { %3641 = vmatprep.subr.bf16.mxu0 %v7062_v62  ;;  %v7118_v22 = vld [vmem:[#allocation174_spill] sm:$0xff] }
 0x1ba   :  { %2917 = vmatmul.mubr.msk.f32.vlgmr.msra.gmra.mrb[0].mxu1 %vm39_vm0, %v6879_v4  ;;  %v7119_v39 = vld [vmem:[#allocation178_spill] sm:$0xff] }
 0x1bb   :  { %2929 = vmatmul.mubr.msk.f32.vlgmr.msra.gmra.mrb[0].mxu0 %vm41_vm2, %v6879_v4  ;;  %2918 = vmatprep.mubr.msk.f32.mxu1 %vm44_vm5, %v6879_v4  ;;  %v7122_v62 = vld [vmem:[#allocation186_spill] sm:$0xff] }
 0x1bc   :  { %3259 = vmatpush1.bf16.msra.mxu1 %v7066_v3  ;;  %2930 = vmatprep.mubr.msk.f32.mxu0 %vm46_vm7, %v6879_v4  ;;  %v7123_v3 = vld [vmem:[#allocation190_spill] sm:$0xff] }
 0x1bd   :  { %3643 = vmatpush1.bf16.msra.mxu0 %v7067_v60  ;;  %3261 = vmatprep.subr.bf16.mxu1 %v7068_v28  ;;  %v7124_v60 = vld [vmem:[#allocation192_spill] sm:$0xff]  ;;  %v7125_v28 = vld [vmem:[#allocation195_spill] sm:$0xff] }
 0x1be   :  { %2919 = vmatmul.mubr.msk.f32.gmra.mrb[2].mxu1 %vm43_vm4, %v6879_v4  ;;  %3645 = vmatprep.subr.bf16.mxu0 %v7069_v2  ;;  %v7126_v2 = vld [vmem:[#allocation198_spill] sm:$0xff] }
 0x1bf   :  { %2931 = vmatmul.mubr.msk.f32.gmra.mrb[2].mxu0 %vm45_vm6, %v6879_v4  ;;  %2920 = vmatprep.mubr.msk.f32.mxu1 %vm40_vm1, %v6879_v4 }
 0x1c0   :  { %3263 = vmatpush1.bf16.msra.mxu1 %v7070_v31  ;;  %2932 = vmatprep.mubr.msk.f32.mxu0 %vm42_vm3, %v6879_v4  ;;  %v7127_v31 = vld [vmem:[#allocation202_spill] sm:$0xff] }
 0x1c1   :  { %3647 = vmatpush1.bf16.msra.mxu0 %v7071_v54  ;;  %3265 = vmatprep.subr.bf16.mxu1 %v7072_v35 }
 0x1c2   :  { %3649 = vmatprep.subr.bf16.mxu0 %v7073_v26 }
 0x1c4   :  { %3267 = vmatpush1.bf16.msra.mxu1 %v7074_v21 }
 0x1c5   :  { %3651 = vmatpush1.bf16.msra.mxu0 %v7075_v9  ;;  %3269 = vmatprep.subr.bf16.mxu1 %v7076_v57 }
 0x1c6   :  { %3653 = vmatprep.subr.bf16.mxu0 %v7077_v12 }
 0x1c8   :  { %3271 = vmatpush1.bf16.msra.mxu1 %v7078_v59 }
 0x1c9   :  { %3655 = vmatpush1.bf16.msra.mxu0 %v7079_v45  ;;  %3273 = vmatprep.subr.bf16.mxu1 %v7080_v40 }
 0x1ca   :  { %3657 = vmatprep.subr.bf16.mxu0 %v7081_v41 }
 0x1cc   :  { %3275 = vmatpush1.bf16.msra.mxu1 %v7082_v29 }
 0x1cd   :  { %3659 = vmatpush1.bf16.msra.mxu0 %v7083_v15  ;;  %3277 = vmatprep.subr.bf16.mxu1 %v7084_v61 }
 0x1ce   :  { %3661 = vmatprep.subr.bf16.mxu0 %v7085_v51 }
 0x1d0   :  { %3279 = vmatpush1.bf16.msra.mxu1 %v7086_v44 }
 0x1d1   :  { %3663 = vmatpush1.bf16.msra.mxu0 %v7087_v52  ;;  %3281 = vmatprep.subr.bf16.mxu1 %v7088_v24 }
 0x1d2   :  { %3665 = vmatprep.subr.bf16.mxu0 %v7089_v25 }
 0x1d4   :  { %3283 = vmatpush1.bf16.msra.mxu1 %v7090_v43 }
 0x1d5   :  { %3667 = vmatpush1.bf16.msra.mxu0 %v7091_v53  ;;  %3285 = vmatprep.subr.bf16.mxu1 %v7092_v47 }
 0x1d6   :  { %3669 = vmatprep.subr.bf16.mxu0 %v7093_v7 }
 0x1d8   :  { %3287 = vmatpush1.bf16.msra.mxu1 %v7094_v5 }
 0x1d9   :  { %3671 = vmatpush1.bf16.msra.mxu0 %v7095_v55  ;;  %3289 = vmatprep.subr.bf16.mxu1 %v7096_v48 }
 0x1da   :  { %3673 = vmatprep.subr.bf16.mxu0 %v7097_v19 }
 0x1dc   :  { %3291 = vmatpush1.bf16.msra.mxu1 %v7098_v27 }
 0x1dd   :  { %3675 = vmatpush1.bf16.msra.mxu0 %v7099_v30  ;;  %3293 = vmatprep.subr.bf16.mxu1 %v7100_v46 }
 0x1de   :  { %3677 = vmatprep.subr.bf16.mxu0 %v7101_v42 }
 0x1e0   :  { %3295 = vmatpush1.bf16.msra.mxu1 %v7102_v49 }
 0x1e1   :  { %3679 = vmatpush1.bf16.msra.mxu0 %v7103_v50  ;;  %3297 = vmatprep.subr.bf16.mxu1 %v7104_v33 }
 0x1e2   :  { %3681 = vmatprep.subr.bf16.mxu0 %v7105_v36 }
 0x1e4   :  { %3299 = vmatpush1.bf16.msra.mxu1 %v7106_v20 }
 0x1e5   :  { %3683 = vmatpush1.bf16.msra.mxu0 %v7107_v0  ;;  %3301 = vmatprep.subr.bf16.mxu1 %v7108_v16 }
 0x1e6   :  { %3685 = vmatprep.subr.bf16.mxu0 %v7109_v32 }
 0x1e8   :  { %3303 = vmatpush1.bf16.msra.mxu1 %v7110_v34 }
 0x1e9   :  { %3687 = vmatpush1.bf16.msra.mxu0 %v7111_v17  ;;  %3305 = vmatprep.subr.bf16.mxu1 %v7112_v38 }
 0x1ea   :  { %3689 = vmatprep.subr.bf16.mxu0 %v7113_v23 }
 0x1ec   :  { %3307 = vmatpush1.bf16.msra.mxu1 %v7114_v13 }
 0x1ed   :  { %3691 = vmatpush1.bf16.msra.mxu0 %v7115_v18  ;;  %3309 = vmatprep.subr.bf16.mxu1 %v7116_v58 }
 0x1ee   :  { %3693 = vmatprep.subr.bf16.mxu0 %v7117_v11 }
 0x1f0   :  { %3311 = vmatpush1.bf16.msra.mxu1 %v7118_v22 }
 0x1f1   :  { %3695 = vmatpush1.bf16.msra.mxu0 %v7119_v39  ;;  %3313 = vmatprep.subr.bf16.mxu1 %v7120_v56 }
 0x1f2   :  { %3697 = vmatprep.subr.bf16.mxu0 %v7121_v14 }
 0x1f4   :  { %3315 = vmatpush1.bf16.msra.mxu1 %v7122_v62 }
 0x1f5   :  { %3699 = vmatpush1.bf16.msra.mxu0 %v7123_v3  ;;  %3317 = vmatprep.subr.bf16.mxu1 %v7124_v60 }
 0x1f6   :  { %3701 = vmatprep.subr.bf16.mxu0 %v7125_v28 }
 0x1f8   :  { %3319 = vmatpush1.bf16.msra.mxu1 %v7126_v2 }
 0x1f9   :  { %3703 = vmatpush1.bf16.msra.mxu0 %v7127_v31 }
 0x1fb   :  { %2921 = vmatmul.mubr.msk.f32.vlgmr.msra.gmra.mrb[0].mxu1 %vm39_vm0, %v6879_v4 }
 0x1fc   :  { %2933 = vmatmul.mubr.msk.f32.vlgmr.msra.gmra.mrb[0].mxu0 %vm41_vm2, %v6879_v4  ;;  %2922 = vmatprep.mubr.msk.f32.mxu1 %vm44_vm5, %v6879_v4 }
 0x1fd   :  { %2934 = vmatprep.mubr.msk.f32.mxu0 %vm46_vm7, %v6879_v4 }
 0x1ff   :  { %2923 = vmatmul.mubr.msk.f32.gmra.mrb[2].mxu1 %vm43_vm4, %v6879_v4 }
 0x200   :  { %2935 = vmatmul.mubr.msk.f32.gmra.mrb[2].mxu0 %vm45_vm6, %v6879_v4 }
 0x2ce   :  { %v1524_v10 = vpop.f32.mrb[0].mxu1 }
 0x2cf   :  { %v2870_v54 = vpop.f32.mrb[0].mxu0  ;;  %v1526_v35 = vpop.f32.mrb[1].mxu1 }
 0x2d0   :  { %v3704_v6 = vadd.f32 %v2870_v54, %v1524_v10  ;;  %v2872_v26 = vpop.f32.mrb[1].mxu0 }
 0x2d1   :  { %v3705_v21 = vadd.f32 %v2872_v26, %v1526_v35 }
 0x2d2   :  { %2883 = vst [vmem:[#allocation5] sm:$0xff] %v3704_v6  ;;  %v1532_v9 = vpop.f32.mrb[2].mxu1 }
 0x2d3   :  { %2884 = vst [vmem:[#allocation5 + $0x8] sm:$0xff] %v3705_v21  ;;  %v2878_v37 = vpop.f32.mrb[2].mxu0  ;;  %v1534_v57 = vpop.f32.mrb[3].mxu1 }
 0x2d4   :  { %v3706_v1 = vadd.f32 %v2878_v37, %v1532_v9  ;;  %v2880_v12 = vpop.f32.mrb[3].mxu0 }
 0x2d5   :  { %v3707_v59 = vadd.f32 %v2880_v12, %v1534_v57 }
 0x2d6   :  { %2885 = vst [vmem:[#allocation5 + $0x10] sm:$0xff] %v3706_v1 }
 0x2d7   :  { %2886 = vst [vmem:[#allocation5 + $0x18] sm:$0xff] %v3707_v59 }
 0x2d8   :  { %3789 = shalt.err (!%p3786_p12)
}
 0x2d9   :  { %s3790_s30 = scalar_lea.hbm %s5775_s2, 512 }
 0x2da   :  { %p3791_p13 = scmp.ne.s32.totalorder %s5775_s2, %s3790_s30  ;;  %p3794_p0 = scmp.lt.u32.totalorder %s3790_s30, %s5775_s2 }
 0x2dc   :  { %p3796_p1 = pnand %p3794_p0, %p3791_p13 }
 0x2de   :  { %3799 = shalt.err (!%p3796_p1)
}
 0x2df   :  { %2898 = dma.vmem_to_hbm [thread:$0]  %s2893_s1, 512, %s5775_s2, [#allocation4], %s3805_s19, %s3805_s19, %s3806_s20  }
 0x2e0   :  { %3802 = dma.done.wait [#allocation4], 512  }
 0x2e1   :  { %3803 = vsyncadd [#allocation4], 4294966784 }
 0x2e2   :  { %2902 = vsyncpa [#allocation3], 1 }
 0x2e3   :  { %2903 = vsyncpa [#allocation4], 1 }

</bundles_post_ra>
